<compile_context>
chip_gen: v7x
topology: tpu7x:2x2x1
jax: 0.10.0
libtpu: 0.0.40
codegen_flags: <defaults>
</compile_context>

<pallas_src>
import functools
import math

import jax
import jax.numpy as jnp
from jax import lax
from jax.experimental import pallas as pl
from jax.experimental.pallas import tpu as pltpu

_EPS = 1e-5
_LANES = 128
_VMEM_LIMIT = 32 * 1024 * 1024          # conservative vs v7x's 64 MiB/TC


def _round_up(x, m):
    return (x + m - 1) // m * m


# ------------------------------ kernel helpers ------------------------------ #

def _bn_scale_shift(stats_ref, gamma_ref, beta_ref, inv_m, eps):
    """Fold global BN stats ([sum; sumsq] over interior pixels) into y*scale + shift."""
    s = stats_ref[0:1, :]
    ss = stats_ref[1:2, :]
    mean = s * inv_m
    var = jnp.maximum(ss * inv_m - mean * mean, 0.0)    # guard catastrophic cancellation
    inv = lax.rsqrt(var + eps)                          # EUP rsqrt (free slot vs VALU)
    scale = inv * gamma_ref[...]
    shift = beta_ref[...] - mean * scale
    return scale, shift


def _partial_stats(y, mask):
    """(2, C) per-tile partial [sum; sum of squares] over interior rows only."""
    ym = y * mask
    return jnp.concatenate(
        [jnp.sum(ym, axis=0, keepdims=True),
         jnp.sum(ym * y, axis=0, keepdims=True)], axis=0)


# ------------------------------ Pallas kernels ------------------------------ #

def _stage1_kernel(x_ref, mask_ref, wcat_ref, bcat_ref,
                   y1_ref, st1_ref, stp_ref, *, c0p):
    # conv1 (1x1, stride) and projection conv (1x1, stride) as ONE matmul with a
    # concatenated RHS [w1 | wp]; projection activations are NOT stored (recomputed
    # in stage 4), only their BN partial stats are emitted here.
    x = x_ref[0]                                         # (TR, Cin_p) bf16
    m = mask_ref[...]                                    # (TR, 1) f32
    yb = jnp.dot(x, wcat_ref[...], preferred_element_type=jnp.float32) + bcat_ref[...]
    y1 = yb[:, :c0p]
    ys = yb[:, c0p:]
    y1_ref[0] = y1.astype(y1_ref.dtype)
    st1_ref[0, 0] = _partial_stats(y1, m)
    stp_ref[0, 0] = _partial_stats(ys, m)


def _stage2_kernel(y1_ref, mask_ref, st1_ref, g1_ref, be1_ref, w2_ref, b2_ref,
                   y2_ref, st2_ref, zcbuf, *, ws, rows, c0p, inv_m, eps):
    # bn1 + relu (global stats), then the 3x3 'same' conv as an in-VMEM im2col along
    # kw (3 column blocks = z shifted by -1/0/+1 rows) and 3 MXU matmuls (K = 3*C0)
    # whose LHS windows start at sublane-aligned offsets (multiples of ws).
    # Accumulation is a register-level chain -> single y2 write, no VMEM RMW.
    m = mask_ref[...]
    scale, shift = _bn_scale_shift(st1_ref, g1_ref, be1_ref, inv_m, eps)
    z = jnp.maximum(y1_ref[0].astype(jnp.float32) * scale + shift, 0.0) * m
    c3 = 3 * c0p
    zero_halo = jnp.zeros((ws, c3), zcbuf.dtype)
    zcbuf[0:ws, :] = zero_halo
    zcbuf[ws + rows:, :] = zero_halo
    zcbuf[ws:ws + rows, c0p:2 * c0p] = z.astype(zcbuf.dtype)          # kw = 1 (centre)
    # kw = 0 / kw = 2 blocks: read the centre block back at +-1 rows (halo rows are 0).
    zcbuf[ws:ws + rows, 0:c0p] = zcbuf[ws - 1:ws - 1 + rows, c0p:2 * c0p]
    zcbuf[ws:ws + rows, 2 * c0p:] = zcbuf[ws + 1:ws + 1 + rows, c0p:2 * c0p]
    acc = jnp.dot(zcbuf[0:rows, :], w2_ref[0], preferred_element_type=jnp.float32)
    acc = acc + jnp.dot(zcbuf[ws:ws + rows, :], w2_ref[1],
                        preferred_element_type=jnp.float32)
    acc = acc + jnp.dot(zcbuf[2 * ws:2 * ws + rows, :], w2_ref[2],
                        preferred_element_type=jnp.float32)
    y2 = acc + b2_ref[...]
    y2_ref[0] = y2.astype(y2_ref.dtype)
    st2_ref[0] = _partial_stats(y2, m)


def _stage3_kernel(y2_ref, mask_ref, st2_ref, g2_ref, be2_ref, w3_ref, b3_ref,
                   y3_ref, st3_ref, *, inv_m, eps):
    # bn2 + relu (global stats) + conv3 (1x1).
    m = mask_ref[...]
    scale, shift = _bn_scale_shift(st2_ref, g2_ref, be2_ref, inv_m, eps)
    a2 = jnp.maximum(y2_ref[0].astype(jnp.float32) * scale + shift, 0.0)
    y3 = jnp.dot(a2.astype(jnp.bfloat16), w3_ref[...],
                 preferred_element_type=jnp.float32) + b3_ref[...]
    y3_ref[0] = y3.astype(y3_ref.dtype)
    st3_ref[0, 0] = _partial_stats(y3, m)


def _stage4_kernel(y3_ref, x_ref, st3_ref, g3_ref, be3_ref,
                   stp_ref, gp_ref, bep_ref, wp_ref, bp_ref, o_ref, *, inv_m, eps):
    # bn3 + projection conv recompute (1x1) + proj-bn + residual add + ReLU.
    s3, sh3 = _bn_scale_shift(st3_ref, g3_ref, be3_ref, inv_m, eps)
    sp, shp = _bn_scale_shift(stp_ref, gp_ref, bep_ref, inv_m, eps)
    ys = jnp.dot(x_ref[0], wp_ref[...], preferred_element_type=jnp.float32) + bp_ref[...]
    y3 = y3_ref[0].astype(jnp.float32)
    o_ref[0] = jnp.maximum(y3 * s3 + sh3 + ys * sp + shp, 0.0).astype(o_ref.dtype)


# ------------------------------ module forward ----------------------------- #

def bottleneck_forward(x_nchw, p, stride=2):
    N, Cin, H, W = x_nchw.shape
    C0 = p['w1'].shape[1]
    C1, C2 = p['w3'].shape
    Ho = (H - 1) // stride + 1
    Wo = (W - 1) // stride + 1
    Hp = Ho + 2
    Ws = _round_up(Wo + 2, 16)          # plane width: zero halo, rounded so the +-Ws
                                        # row shifts in stage 2 are sublane aligned
    Rpl = Hp * Ws                       # rows of one padded image plane (mult of 16)
    TR = Rpl if Rpl <= 1024 else 512    # row tile for the row-parallel stages
    Rp = _round_up(Rpl, TR)
    NR = Rp // TR

    Cin_p = _round_up(Cin, _LANES)
    C0_p = _round_up(C0, _LANES)
    C1_p = _round_up(C1, _LANES)
    C2_p = _round_up(C2, _LANES)

    inv_m = 1.0 / float(N * Ho * Wo)    # BN divisor: interior pixels only

    # ---- XLA glue: layout / padding / dtype prep (no compute) ---- #
    x = jnp.transpose(x_nchw, (0, 2, 3, 1))                         # NHWC
    xs = x[:, ::stride, ::stride, :]                                # 1x1 stride-s conv == subsample
    xsp = jnp.pad(xs, ((0, 0), (1, 1), (1, Ws - 1 - Wo), (0, Cin_p - Cin)))
    xsp = xsp.reshape(N, Rpl, Cin_p)
    if Rp > Rpl:
        xsp = jnp.pad(xsp, ((0, 0), (0, Rp - Rpl), (0, 0)))
    xsp = xsp.astype(jnp.bfloat16)

    hh = jnp.arange(Hp)[:, None]
    ww = jnp.arange(Ws)[None, :]
    interior = (hh >= 1) & (hh <= Ho) & (ww >= 1) & (ww <= Wo)
    mask = interior.astype(jnp.float32).reshape(Rpl, 1)
    mask = jnp.pad(mask, ((0, Rp - Rpl), (0, 0)))                   # (Rp, 1)

    def padw(w, rows, cols):
        return jnp.pad(w, ((0, rows - w.shape[0]), (0, cols - w.shape[1])))

    def padv(v, cols):
        return jnp.pad(v, ((0, 0), (0, cols - v.shape[1])))

    w1p = padw(p['w1'], Cin_p, C0_p)
    wpp = padw(p['wp'], Cin_p, C2_p)
    wcat = jnp.concatenate([w1p, wpp], axis=1).astype(jnp.bfloat16)  # [conv1 | proj]
    wpp = wpp.astype(jnp.bfloat16)
    w3 = padw(p['w3'], C1_p, C2_p).astype(jnp.bfloat16)
    w2 = jnp.pad(p['w2_hwio'], ((0, 0), (0, 0), (0, C0_p - C0), (0, C1_p - C1)))
    w2 = w2.reshape(3, 3 * C0_p, C1_p).astype(jnp.bfloat16)          # rows: kw*C0_p + c

    b1 = padv(p['b1'], C0_p); g1 = padv(p['g1'], C0_p); be1 = padv(p['be1'], C0_p)
    b2 = padv(p['b2'], C1_p); g2 = padv(p['g2'], C1_p); be2 = padv(p['be2'], C1_p)
    b3 = padv(p['b3'], C2_p); g3 = padv(p['g3'], C2_p); be3 = padv(p['be3'], C2_p)
    bp = padv(p['bp'], C2_p); gp = padv(p['gp'], C2_p); bep = padv(p['bep'], C2_p)
    bcat = jnp.concatenate([b1, bp], axis=1)

    # ---- BlockSpecs: stages 1/3/4 grid = (N, row tiles); stage 2 grid = (N,) ---- #
    def img_rt(c):
        return pl.BlockSpec((1, TR, c), lambda n, r: (n, r, 0))

    def stat_rt(c):
        return pl.BlockSpec((1, 1, 2, c), lambda n, r: (n, r, 0, 0))

    def full_rt(rows, cols):
        return pl.BlockSpec((rows, cols), lambda n, r: (0, 0))

    mask_rt = pl.BlockSpec((TR, 1), lambda n, r: (r, 0))

    def img_n(c):
        return pl.BlockSpec((1, Rp, c), lambda n: (n, 0, 0))

    def stat_n(c):
        return pl.BlockSpec((1, 2, c), lambda n: (n, 0, 0))

    def full_n(rows, cols):
        return pl.BlockSpec((rows, cols), lambda n: (0, 0))

    mask_n = pl.BlockSpec((Rp, 1), lambda n: (0, 0))
    w2_spec = pl.BlockSpec((3, 3 * C0_p, C1_p), lambda n: (0, 0, 0))

    cp_rt = pltpu.CompilerParams(dimension_semantics=("parallel", "parallel"),
                                 vmem_limit_bytes=_VMEM_LIMIT)
    cp_n = pltpu.CompilerParams(dimension_semantics=("parallel",),
                                vmem_limit_bytes=_VMEM_LIMIT)

    # ---- stage 1: fused conv1 + projection conv, BN partial stats ---- #
    kern1 = functools.partial(_stage1_kernel, c0p=C0_p)
    y1_pre, st1_p, stp_p = pl.pallas_call(
        kern1,
        grid=(N, NR),
        in_specs=[img_rt(Cin_p), mask_rt,
                  full_rt(Cin_p, C0_p + C2_p), full_rt(1, C0_p + C2_p)],
        out_specs=[img_rt(C0_p), stat_rt(C0_p), stat_rt(C2_p)],
        out_shape=[jax.ShapeDtypeStruct((N, Rp, C0_p), jnp.bfloat16),
                   jax.ShapeDtypeStruct((N, NR, 2, C0_p), jnp.float32),
                   jax.ShapeDtypeStruct((N, NR, 2, C2_p), jnp.float32)],
        compiler_params=cp_rt,
    )(xsp, mask, wcat, bcat)
    st1 = jnp.sum(st1_p, axis=(0, 1))           # exact global BN stats (tiny XLA reduce)
    stp = jnp.sum(stp_p, axis=(0, 1))

    # ---- stage 2: bn1+relu, 3x3 conv (im2col along kw, 3 matmuls), bn2 stats ---- #
    kern2 = functools.partial(_stage2_kernel, ws=Ws, rows=Rp, c0p=C0_p,
                              inv_m=inv_m, eps=_EPS)
    y2_pre, st2_p = pl.pallas_call(
        kern2,
        grid=(N,),
        in_specs=[img_n(C0_p), mask_n, full_n(2, C0_p),
                  full_n(1, C0_p), full_n(1, C0_p),
                  w2_spec, full_n(1, C1_p)],
        out_specs=[img_n(C1_p), stat_n(C1_p)],
        out_shape=[jax.ShapeDtypeStruct((N, Rp, C1_p), jnp.bfloat16),
                   jax.ShapeDtypeStruct((N, 2, C1_p), jnp.float32)],
        scratch_shapes=[pltpu.VMEM((Rp + 2 * Ws, 3 * C0_p), jnp.bfloat16)],
        compiler_params=cp_n,
    )(y1_pre, mask, st1, g1, be1, w2, b2)
    st2 = jnp.sum(st2_p, axis=0)

    # ---- stage 3: bn2+relu, conv3 (1x1), bn3 stats ---- #
    kern3 = functools.partial(_stage3_kernel, inv_m=inv_m, eps=_EPS)
    y3_pre, st3_p = pl.pallas_call(
        kern3,
        grid=(N, NR),
        in_specs=[img_rt(C1_p), mask_rt, full_rt(2, C1_p),
                  full_rt(1, C1_p), full_rt(1, C1_p),
                  full_rt(C1_p, C2_p), full_rt(1, C2_p)],
        out_specs=[img_rt(C2_p), stat_rt(C2_p)],
        out_shape=[jax.ShapeDtypeStruct((N, Rp, C2_p), jnp.bfloat16),
                   jax.ShapeDtypeStruct((N, NR, 2, C2_p), jnp.float32)],
        compiler_params=cp_rt,
    )(y2_pre, mask, st2, g2, be2, w3, b3)
    st3 = jnp.sum(st3_p, axis=(0, 1))

    # ---- stage 4: bn3 + proj recompute + proj-bn + residual + ReLU (bf16 store) ---- #
    kern4 = functools.partial(_stage4_kernel, inv_m=inv_m, eps=_EPS)
    out_pad = pl.pallas_call(
        kern4,
        grid=(N, NR),
        in_specs=[img_rt(C2_p), img_rt(Cin_p), full_rt(2, C2_p),
                  full_rt(1, C2_p), full_rt(1, C2_p),
                  full_rt(2, C2_p), full_rt(1, C2_p), full_rt(1, C2_p),
                  full_rt(Cin_p, C2_p), full_rt(1, C2_p)],
        out_specs=img_rt(C2_p),
        out_shape=jax.ShapeDtypeStruct((N, Rp, C2_p), jnp.bfloat16),
        compiler_params=cp_rt,
    )(y3_pre, xsp, st3, g3, be3, stp, gp, bep, wpp, bp)

    # ---- XLA glue: strip halo / channel padding, back to NCHW f32 ---- #
    out = out_pad[:, :Rpl, :].reshape(N, Hp, Ws, C2_p)[:, 1:1 + Ho, 1:1 + Wo, :C2]
    return jnp.transpose(out, (0, 3, 1, 2)).astype(jnp.float32)


# --------------------------- deterministic params --------------------------- #

def init_params(key, in_channels, out_channels):
    c0, c1, c2 = out_channels
    ks = jax.random.split(key, 8)

    def kaiming(k, shape, fan_out):  # kaiming_normal_(mode='fan_out', relu)
        return (math.sqrt(2.0 / fan_out) * jax.random.normal(k, shape)).astype(jnp.float32)

    def bias(k, shape, fan_in):      # PyTorch Conv2d default bias init
        bound = 1.0 / math.sqrt(fan_in)
        return jax.random.uniform(k, shape, jnp.float32, -bound, bound)

    p = {}
    p['w1'] = kaiming(ks[0], (in_channels, c0), c0 * 1 * 1)          # (Cin, C0)
    p['b1'] = bias(ks[1], (1, c0), in_channels * 1 * 1)
    p['w2_hwio'] = kaiming(ks[2], (3, 3, c0, c1), c1 * 3 * 3)        # (kh, kw, C0, C1)
    p['b2'] = bias(ks[3], (1, c1), c0 * 3 * 3)
    p['w3'] = kaiming(ks[4], (c1, c2), c2 * 1 * 1)
    p['b3'] = bias(ks[5], (1, c2), c1 * 1 * 1)
    p['wp'] = kaiming(ks[6], (in_channels, c2), c2 * 1 * 1)
    p['bp'] = bias(ks[7], (1, c2), in_channels * 1 * 1)
    for name, c in (('1', c0), ('2', c1), ('3', c2), ('p', c2)):     # BN defaults
        p['g' + name] = jnp.ones((1, c), jnp.float32)
        p['be' + name] = jnp.zeros((1, c), jnp.float32)
    return p


# ------------------------------ JAX reference ------------------------------ #

def reference_forward(x_nchw, p, stride=2):
    def conv(x, w_oihw, b, s, pad):
        y = lax.conv_general_dilated(x, w_oihw, (s, s), pad,
                                     dimension_numbers=('NCHW', 'OIHW', 'NCHW'))
        return y + b.reshape(1, -1, 1, 1)

    def bn(x, g, be):
        mean = jnp.mean(x, axis=(0, 2, 3), keepdims=True)
        var = jnp.mean(jnp.square(x - mean), axis=(0, 2, 3), keepdims=True)
        xn = (x - mean) / jnp.sqrt(var + _EPS)
        return xn * g.reshape(1, -1, 1, 1) + be.reshape(1, -1, 1, 1)

    w1 = p['w1'].T[:, :, None, None]
    w2 = jnp.transpose(p['w2_hwio'], (3, 2, 0, 1))
    w3 = p['w3'].T[:, :, None, None]
    wp = p['wp'].T[:, :, None, None]

    out = conv(x_nchw, w1, p['b1'][0], stride, 'VALID')
    out = jax.nn.relu(bn(out, p['g1'], p['be1']))
    out = conv(out, w2, p['b2'][0], 1, [(1, 1), (1, 1)])
    out = jax.nn.relu(bn(out, p['g2'], p['be2']))
    out = conv(out, w3, p['b3'][0], 1, 'VALID')
    out = bn(out, p['g3'], p['be3'])
    sc = conv(x_nchw, wp, p['bp'][0], stride, 'VALID')
    sc = bn(sc, p['gp'], p['bep'])
    return jax.nn.relu(out + sc)


if __name__ == "__main__":
    key = jax.random.PRNGKey(0)
    k_param, k_x = jax.random.split(key)

    in_channels = 4
    out_channels = (8, 8, 16)
    stride = 2

    params = init_params(k_param, in_channels, out_channels)
    x = jax.random.normal(k_x, (2, in_channels, 16, 16), jnp.float32)

    fwd = jax.jit(functools.partial(bottleneck_forward, stride=stride))
    out = jax.block_until_ready(fwd(x, params))

    ref = reference_forward(x, params, stride=stride)
    assert out.shape == ref.shape == (2, out_channels[2], 8, 8), (out.shape, ref.shape)
    # bf16 MXU inputs / bf16 intermediates (f32 accumulate, f32 BN math) -> bf16-grade tol.
    assert bool(jnp.allclose(out, ref, atol=5e-2, rtol=5e-2)), "mismatch vs JAX reference"

    print("KERNEL_OK")
</pallas_src>

<mosaic_0001>
module attributes {stable_mosaic.version = 11 : i64} {
  func.func @_stage1_kernel(%arg0: i32, %arg1: i32, %arg2: memref<1x160x128xbf16, #tpu.memory_space<vmem>>, %arg3: memref<160x1xf32, #tpu.memory_space<vmem>>, %arg4: memref<128x256xbf16, #tpu.memory_space<vmem>>, %arg5: memref<1x256xf32, #tpu.memory_space<vmem>>, %arg6: memref<1x160x128xbf16, #tpu.memory_space<vmem>>, %arg7: memref<1x1x2x128xf32, #tpu.memory_space<vmem>>, %arg8: memref<1x1x2x128xf32, #tpu.memory_space<vmem>>) attributes {dimension_semantics = [#tpu.dimension_semantics<parallel>, #tpu.dimension_semantics<parallel>], iteration_bounds = array<i64: 2, 1>, scalar_prefetch = 0 : i64, scratch_operands = 0 : i64, tpu.core_type = #tpu.core_type<tc>, window_params = [{transform_indices = @transform_0, window_bounds = array<i64: 1, 160, 128>}, {transform_indices = @transform_1, window_bounds = array<i64: 160, 1>}, {pipeline_mode = #tpu.pipeline_mode<synchronous>, transform_indices = @transform_2, window_bounds = array<i64: 128, 256>}, {pipeline_mode = #tpu.pipeline_mode<synchronous>, transform_indices = @transform_3, window_bounds = array<i64: 1, 256>}, {transform_indices = @transform_4, window_bounds = array<i64: 1, 160, 128>}, {transform_indices = @transform_5, window_bounds = array<i64: 1, 1, 2, 128>}, {transform_indices = @transform_6, window_bounds = array<i64: 1, 1, 2, 128>}]} {
    %c0 = arith.constant 0 : index
    %c0_0 = arith.constant 0 : index
    %c0_1 = arith.constant 0 : index
    %0 = vector.load %arg2[%c0, %c0_0, %c0_1] : memref<1x160x128xbf16, #tpu.memory_space<vmem>>, vector<1x160x128xbf16>
    %1 = vector.shape_cast %0 : vector<1x160x128xbf16> to vector<160x128xbf16>
    %c0_2 = arith.constant 0 : index
    %c0_3 = arith.constant 0 : index
    %2 = vector.load %arg3[%c0_2, %c0_3] : memref<160x1xf32, #tpu.memory_space<vmem>>, vector<160x1xf32>
    %c0_4 = arith.constant 0 : index
    %c0_5 = arith.constant 0 : index
    %3 = vector.load %arg4[%c0_4, %c0_5] : memref<128x256xbf16, #tpu.memory_space<vmem>>, vector<128x256xbf16>
    %cst = arith.constant dense<0.000000e+00> : vector<160x256xf32>
    %4 = tpu.matmul %1, %3, %cst {dimension_numbers = #tpu.dot_dimension_numbers<[1], [0], [0], [1], [0, 0, 1, 1], [], []>} : vector<160x128xbf16>, vector<128x256xbf16>, vector<160x256xf32> -> vector<160x256xf32>
    %c0_6 = arith.constant 0 : index
    %c0_7 = arith.constant 0 : index
    %5 = vector.load %arg5[%c0_6, %c0_7] : memref<1x256xf32, #tpu.memory_space<vmem>>, vector<1x256xf32>
    %6 = vector.broadcast %5 : vector<1x256xf32> to vector<160x256xf32>
    %7 = arith.addf %4, %6 : vector<160x256xf32>
    %8 = vector.extract_strided_slice %7 {offsets = [0, 0], sizes = [160, 128], strides = [1, 1]} : vector<160x256xf32> to vector<160x128xf32>
    %9 = vector.extract_strided_slice %7 {offsets = [0, 128], sizes = [160, 128], strides = [1, 1]} : vector<160x256xf32> to vector<160x128xf32>
    %10 = arith.truncf %8 : vector<160x128xf32> to vector<160x128xbf16>
    %c0_8 = arith.constant 0 : index
    %c0_9 = arith.constant 0 : index
    %c0_10 = arith.constant 0 : index
    %11 = vector.load %arg6[%c0_8, %c0_9, %c0_10] : memref<1x160x128xbf16, #tpu.memory_space<vmem>>, vector<1x160x128xbf16>
    %12 = vector.shape_cast %11 : vector<1x160x128xbf16> to vector<160x128xbf16>
    %13 = vector.shape_cast %10 : vector<160x128xbf16> to vector<1x160x128xbf16>
    tpu.vector_store %arg6[%c0_8, %c0_9, %c0_10], %13 {strides = array<i32>} : memref<1x160x128xbf16, #tpu.memory_space<vmem>>, vector<1x160x128xbf16>,
    %14 = vector.broadcast %2 : vector<160x1xf32> to vector<160x128xf32>
    %15 = arith.mulf %8, %14 : vector<160x128xf32>
    %cst_11 = arith.constant dense<0.000000e+00> : vector<128xf32>
    %16 = vector.multi_reduction <add>, %15, %cst_11 [0] : vector<160x128xf32> to vector<128xf32>
    %17 = vector.shape_cast %16 : vector<128xf32> to vector<1x128xf32>
    %18 = arith.mulf %15, %8 : vector<160x128xf32>
    %cst_12 = arith.constant dense<0.000000e+00> : vector<128xf32>
    %19 = vector.multi_reduction <add>, %18, %cst_12 [0] : vector<160x128xf32> to vector<128xf32>
    %20 = vector.shape_cast %19 : vector<128xf32> to vector<1x128xf32>
    %21 = tpu.concatenate %17, %20 in 0 : vector<1x128xf32>, vector<1x128xf32> -> vector<2x128xf32>
    %c0_13 = arith.constant 0 : index
    %c0_14 = arith.constant 0 : index
    %c0_15 = arith.constant 0 : index
    %c0_16 = arith.constant 0 : index
    %22 = vector.load %arg7[%c0_13, %c0_14, %c0_15, %c0_16] : memref<1x1x2x128xf32, #tpu.memory_space<vmem>>, vector<1x1x2x128xf32>
    %23 = vector.shape_cast %22 : vector<1x1x2x128xf32> to vector<2x128xf32>
    %24 = vector.shape_cast %21 : vector<2x128xf32> to vector<1x1x2x128xf32>
    tpu.vector_store %arg7[%c0_13, %c0_14, %c0_15, %c0_16], %24 {strides = array<i32>} : memref<1x1x2x128xf32, #tpu.memory_space<vmem>>, vector<1x1x2x128xf32>,
    %25 = vector.broadcast %2 : vector<160x1xf32> to vector<160x128xf32>
    %26 = arith.mulf %9, %25 : vector<160x128xf32>
    %cst_17 = arith.constant dense<0.000000e+00> : vector<128xf32>
    %27 = vector.multi_reduction <add>, %26, %cst_17 [0] : vector<160x128xf32> to vector<128xf32>
    %28 = vector.shape_cast %27 : vector<128xf32> to vector<1x128xf32>
    %29 = arith.mulf %26, %9 : vector<160x128xf32>
    %cst_18 = arith.constant dense<0.000000e+00> : vector<128xf32>
    %30 = vector.multi_reduction <add>, %29, %cst_18 [0] : vector<160x128xf32> to vector<128xf32>
    %31 = vector.shape_cast %30 : vector<128xf32> to vector<1x128xf32>
    %32 = tpu.concatenate %28, %31 in 0 : vector<1x128xf32>, vector<1x128xf32> -> vector<2x128xf32>
    %c0_19 = arith.constant 0 : index
    %c0_20 = arith.constant 0 : index
    %c0_21 = arith.constant 0 : index
    %c0_22 = arith.constant 0 : index
    %33 = vector.load %arg8[%c0_19, %c0_20, %c0_21, %c0_22] : memref<1x1x2x128xf32, #tpu.memory_space<vmem>>, vector<1x1x2x128xf32>
    %34 = vector.shape_cast %33 : vector<1x1x2x128xf32> to vector<2x128xf32>
    %35 = vector.shape_cast %32 : vector<2x128xf32> to vector<1x1x2x128xf32>
    tpu.vector_store %arg8[%c0_19, %c0_20, %c0_21, %c0_22], %35 {strides = array<i32>} : memref<1x1x2x128xf32, #tpu.memory_space<vmem>>, vector<1x1x2x128xf32>,
    return
  }
  func.func @transform_0(%arg0: i32, %arg1: i32) -> (i32, i32, i32) {
    %c0_i32 = arith.constant 0 : i32
    %c0_i32_0 = arith.constant 0 : i32
    return %arg0, %arg1, %c0_i32 : i32, i32, i32
  }
  func.func @transform_1(%arg0: i32, %arg1: i32) -> (i32, i32) {
    %c0_i32 = arith.constant 0 : i32
    %c0_i32_0 = arith.constant 0 : i32
    return %arg1, %c0_i32 : i32, i32
  }
  func.func @transform_2(%arg0: i32, %arg1: i32) -> (i32, i32) {
    %c0_i32 = arith.constant 0 : i32
    %c0_i32_0 = arith.constant 0 : i32
    %c0_i32_1 = arith.constant 0 : i32
    return %c0_i32, %c0_i32_0 : i32, i32
  }
  func.func @transform_3(%arg0: i32, %arg1: i32) -> (i32, i32) {
    %c0_i32 = arith.constant 0 : i32
    %c0_i32_0 = arith.constant 0 : i32
    %c0_i32_1 = arith.constant 0 : i32
    return %c0_i32, %c0_i32_0 : i32, i32
  }
  func.func @transform_4(%arg0: i32, %arg1: i32) -> (i32, i32, i32) {
    %c0_i32 = arith.constant 0 : i32
    %c0_i32_0 = arith.constant 0 : i32
    return %arg0, %arg1, %c0_i32 : i32, i32, i32
  }
  func.func @transform_5(%arg0: i32, %arg1: i32) -> (i32, i32, i32, i32) {
    %c0_i32 = arith.constant 0 : i32
    %c0_i32_0 = arith.constant 0 : i32
    %c0_i32_1 = arith.constant 0 : i32
    return %arg0, %arg1, %c0_i32, %c0_i32_0 : i32, i32, i32, i32
  }
  func.func @transform_6(%arg0: i32, %arg1: i32) -> (i32, i32, i32, i32) {
    %c0_i32 = arith.constant 0 : i32
    %c0_i32_0 = arith.constant 0 : i32
    %c0_i32_1 = arith.constant 0 : i32
    return %arg0, %arg1, %c0_i32, %c0_i32_0 : i32, i32, i32, i32
  }
}

module attributes {stable_mosaic.version = 11 : i64} {
  func.func @_stage2_kernel(%arg0: i32, %arg1: memref<1x160x128xbf16, #tpu.memory_space<vmem>>, %arg2: memref<160x1xf32, #tpu.memory_space<vmem>>, %arg3: memref<2x128xf32, #tpu.memory_space<vmem>>, %arg4: memref<1x128xf32, #tpu.memory_space<vmem>>, %arg5: memref<1x128xf32, #tpu.memory_space<vmem>>, %arg6: memref<3x384x128xbf16, #tpu.memory_space<vmem>>, %arg7: memref<1x128xf32, #tpu.memory_space<vmem>>, %arg8: memref<1x160x128xbf16, #tpu.memory_space<vmem>>, %arg9: memref<1x2x128xf32, #tpu.memory_space<vmem>>, %arg10: memref<192x384xbf16, #tpu.memory_space<vmem>>) attributes {dimension_semantics = [#tpu.dimension_semantics<parallel>], iteration_bounds = array<i64: 2>, scalar_prefetch = 0 : i64, scratch_operands = 1 : i64, tpu.core_type = #tpu.core_type<tc>, window_params = [{transform_indices = @transform_0, window_bounds = array<i64: 1, 160, 128>}, {pipeline_mode = #tpu.pipeline_mode<synchronous>, transform_indices = @transform_1, window_bounds = array<i64: 160, 1>}, {pipeline_mode = #tpu.pipeline_mode<synchronous>, transform_indices = @transform_2, window_bounds = array<i64: 2, 128>}, {pipeline_mode = #tpu.pipeline_mode<synchronous>, transform_indices = @transform_3, window_bounds = array<i64: 1, 128>}, {pipeline_mode = #tpu.pipeline_mode<synchronous>, transform_indices = @transform_4, window_bounds = array<i64: 1, 128>}, {pipeline_mode = #tpu.pipeline_mode<synchronous>, transform_indices = @transform_5, window_bounds = array<i64: 3, 384, 128>}, {pipeline_mode = #tpu.pipeline_mode<synchronous>, transform_indices = @transform_6, window_bounds = array<i64: 1, 128>}, {transform_indices = @transform_7, window_bounds = array<i64: 1, 160, 128>}, {transform_indices = @transform_8, window_bounds = array<i64: 1, 2, 128>}]} {
    %c0 = arith.constant 0 : index
    %c0_0 = arith.constant 0 : index
    %0 = vector.load %arg2[%c0, %c0_0] : memref<160x1xf32, #tpu.memory_space<vmem>>, vector<160x1xf32>
    %c0_1 = arith.constant 0 : index
    %c0_2 = arith.constant 0 : index
    %1 = vector.load %arg3[%c0_1, %c0_2] : memref<2x128xf32, #tpu.memory_space<vmem>>, vector<1x128xf32>
    %c1 = arith.constant 1 : index
    %c0_3 = arith.constant 0 : index
    %2 = vector.load %arg3[%c1, %c0_3] : memref<2x128xf32, #tpu.memory_space<vmem>>, vector<1x128xf32>
    %cst = arith.constant 7.812500e-03 : f32
    %3 = vector.broadcast %cst : f32 to vector<1x128xf32>
    %4 = arith.mulf %1, %3 : vector<1x128xf32>
    %cst_4 = arith.constant 7.812500e-03 : f32
    %5 = vector.broadcast %cst_4 : f32 to vector<1x128xf32>
    %6 = arith.mulf %2, %5 : vector<1x128xf32>
    %7 = arith.mulf %4, %4 : vector<1x128xf32>
    %8 = arith.subf %6, %7 : vector<1x128xf32>
    %cst_5 = arith.constant 0.000000e+00 : f32
    %9 = vector.broadcast %cst_5 : f32 to vector<1x128xf32>
    %10 = arith.maximumf %8, %9 : vector<1x128xf32>
    %cst_6 = arith.constant 9.99999974E-6 : f32
    %11 = vector.broadcast %cst_6 : f32 to vector<1x128xf32>
    %12 = arith.addf %10, %11 : vector<1x128xf32>
    %13 = math.rsqrt %12 : vector<1x128xf32>
    %c0_7 = arith.constant 0 : index
    %c0_8 = arith.constant 0 : index
    %14 = vector.load %arg4[%c0_7, %c0_8] : memref<1x128xf32, #tpu.memory_space<vmem>>, vector<1x128xf32>
    %15 = arith.mulf %13, %14 : vector<1x128xf32>
    %c0_9 = arith.constant 0 : index
    %c0_10 = arith.constant 0 : index
    %16 = vector.load %arg5[%c0_9, %c0_10] : memref<1x128xf32, #tpu.memory_space<vmem>>, vector<1x128xf32>
    %17 = arith.mulf %4, %15 : vector<1x128xf32>
    %18 = arith.subf %16, %17 : vector<1x128xf32>
    %c0_11 = arith.constant 0 : index
    %c0_12 = arith.constant 0 : index
    %c0_13 = arith.constant 0 : index
    %19 = vector.load %arg1[%c0_11, %c0_12, %c0_13] : memref<1x160x128xbf16, #tpu.memory_space<vmem>>, vector<1x160x128xbf16>
    %20 = vector.shape_cast %19 : vector<1x160x128xbf16> to vector<160x128xbf16>
    %21 = arith.extf %20 : vector<160x128xbf16> to vector<160x128xf32>
    %22 = vector.broadcast %15 : vector<1x128xf32> to vector<160x128xf32>
    %23 = arith.mulf %21, %22 : vector<160x128xf32>
    %24 = vector.broadcast %18 : vector<1x128xf32> to vector<160x128xf32>
    %25 = arith.addf %23, %24 : vector<160x128xf32>
    %cst_14 = arith.constant 0.000000e+00 : f32
    %26 = vector.broadcast %cst_14 : f32 to vector<160x128xf32>
    %27 = arith.maximumf %25, %26 : vector<160x128xf32>
    %28 = vector.broadcast %0 : vector<160x1xf32> to vector<160x128xf32>
    %29 = arith.mulf %27, %28 : vector<160x128xf32>
    %cst_15 = arith.constant 0.000000e+00 : bf16
    %30 = vector.broadcast %cst_15 : bf16 to vector<16x384xbf16>
    %c0_16 = arith.constant 0 : index
    %c0_17 = arith.constant 0 : index
    %31 = vector.load %arg10[%c0_16, %c0_17] : memref<192x384xbf16, #tpu.memory_space<vmem>>, vector<16x384xbf16>
    tpu.vector_store %arg10[%c0_16, %c0_17], %30 {strides = array<i32>} : memref<192x384xbf16, #tpu.memory_space<vmem>>, vector<16x384xbf16>,
    %c176 = arith.constant 176 : index
    %c0_18 = arith.constant 0 : index
    %32 = vector.load %arg10[%c176, %c0_18] : memref<192x384xbf16, #tpu.memory_space<vmem>>, vector<16x384xbf16>
    tpu.vector_store %arg10[%c176, %c0_18], %30 {strides = array<i32>} : memref<192x384xbf16, #tpu.memory_space<vmem>>, vector<16x384xbf16>,
    %33 = arith.truncf %29 : vector<160x128xf32> to vector<160x128xbf16>
    %c16 = arith.constant 16 : index
    %c128 = arith.constant 128 : index
    %34 = vector.load %arg10[%c16, %c128] : memref<192x384xbf16, #tpu.memory_space<vmem>>, vector<160x128xbf16>
    tpu.vector_store %arg10[%c16, %c128], %33 {strides = array<i32>} : memref<192x384xbf16, #tpu.memory_space<vmem>>, vector<160x128xbf16>,
    %c15 = arith.constant 15 : index
    %c128_19 = arith.constant 128 : index
    %35 = vector.load %arg10[%c15, %c128_19] : memref<192x384xbf16, #tpu.memory_space<vmem>>, vector<160x128xbf16>
    %c16_20 = arith.constant 16 : index
    %c0_21 = arith.constant 0 : index
    %36 = vector.load %arg10[%c16_20, %c0_21] : memref<192x384xbf16, #tpu.memory_space<vmem>>, vector<160x128xbf16>
    tpu.vector_store %arg10[%c16_20, %c0_21], %35 {strides = array<i32>} : memref<192x384xbf16, #tpu.memory_space<vmem>>, vector<160x128xbf16>,
    %c17 = arith.constant 17 : index
    %c128_22 = arith.constant 128 : index
    %37 = vector.load %arg10[%c17, %c128_22] : memref<192x384xbf16, #tpu.memory_space<vmem>>, vector<160x128xbf16>
    %c16_23 = arith.constant 16 : index
    %c256 = arith.constant 256 : index
    %38 = vector.load %arg10[%c16_23, %c256] : memref<192x384xbf16, #tpu.memory_space<vmem>>, vector<160x128xbf16>
    tpu.vector_store %arg10[%c16_23, %c256], %37 {strides = array<i32>} : memref<192x384xbf16, #tpu.memory_space<vmem>>, vector<160x128xbf16>,
    %c0_24 = arith.constant 0 : index
    %c0_25 = arith.constant 0 : index
    %39 = vector.load %arg10[%c0_24, %c0_25] : memref<192x384xbf16, #tpu.memory_space<vmem>>, vector<160x384xbf16>
    %c0_26 = arith.constant 0 : index
    %c0_27 = arith.constant 0 : index
    %c0_28 = arith.constant 0 : index
    %40 = vector.load %arg6[%c0_26, %c0_27, %c0_28] : memref<3x384x128xbf16, #tpu.memory_space<vmem>>, vector<1x384x128xbf16>
    %41 = vector.shape_cast %40 : vector<1x384x128xbf16> to vector<384x128xbf16>
    %cst_29 = arith.constant dense<0.000000e+00> : vector<160x128xf32>
    %42 = tpu.matmul %39, %41, %cst_29 {dimension_numbers = #tpu.dot_dimension_numbers<[1], [0], [0], [1], [0, 0, 1, 1], [], []>} : vector<160x384xbf16>, vector<384x128xbf16>, vector<160x128xf32> -> vector<160x128xf32>
    %c16_30 = arith.constant 16 : index
    %c0_31 = arith.constant 0 : index
    %43 = vector.load %arg10[%c16_30, %c0_31] : memref<192x384xbf16, #tpu.memory_space<vmem>>, vector<160x384xbf16>
    %c1_32 = arith.constant 1 : index
    %c0_33 = arith.constant 0 : index
    %c0_34 = arith.constant 0 : index
    %44 = vector.load %arg6[%c1_32, %c0_33, %c0_34] : memref<3x384x128xbf16, #tpu.memory_space<vmem>>, vector<1x384x128xbf16>
    %45 = vector.shape_cast %44 : vector<1x384x128xbf16> to vector<384x128xbf16>
    %cst_35 = arith.constant dense<0.000000e+00> : vector<160x128xf32>
    %46 = tpu.matmul %43, %45, %cst_35 {dimension_numbers = #tpu.dot_dimension_numbers<[1], [0], [0], [1], [0, 0, 1, 1], [], []>} : vector<160x384xbf16>, vector<384x128xbf16>, vector<160x128xf32> -> vector<160x128xf32>
    %47 = arith.addf %42, %46 : vector<160x128xf32>
    %c32 = arith.constant 32 : index
    %c0_36 = arith.constant 0 : index
    %48 = vector.load %arg10[%c32, %c0_36] : memref<192x384xbf16, #tpu.memory_space<vmem>>, vector<160x384xbf16>
    %c2 = arith.constant 2 : index
    %c0_37 = arith.constant 0 : index
    %c0_38 = arith.constant 0 : index
    %49 = vector.load %arg6[%c2, %c0_37, %c0_38] : memref<3x384x128xbf16, #tpu.memory_space<vmem>>, vector<1x384x128xbf16>
    %50 = vector.shape_cast %49 : vector<1x384x128xbf16> to vector<384x128xbf16>
    %cst_39 = arith.constant dense<0.000000e+00> : vector<160x128xf32>
    %51 = tpu.matmul %48, %50, %cst_39 {dimension_numbers = #tpu.dot_dimension_numbers<[1], [0], [0], [1], [0, 0, 1, 1], [], []>} : vector<160x384xbf16>, vector<384x128xbf16>, vector<160x128xf32> -> vector<160x128xf32>
    %52 = arith.addf %47, %51 : vector<160x128xf32>
    %c0_40 = arith.constant 0 : index
    %c0_41 = arith.constant 0 : index
    %53 = vector.load %arg7[%c0_40, %c0_41] : memref<1x128xf32, #tpu.memory_space<vmem>>, vector<1x128xf32>
    %54 = vector.broadcast %53 : vector<1x128xf32> to vector<160x128xf32>
    %55 = arith.addf %52, %54 : vector<160x128xf32>
    %56 = arith.truncf %55 : vector<160x128xf32> to vector<160x128xbf16>
    %c0_42 = arith.constant 0 : index
    %c0_43 = arith.constant 0 : index
    %c0_44 = arith.constant 0 : index
    %57 = vector.load %arg8[%c0_42, %c0_43, %c0_44] : memref<1x160x128xbf16, #tpu.memory_space<vmem>>, vector<1x160x128xbf16>
    %58 = vector.shape_cast %57 : vector<1x160x128xbf16> to vector<160x128xbf16>
    %59 = vector.shape_cast %56 : vector<160x128xbf16> to vector<1x160x128xbf16>
    tpu.vector_store %arg8[%c0_42, %c0_43, %c0_44], %59 {strides = array<i32>} : memref<1x160x128xbf16, #tpu.memory_space<vmem>>, vector<1x160x128xbf16>,
    %60 = vector.broadcast %0 : vector<160x1xf32> to vector<160x128xf32>
    %61 = arith.mulf %55, %60 : vector<160x128xf32>
    %cst_45 = arith.constant dense<0.000000e+00> : vector<128xf32>
    %62 = vector.multi_reduction <add>, %61, %cst_45 [0] : vector<160x128xf32> to vector<128xf32>
    %63 = vector.shape_cast %62 : vector<128xf32> to vector<1x128xf32>
    %64 = arith.mulf %61, %55 : vector<160x128xf32>
    %cst_46 = arith.constant dense<0.000000e+00> : vector<128xf32>
    %65 = vector.multi_reduction <add>, %64, %cst_46 [0] : vector<160x128xf32> to vector<128xf32>
    %66 = vector.shape_cast %65 : vector<128xf32> to vector<1x128xf32>
    %67 = tpu.concatenate %63, %66 in 0 : vector<1x128xf32>, vector<1x128xf32> -> vector<2x128xf32>
    %c0_47 = arith.constant 0 : index
    %c0_48 = arith.constant 0 : index
    %c0_49 = arith.constant 0 : index
    %68 = vector.load %arg9[%c0_47, %c0_48, %c0_49] : memref<1x2x128xf32, #tpu.memory_space<vmem>>, vector<1x2x128xf32>
    %69 = vector.shape_cast %68 : vector<1x2x128xf32> to vector<2x128xf32>
    %70 = vector.shape_cast %67 : vector<2x128xf32> to vector<1x2x128xf32>
    tpu.vector_store %arg9[%c0_47, %c0_48, %c0_49], %70 {strides = array<i32>} : memref<1x2x128xf32, #tpu.memory_space<vmem>>, vector<1x2x128xf32>,
    return
  }
  func.func @transform_0(%arg0: i32) -> (i32, i32, i32) {
    %c0_i32 = arith.constant 0 : i32
    %c0_i32_0 = arith.constant 0 : i32
    %c0_i32_1 = arith.constant 0 : i32
    return %arg0, %c0_i32, %c0_i32_0 : i32, i32, i32
  }
  func.func @transform_1(%arg0: i32) -> (i32, i32) {
    %c0_i32 = arith.constant 0 : i32
    %c0_i32_0 = arith.constant 0 : i32
    %c0_i32_1 = arith.constant 0 : i32
    return %c0_i32, %c0_i32_0 : i32, i32
  }
  func.func @transform_2(%arg0: i32) -> (i32, i32) {
    %c0_i32 = arith.constant 0 : i32
    %c0_i32_0 = arith.constant 0 : i32
    %c0_i32_1 = arith.constant 0 : i32
    return %c0_i32, %c0_i32_0 : i32, i32
  }
  func.func @transform_3(%arg0: i32) -> (i32, i32) {
    %c0_i32 = arith.constant 0 : i32
    %c0_i32_0 = arith.constant 0 : i32
    %c0_i32_1 = arith.constant 0 : i32
    return %c0_i32, %c0_i32_0 : i32, i32
  }
  func.func @transform_4(%arg0: i32) -> (i32, i32) {
    %c0_i32 = arith.constant 0 : i32
    %c0_i32_0 = arith.constant 0 : i32
    %c0_i32_1 = arith.constant 0 : i32
    return %c0_i32, %c0_i32_0 : i32, i32
  }
  func.func @transform_5(%arg0: i32) -> (i32, i32, i32) {
    %c0_i32 = arith.constant 0 : i32
    %c0_i32_0 = arith.constant 0 : i32
    %c0_i32_1 = arith.constant 0 : i32
    %c0_i32_2 = arith.constant 0 : i32
    return %c0_i32, %c0_i32_0, %c0_i32_1 : i32, i32, i32
  }
  func.func @transform_6(%arg0: i32) -> (i32, i32) {
    %c0_i32 = arith.constant 0 : i32
    %c0_i32_0 = arith.constant 0 : i32
    %c0_i32_1 = arith.constant 0 : i32
    return %c0_i32, %c0_i32_0 : i32, i32
  }
  func.func @transform_7(%arg0: i32) -> (i32, i32, i32) {
    %c0_i32 = arith.constant 0 : i32
    %c0_i32_0 = arith.constant 0 : i32
    %c0_i32_1 = arith.constant 0 : i32
    return %arg0, %c0_i32, %c0_i32_0 : i32, i32, i32
  }
  func.func @transform_8(%arg0: i32) -> (i32, i32, i32) {
    %c0_i32 = arith.constant 0 : i32
    %c0_i32_0 = arith.constant 0 : i32
    %c0_i32_1 = arith.constant 0 : i32
    return %arg0, %c0_i32, %c0_i32_0 : i32, i32, i32
  }
}

module attributes {stable_mosaic.version = 11 : i64} {
  func.func @_stage4_kernel(%arg0: i32, %arg1: i32, %arg2: memref<1x160x128xbf16, #tpu.memory_space<vmem>>, %arg3: memref<1x160x128xbf16, #tpu.memory_space<vmem>>, %arg4: memref<2x128xf32, #tpu.memory_space<vmem>>, %arg5: memref<1x128xf32, #tpu.memory_space<vmem>>, %arg6: memref<1x128xf32, #tpu.memory_space<vmem>>, %arg7: memref<2x128xf32, #tpu.memory_space<vmem>>, %arg8: memref<1x128xf32, #tpu.memory_space<vmem>>, %arg9: memref<1x128xf32, #tpu.memory_space<vmem>>, %arg10: memref<128x128xbf16, #tpu.memory_space<vmem>>, %arg11: memref<1x128xf32, #tpu.memory_space<vmem>>, %arg12: memref<1x160x128xbf16, #tpu.memory_space<vmem>>) attributes {dimension_semantics = [#tpu.dimension_semantics<parallel>, #tpu.dimension_semantics<parallel>], iteration_bounds = array<i64: 2, 1>, scalar_prefetch = 0 : i64, scratch_operands = 0 : i64, tpu.core_type = #tpu.core_type<tc>, window_params = [{transform_indices = @transform_0, window_bounds = array<i64: 1, 160, 128>}, {transform_indices = @transform_1, window_bounds = array<i64: 1, 160, 128>}, {pipeline_mode = #tpu.pipeline_mode<synchronous>, transform_indices = @transform_2, window_bounds = array<i64: 2, 128>}, {pipeline_mode = #tpu.pipeline_mode<synchronous>, transform_indices = @transform_3, window_bounds = array<i64: 1, 128>}, {pipeline_mode = #tpu.pipeline_mode<synchronous>, transform_indices = @transform_4, window_bounds = array<i64: 1, 128>}, {pipeline_mode = #tpu.pipeline_mode<synchronous>, transform_indices = @transform_5, window_bounds = array<i64: 2, 128>}, {pipeline_mode = #tpu.pipeline_mode<synchronous>, transform_indices = @transform_6, window_bounds = array<i64: 1, 128>}, {pipeline_mode = #tpu.pipeline_mode<synchronous>, transform_indices = @transform_7, window_bounds = array<i64: 1, 128>}, {pipeline_mode = #tpu.pipeline_mode<synchronous>, transform_indices = @transform_8, window_bounds = array<i64: 128, 128>}, {pipeline_mode = #tpu.pipeline_mode<synchronous>, transform_indices = @transform_9, window_bounds = array<i64: 1, 128>}, {transform_indices = @transform_10, window_bounds = array<i64: 1, 160, 128>}]} {
    %c0 = arith.constant 0 : index
    %c0_0 = arith.constant 0 : index
    %0 = vector.load %arg4[%c0, %c0_0] : memref<2x128xf32, #tpu.memory_space<vmem>>, vector<1x128xf32>
    %c1 = arith.constant 1 : index
    %c0_1 = arith.constant 0 : index
    %1 = vector.load %arg4[%c1, %c0_1] : memref<2x128xf32, #tpu.memory_space<vmem>>, vector<1x128xf32>
    %cst = arith.constant 7.812500e-03 : f32
    %2 = vector.broadcast %cst : f32 to vector<1x128xf32>
    %3 = arith.mulf %0, %2 : vector<1x128xf32>
    %cst_2 = arith.constant 7.812500e-03 : f32
    %4 = vector.broadcast %cst_2 : f32 to vector<1x128xf32>
    %5 = arith.mulf %1, %4 : vector<1x128xf32>
    %6 = arith.mulf %3, %3 : vector<1x128xf32>
    %7 = arith.subf %5, %6 : vector<1x128xf32>
    %cst_3 = arith.constant 0.000000e+00 : f32
    %8 = vector.broadcast %cst_3 : f32 to vector<1x128xf32>
    %9 = arith.maximumf %7, %8 : vector<1x128xf32>
    %cst_4 = arith.constant 9.99999974E-6 : f32
    %10 = vector.broadcast %cst_4 : f32 to vector<1x128xf32>
    %11 = arith.addf %9, %10 : vector<1x128xf32>
    %12 = math.rsqrt %11 : vector<1x128xf32>
    %c0_5 = arith.constant 0 : index
    %c0_6 = arith.constant 0 : index
    %13 = vector.load %arg5[%c0_5, %c0_6] : memref<1x128xf32, #tpu.memory_space<vmem>>, vector<1x128xf32>
    %14 = arith.mulf %12, %13 : vector<1x128xf32>
    %c0_7 = arith.constant 0 : index
    %c0_8 = arith.constant 0 : index
    %15 = vector.load %arg6[%c0_7, %c0_8] : memref<1x128xf32, #tpu.memory_space<vmem>>, vector<1x128xf32>
    %16 = arith.mulf %3, %14 : vector<1x128xf32>
    %17 = arith.subf %15, %16 : vector<1x128xf32>
    %c0_9 = arith.constant 0 : index
    %c0_10 = arith.constant 0 : index
    %18 = vector.load %arg7[%c0_9, %c0_10] : memref<2x128xf32, #tpu.memory_space<vmem>>, vector<1x128xf32>
    %c1_11 = arith.constant 1 : index
    %c0_12 = arith.constant 0 : index
    %19 = vector.load %arg7[%c1_11, %c0_12] : memref<2x128xf32, #tpu.memory_space<vmem>>, vector<1x128xf32>
    %cst_13 = arith.constant 7.812500e-03 : f32
    %20 = vector.broadcast %cst_13 : f32 to vector<1x128xf32>
    %21 = arith.mulf %18, %20 : vector<1x128xf32>
    %cst_14 = arith.constant 7.812500e-03 : f32
    %22 = vector.broadcast %cst_14 : f32 to vector<1x128xf32>
    %23 = arith.mulf %19, %22 : vector<1x128xf32>
    %24 = arith.mulf %21, %21 : vector<1x128xf32>
    %25 = arith.subf %23, %24 : vector<1x128xf32>
    %cst_15 = arith.constant 0.000000e+00 : f32
    %26 = vector.broadcast %cst_15 : f32 to vector<1x128xf32>
    %27 = arith.maximumf %25, %26 : vector<1x128xf32>
    %cst_16 = arith.constant 9.99999974E-6 : f32
    %28 = vector.broadcast %cst_16 : f32 to vector<1x128xf32>
    %29 = arith.addf %27, %28 : vector<1x128xf32>
    %30 = math.rsqrt %29 : vector<1x128xf32>
    %c0_17 = arith.constant 0 : index
    %c0_18 = arith.constant 0 : index
    %31 = vector.load %arg8[%c0_17, %c0_18] : memref<1x128xf32, #tpu.memory_space<vmem>>, vector<1x128xf32>
    %32 = arith.mulf %30, %31 : vector<1x128xf32>
    %c0_19 = arith.constant 0 : index
    %c0_20 = arith.constant 0 : index
    %33 = vector.load %arg9[%c0_19, %c0_20] : memref<1x128xf32, #tpu.memory_space<vmem>>, vector<1x128xf32>
    %34 = arith.mulf %21, %32 : vector<1x128xf32>
    %35 = arith.subf %33, %34 : vector<1x128xf32>
    %c0_21 = arith.constant 0 : index
    %c0_22 = arith.constant 0 : index
    %c0_23 = arith.constant 0 : index
    %36 = vector.load %arg3[%c0_21, %c0_22, %c0_23] : memref<1x160x128xbf16, #tpu.memory_space<vmem>>, vector<1x160x128xbf16>
    %37 = vector.shape_cast %36 : vector<1x160x128xbf16> to vector<160x128xbf16>
    %c0_24 = arith.constant 0 : index
    %c0_25 = arith.constant 0 : index
    %38 = vector.load %arg10[%c0_24, %c0_25] : memref<128x128xbf16, #tpu.memory_space<vmem>>, vector<128x128xbf16>
    %cst_26 = arith.constant dense<0.000000e+00> : vector<160x128xf32>
    %39 = tpu.matmul %37, %38, %cst_26 {dimension_numbers = #tpu.dot_dimension_numbers<[1], [0], [0], [1], [0, 0, 1, 1], [], []>} : vector<160x128xbf16>, vector<128x128xbf16>, vector<160x128xf32> -> vector<160x128xf32>
    %c0_27 = arith.constant 0 : index
    %c0_28 = arith.constant 0 : index
    %40 = vector.load %arg11[%c0_27, %c0_28] : memref<1x128xf32, #tpu.memory_space<vmem>>, vector<1x128xf32>
    %41 = vector.broadcast %40 : vector<1x128xf32> to vector<160x128xf32>
    %42 = arith.addf %39, %41 : vector<160x128xf32>
    %c0_29 = arith.constant 0 : index
    %c0_30 = arith.constant 0 : index
    %c0_31 = arith.constant 0 : index
    %43 = vector.load %arg2[%c0_29, %c0_30, %c0_31] : memref<1x160x128xbf16, #tpu.memory_space<vmem>>, vector<1x160x128xbf16>
    %44 = vector.shape_cast %43 : vector<1x160x128xbf16> to vector<160x128xbf16>
    %45 = arith.extf %44 : vector<160x128xbf16> to vector<160x128xf32>
    %46 = vector.broadcast %14 : vector<1x128xf32> to vector<160x128xf32>
    %47 = arith.mulf %45, %46 : vector<160x128xf32>
    %48 = vector.broadcast %17 : vector<1x128xf32> to vector<160x128xf32>
    %49 = arith.addf %47, %48 : vector<160x128xf32>
    %50 = vector.broadcast %32 : vector<1x128xf32> to vector<160x128xf32>
    %51 = arith.mulf %42, %50 : vector<160x128xf32>
    %52 = arith.addf %49, %51 : vector<160x128xf32>
    %53 = vector.broadcast %35 : vector<1x128xf32> to vector<160x128xf32>
    %54 = arith.addf %52, %53 : vector<160x128xf32>
    %cst_32 = arith.constant 0.000000e+00 : f32
    %55 = vector.broadcast %cst_32 : f32 to vector<160x128xf32>
    %56 = arith.maximumf %54, %55 : vector<160x128xf32>
    %57 = arith.truncf %56 : vector<160x128xf32> to vector<160x128xbf16>
    %c0_33 = arith.constant 0 : index
    %c0_34 = arith.constant 0 : index
    %c0_35 = arith.constant 0 : index
    %58 = vector.load %arg12[%c0_33, %c0_34, %c0_35] : memref<1x160x128xbf16, #tpu.memory_space<vmem>>, vector<1x160x128xbf16>
    %59 = vector.shape_cast %58 : vector<1x160x128xbf16> to vector<160x128xbf16>
    %60 = vector.shape_cast %57 : vector<160x128xbf16> to vector<1x160x128xbf16>
    tpu.vector_store %arg12[%c0_33, %c0_34, %c0_35], %60 {strides = array<i32>} : memref<1x160x128xbf16, #tpu.memory_space<vmem>>, vector<1x160x128xbf16>,
    return
  }
  func.func @transform_0(%arg0: i32, %arg1: i32) -> (i32, i32, i32) {
    %c0_i32 = arith.constant 0 : i32
    %c0_i32_0 = arith.constant 0 : i32
    return %arg0, %arg1, %c0_i32 : i32, i32, i32
  }
  func.func @transform_1(%arg0: i32, %arg1: i32) -> (i32, i32, i32) {
    %c0_i32 = arith.constant 0 : i32
    %c0_i32_0 = arith.constant 0 : i32
    return %arg0, %arg1, %c0_i32 : i32, i32, i32
  }
  func.func @transform_2(%arg0: i32, %arg1: i32) -> (i32, i32) {
    %c0_i32 = arith.constant 0 : i32
    %c0_i32_0 = arith.constant 0 : i32
    %c0_i32_1 = arith.constant 0 : i32
    return %c0_i32, %c0_i32_0 : i32, i32
  }
  func.func @transform_3(%arg0: i32, %arg1: i32) -> (i32, i32) {
    %c0_i32 = arith.constant 0 : i32
    %c0_i32_0 = arith.constant 0 : i32
    %c0_i32_1 = arith.constant 0 : i32
    return %c0_i32, %c0_i32_0 : i32, i32
  }
  func.func @transform_4(%arg0: i32, %arg1: i32) -> (i32, i32) {
    %c0_i32 = arith.constant 0 : i32
    %c0_i32_0 = arith.constant 0 : i32
    %c0_i32_1 = arith.constant 0 : i32
    return %c0_i32, %c0_i32_0 : i32, i32
  }
  func.func @transform_5(%arg0: i32, %arg1: i32) -> (i32, i32) {
    %c0_i32 = arith.constant 0 : i32
    %c0_i32_0 = arith.constant 0 : i32
    %c0_i32_1 = arith.constant 0 : i32
    return %c0_i32, %c0_i32_0 : i32, i32
  }
  func.func @transform_6(%arg0: i32, %arg1: i32) -> (i32, i32) {
    %c0_i32 = arith.constant 0 : i32
    %c0_i32_0 = arith.constant 0 : i32
    %c0_i32_1 = arith.constant 0 : i32
    return %c0_i32, %c0_i32_0 : i32, i32
  }
  func.func @transform_7(%arg0: i32, %arg1: i32) -> (i32, i32) {
    %c0_i32 = arith.constant 0 : i32
    %c0_i32_0 = arith.constant 0 : i32
    %c0_i32_1 = arith.constant 0 : i32
    return %c0_i32, %c0_i32_0 : i32, i32
  }
  func.func @transform_8(%arg0: i32, %arg1: i32) -> (i32, i32) {
    %c0_i32 = arith.constant 0 : i32
    %c0_i32_0 = arith.constant 0 : i32
    %c0_i32_1 = arith.constant 0 : i32
    return %c0_i32, %c0_i32_0 : i32, i32
  }
  func.func @transform_9(%arg0: i32, %arg1: i32) -> (i32, i32) {
    %c0_i32 = arith.constant 0 : i32
    %c0_i32_0 = arith.constant 0 : i32
    %c0_i32_1 = arith.constant 0 : i32
    return %c0_i32, %c0_i32_0 : i32, i32
  }
  func.func @transform_10(%arg0: i32, %arg1: i32) -> (i32, i32, i32) {
    %c0_i32 = arith.constant 0 : i32
    %c0_i32_0 = arith.constant 0 : i32
    return %arg0, %arg1, %c0_i32 : i32, i32, i32
  }
}

module attributes {stable_mosaic.version = 11 : i64} {
  func.func @_stage3_kernel(%arg0: i32, %arg1: i32, %arg2: memref<1x160x128xbf16, #tpu.memory_space<vmem>>, %arg3: memref<160x1xf32, #tpu.memory_space<vmem>>, %arg4: memref<2x128xf32, #tpu.memory_space<vmem>>, %arg5: memref<1x128xf32, #tpu.memory_space<vmem>>, %arg6: memref<1x128xf32, #tpu.memory_space<vmem>>, %arg7: memref<128x128xbf16, #tpu.memory_space<vmem>>, %arg8: memref<1x128xf32, #tpu.memory_space<vmem>>, %arg9: memref<1x160x128xbf16, #tpu.memory_space<vmem>>, %arg10: memref<1x1x2x128xf32, #tpu.memory_space<vmem>>) attributes {dimension_semantics = [#tpu.dimension_semantics<parallel>, #tpu.dimension_semantics<parallel>], iteration_bounds = array<i64: 2, 1>, scalar_prefetch = 0 : i64, scratch_operands = 0 : i64, tpu.core_type = #tpu.core_type<tc>, window_params = [{transform_indices = @transform_0, window_bounds = array<i64: 1, 160, 128>}, {transform_indices = @transform_1, window_bounds = array<i64: 160, 1>}, {pipeline_mode = #tpu.pipeline_mode<synchronous>, transform_indices = @transform_2, window_bounds = array<i64: 2, 128>}, {pipeline_mode = #tpu.pipeline_mode<synchronous>, transform_indices = @transform_3, window_bounds = array<i64: 1, 128>}, {pipeline_mode = #tpu.pipeline_mode<synchronous>, transform_indices = @transform_4, window_bounds = array<i64: 1, 128>}, {pipeline_mode = #tpu.pipeline_mode<synchronous>, transform_indices = @transform_5, window_bounds = array<i64: 128, 128>}, {pipeline_mode = #tpu.pipeline_mode<synchronous>, transform_indices = @transform_6, window_bounds = array<i64: 1, 128>}, {transform_indices = @transform_7, window_bounds = array<i64: 1, 160, 128>}, {transform_indices = @transform_8, window_bounds = array<i64: 1, 1, 2, 128>}]} {
    %c0 = arith.constant 0 : index
    %c0_0 = arith.constant 0 : index
    %0 = vector.load %arg3[%c0, %c0_0] : memref<160x1xf32, #tpu.memory_space<vmem>>, vector<160x1xf32>
    %c0_1 = arith.constant 0 : index
    %c0_2 = arith.constant 0 : index
    %1 = vector.load %arg4[%c0_1, %c0_2] : memref<2x128xf32, #tpu.memory_space<vmem>>, vector<1x128xf32>
    %c1 = arith.constant 1 : index
    %c0_3 = arith.constant 0 : index
    %2 = vector.load %arg4[%c1, %c0_3] : memref<2x128xf32, #tpu.memory_space<vmem>>, vector<1x128xf32>
    %cst = arith.constant 7.812500e-03 : f32
    %3 = vector.broadcast %cst : f32 to vector<1x128xf32>
    %4 = arith.mulf %1, %3 : vector<1x128xf32>
    %cst_4 = arith.constant 7.812500e-03 : f32
    %5 = vector.broadcast %cst_4 : f32 to vector<1x128xf32>
    %6 = arith.mulf %2, %5 : vector<1x128xf32>
    %7 = arith.mulf %4, %4 : vector<1x128xf32>
    %8 = arith.subf %6, %7 : vector<1x128xf32>
    %cst_5 = arith.constant 0.000000e+00 : f32
    %9 = vector.broadcast %cst_5 : f32 to vector<1x128xf32>
    %10 = arith.maximumf %8, %9 : vector<1x128xf32>
    %cst_6 = arith.constant 9.99999974E-6 : f32
    %11 = vector.broadcast %cst_6 : f32 to vector<1x128xf32>
    %12 = arith.addf %10, %11 : vector<1x128xf32>
    %13 = math.rsqrt %12 : vector<1x128xf32>
    %c0_7 = arith.constant 0 : index
    %c0_8 = arith.constant 0 : index
    %14 = vector.load %arg5[%c0_7, %c0_8] : memref<1x128xf32, #tpu.memory_space<vmem>>, vector<1x128xf32>
    %15 = arith.mulf %13, %14 : vector<1x128xf32>
    %c0_9 = arith.constant 0 : index
    %c0_10 = arith.constant 0 : index
    %16 = vector.load %arg6[%c0_9, %c0_10] : memref<1x128xf32, #tpu.memory_space<vmem>>, vector<1x128xf32>
    %17 = arith.mulf %4, %15 : vector<1x128xf32>
    %18 = arith.subf %16, %17 : vector<1x128xf32>
    %c0_11 = arith.constant 0 : index
    %c0_12 = arith.constant 0 : index
    %c0_13 = arith.constant 0 : index
    %19 = vector.load %arg2[%c0_11, %c0_12, %c0_13] : memref<1x160x128xbf16, #tpu.memory_space<vmem>>, vector<1x160x128xbf16>
    %20 = vector.shape_cast %19 : vector<1x160x128xbf16> to vector<160x128xbf16>
    %21 = arith.extf %20 : vector<160x128xbf16> to vector<160x128xf32>
    %22 = vector.broadcast %15 : vector<1x128xf32> to vector<160x128xf32>
    %23 = arith.mulf %21, %22 : vector<160x128xf32>
    %24 = vector.broadcast %18 : vector<1x128xf32> to vector<160x128xf32>
    %25 = arith.addf %23, %24 : vector<160x128xf32>
    %cst_14 = arith.constant 0.000000e+00 : f32
    %26 = vector.broadcast %cst_14 : f32 to vector<160x128xf32>
    %27 = arith.maximumf %25, %26 : vector<160x128xf32>
    %28 = arith.truncf %27 : vector<160x128xf32> to vector<160x128xbf16>
    %c0_15 = arith.constant 0 : index
    %c0_16 = arith.constant 0 : index
    %29 = vector.load %arg7[%c0_15, %c0_16] : memref<128x128xbf16, #tpu.memory_space<vmem>>, vector<128x128xbf16>
    %cst_17 = arith.constant dense<0.000000e+00> : vector<160x128xf32>
    %30 = tpu.matmul %28, %29, %cst_17 {dimension_numbers = #tpu.dot_dimension_numbers<[1], [0], [0], [1], [0, 0, 1, 1], [], []>} : vector<160x128xbf16>, vector<128x128xbf16>, vector<160x128xf32> -> vector<160x128xf32>
    %c0_18 = arith.constant 0 : index
    %c0_19 = arith.constant 0 : index
    %31 = vector.load %arg8[%c0_18, %c0_19] : memref<1x128xf32, #tpu.memory_space<vmem>>, vector<1x128xf32>
    %32 = vector.broadcast %31 : vector<1x128xf32> to vector<160x128xf32>
    %33 = arith.addf %30, %32 : vector<160x128xf32>
    %34 = arith.truncf %33 : vector<160x128xf32> to vector<160x128xbf16>
    %c0_20 = arith.constant 0 : index
    %c0_21 = arith.constant 0 : index
    %c0_22 = arith.constant 0 : index
    %35 = vector.load %arg9[%c0_20, %c0_21, %c0_22] : memref<1x160x128xbf16, #tpu.memory_space<vmem>>, vector<1x160x128xbf16>
    %36 = vector.shape_cast %35 : vector<1x160x128xbf16> to vector<160x128xbf16>
    %37 = vector.shape_cast %34 : vector<160x128xbf16> to vector<1x160x128xbf16>
    tpu.vector_store %arg9[%c0_20, %c0_21, %c0_22], %37 {strides = array<i32>} : memref<1x160x128xbf16, #tpu.memory_space<vmem>>, vector<1x160x128xbf16>,
    %38 = vector.broadcast %0 : vector<160x1xf32> to vector<160x128xf32>
    %39 = arith.mulf %33, %38 : vector<160x128xf32>
    %cst_23 = arith.constant dense<0.000000e+00> : vector<128xf32>
    %40 = vector.multi_reduction <add>, %39, %cst_23 [0] : vector<160x128xf32> to vector<128xf32>
    %41 = vector.shape_cast %40 : vector<128xf32> to vector<1x128xf32>
    %42 = arith.mulf %39, %33 : vector<160x128xf32>
    %cst_24 = arith.constant dense<0.000000e+00> : vector<128xf32>
    %43 = vector.multi_reduction <add>, %42, %cst_24 [0] : vector<160x128xf32> to vector<128xf32>
    %44 = vector.shape_cast %43 : vector<128xf32> to vector<1x128xf32>
    %45 = tpu.concatenate %41, %44 in 0 : vector<1x128xf32>, vector<1x128xf32> -> vector<2x128xf32>
    %c0_25 = arith.constant 0 : index
    %c0_26 = arith.constant 0 : index
    %c0_27 = arith.constant 0 : index
    %c0_28 = arith.constant 0 : index
    %46 = vector.load %arg10[%c0_25, %c0_26, %c0_27, %c0_28] : memref<1x1x2x128xf32, #tpu.memory_space<vmem>>, vector<1x1x2x128xf32>
    %47 = vector.shape_cast %46 : vector<1x1x2x128xf32> to vector<2x128xf32>
    %48 = vector.shape_cast %45 : vector<2x128xf32> to vector<1x1x2x128xf32>
    tpu.vector_store %arg10[%c0_25, %c0_26, %c0_27, %c0_28], %48 {strides = array<i32>} : memref<1x1x2x128xf32, #tpu.memory_space<vmem>>, vector<1x1x2x128xf32>,
    return
  }
  func.func @transform_0(%arg0: i32, %arg1: i32) -> (i32, i32, i32) {
    %c0_i32 = arith.constant 0 : i32
    %c0_i32_0 = arith.constant 0 : i32
    return %arg0, %arg1, %c0_i32 : i32, i32, i32
  }
  func.func @transform_1(%arg0: i32, %arg1: i32) -> (i32, i32) {
    %c0_i32 = arith.constant 0 : i32
    %c0_i32_0 = arith.constant 0 : i32
    return %arg1, %c0_i32 : i32, i32
  }
  func.func @transform_2(%arg0: i32, %arg1: i32) -> (i32, i32) {
    %c0_i32 = arith.constant 0 : i32
    %c0_i32_0 = arith.constant 0 : i32
    %c0_i32_1 = arith.constant 0 : i32
    return %c0_i32, %c0_i32_0 : i32, i32
  }
  func.func @transform_3(%arg0: i32, %arg1: i32) -> (i32, i32) {
    %c0_i32 = arith.constant 0 : i32
    %c0_i32_0 = arith.constant 0 : i32
    %c0_i32_1 = arith.constant 0 : i32
    return %c0_i32, %c0_i32_0 : i32, i32
  }
  func.func @transform_4(%arg0: i32, %arg1: i32) -> (i32, i32) {
    %c0_i32 = arith.constant 0 : i32
    %c0_i32_0 = arith.constant 0 : i32
    %c0_i32_1 = arith.constant 0 : i32
    return %c0_i32, %c0_i32_0 : i32, i32
  }
  func.func @transform_5(%arg0: i32, %arg1: i32) -> (i32, i32) {
    %c0_i32 = arith.constant 0 : i32
    %c0_i32_0 = arith.constant 0 : i32
    %c0_i32_1 = arith.constant 0 : i32
    return %c0_i32, %c0_i32_0 : i32, i32
  }
  func.func @transform_6(%arg0: i32, %arg1: i32) -> (i32, i32) {
    %c0_i32 = arith.constant 0 : i32
    %c0_i32_0 = arith.constant 0 : i32
    %c0_i32_1 = arith.constant 0 : i32
    return %c0_i32, %c0_i32_0 : i32, i32
  }
  func.func @transform_7(%arg0: i32, %arg1: i32) -> (i32, i32, i32) {
    %c0_i32 = arith.constant 0 : i32
    %c0_i32_0 = arith.constant 0 : i32
    return %arg0, %arg1, %c0_i32 : i32, i32, i32
  }
  func.func @transform_8(%arg0: i32, %arg1: i32) -> (i32, i32, i32, i32) {
    %c0_i32 = arith.constant 0 : i32
    %c0_i32_0 = arith.constant 0 : i32
    %c0_i32_1 = arith.constant 0 : i32
    return %arg0, %arg1, %c0_i32, %c0_i32_0 : i32, i32, i32, i32
  }
}

</mosaic_0001>

<bundles_post_ra>
// kernel: bottleneck_forward.7
= control target key start
LH: loop header
LB: loop body
LE: loop exit
PB: predicated region body
PF: predicated region fallthrough
CT: control target
= control target key end

     0   :  { %s1486_s13 = smov 0   ;;  %s1488_s14 = smov 0   ;;  %s1769_s0 = inlined_call_operand.vmem [shape: bf16[2,160,128], index: 0, kind: input, shape index: {}]   ;;  %s1770_s1 = inlined_call_operand.vmem [shape: bf16[2,160,128], index: 1, kind: input, shape index: {}]   ;;  %s1771_s2 = inlined_call_operand.vmem [shape: f32[2,128], index: 2, kind: input, shape index: {}]   ;;  %s1772_s3 = inlined_call_operand.vmem [shape: f32[1,128], index: 3, kind: input, shape index: {}]   ;;  %s1773_s4 = inlined_call_operand.vmem [shape: f32[1,128], index: 4, kind: input, shape index: {}]   ;;  %s1774_s5 = inlined_call_operand.vmem [shape: f32[2,128], index: 5, kind: input, shape index: {}]   ;;  %s1775_s6 = inlined_call_operand.vmem [shape: f32[1,128], index: 6, kind: input, shape index: {}]   ;;  %s1776_s7 = inlined_call_operand.vmem [shape: f32[1,128], index: 7, kind: input, shape index: {}]   ;;  %s1777_s8 = inlined_call_operand.vmem [shape: bf16[128,128], index: 8, kind: input, shape index: {}]   ;;  %s1778_s9 = inlined_call_operand.vmem [shape: f32[1,128], index: 9, kind: input, shape index: {}]   ;;  %s1779_s10 = inlined_call_operand.vmem [shape: bf16[2,160,128], index: 10, kind: output, shape index: {}]  }
   0x1   :  { %s1490_s15 = smov 0  }
   0x2 LB: > { %s32_s16 = sadd.s32 1, %s1425_s14  ;;  %p1117_p0 = scmp.ge.s32.totalorder %s1429_s15, 1  ;;  %s1429_s15 = sphi %s1490_s15, %s20_s15   ;;  %s1425_s14 = sphi %s1488_s14, %s1781_s14   ;;  %s1421_s13 = sphi %s1486_s13, %s1780_s13  }
   0x3   : > { %p34_p1 = scmp.ge.s32.totalorder %s32_s16, 2  ;;  %p350_p2 = scmp.lt.s32.totalorder %s1429_s15, 3 }
   0x5   : > { %s1783_s16 = smov (%p34_p1, %s32_s16), 0  ;;  %p351_p3 = pnand %p1117_p0, %p350_p2 }
   0x6   : > { %v1385_v0 = vld [vmem:[%s1777_s8] sm:$0xff] (!%p351_p3)   ;;  %p406_p4 = scmp.lt.s32.totalorder (!%p351_p3), %s1421_s13, 1  ;;  %v1386_v1 = vld [vmem:[%s1777_s8 + $0x8] sm:$0xff] (!%p351_p3)   ;;  %v1387_v2 = vld [vmem:[%s1777_s8 + $0x10] sm:$0xff] (!%p351_p3)   ;;  %v768_v34 = vlaneseq (!%p351_p3) }
   0x7   : > { %354 = sbr.rel (%p351_p3) target bundleno = 288 (0x120), region = 60  ;;  %1308 = vmatprep.subr.bf16.mxu0 (!%p351_p3), %v1385_v0  ;;  %1344 = vmatprep.subr.bf16.mxu1 (!%p351_p3), %v1385_v0  ;;  %v1388_v3 = vld [vmem:[%s1777_s8 + $0x18] sm:$0xff] (!%p351_p3)   ;;  %v1389_v6 = vld [vmem:[%s1777_s8 + $0x20] sm:$0xff] (!%p351_p3)   ;;  %v1390_v7 = vld [vmem:[%s1777_s8 + $0x28] sm:$0xff] (!%p351_p3)  }
   0x8   : > { %1309 = vmatpush3.bf16.msra.mxu0 (!%p351_p3), %v1385_v0  ;;  %1352 = vmatpush3.bf16.msra.mxu1 (!%p351_p3), %v1385_v0  ;;  %v1391_v8 = vld [vmem:[%s1777_s8 + $0x30] sm:$0xff] (!%p351_p3)   ;;  %v1392_v9 = vld [vmem:[%s1777_s8 + $0x38] sm:$0xff] (!%p351_p3)   ;;  %v436_v18 = vld [vmem:[%s1771_s2] sm:$0x1] (!%p351_p3)  ;;  %v769_v38 = vshrl.u32 (!%p351_p3), %v768_v34, 7 }
   0x9   : > { %1310 = vmatprep.subr.bf16.mxu0 (!%p351_p3), %v1386_v1  ;;  %1345 = vmatprep.subr.bf16.mxu1 (!%p351_p3), %v1386_v1  ;;  %v438_v19 = vmul.f32 (!%p351_p3), 0.0078125, %v436_v18  ;;  %v437_v20 = vld [vmem:[%s1771_s2 + $0x1] sm:$0x1] (!%p351_p3)  ;;  %v450_v21 = vld [vmem:[%s1774_s5] sm:$0x1] (!%p351_p3) }
   0xa   : > { %v439_v22 = vmul.f32 (!%p351_p3), 0.0078125, %v437_v20  ;;  %v452_v24 = vmul.f32 (!%p351_p3), 0.0078125, %v450_v21  ;;  %v451_v25 = vld [vmem:[%s1774_s5 + $0x1] sm:$0x1] (!%p351_p3)  ;;  %v445_v36 = vld [vmem:[%s1772_s3] sm:$0x1] (!%p351_p3) }
   0xb   : > { %v440_v23 = vmul.f32 (!%p351_p3), %v438_v19, %v438_v19  ;;  %v453_v27 = vmul.f32 (!%p351_p3), 0.0078125, %v451_v25  ;;  %v459_v40 = vld [vmem:[%s1775_s6] sm:$0x1] (!%p351_p3)  ;;  %v770_v42 = vsub.s32 (!%p351_p3), 0, %v769_v38 }
   0xc   : > { %1311 = vmatpush3.bf16.msra.mxu0 (!%p351_p3), %v1386_v1  ;;  %1353 = vmatpush3.bf16.msra.mxu1 (!%p351_p3), %v1386_v1  ;;  %v454_v28 = vmul.f32 (!%p351_p3), %v452_v24, %v452_v24  ;;  %v447_v43 = vld [vmem:[%s1773_s4] sm:$0x1] (!%p351_p3) }
   0xd   : > { %1312 = vmatprep.subr.bf16.mxu0 (!%p351_p3), %v1387_v2  ;;  %1346 = vmatprep.subr.bf16.mxu1 (!%p351_p3), %v1387_v2  ;;  %v441_v26 = vsub.f32 (!%p351_p3), %v439_v22, %v440_v23  ;;  %v461_v52 = vld [vmem:[%s1776_s7] sm:$0x1] (!%p351_p3) }
   0xe   : > { %s1785_s13 = smov (!%p406_p4, %s1421_s13), 1  ;;  %v455_v30 = vsub.f32 %v453_v27, %v454_v28 }
   0xf   : > { %s1513_s23 = smul.u32 80, %s1785_s13  ;;  %v442_v29 = vmax.f32 %v441_v26, 0.0 }
  0x10   : > { %1313 = vmatpush3.bf16.msra.mxu0 %v1387_v2  ;;  %1354 = vmatpush3.bf16.msra.mxu1 %v1387_v2  ;;  %v456_v32 = vmax.f32 %v455_v30, 0.0 }
  0x11   : > { %s1519_s26 = scalar_lea.vmem %s1770_s1, %s1513_s23  ;;  %1314 = vmatprep.subr.bf16.mxu0 %v1388_v3  ;;  %1347 = vmatprep.subr.bf16.mxu1 %v1388_v3  ;;  %v443_v31 = vadd.f32 1e-05, %v442_v29  ;;  %s1565_s13 = scalar_lea.vmem %s1769_s0, %s1513_s23 }
  0x12   : > { %v1393_v4 = vld [vmem:[%s1519_s26] sm:$0xff]   ;;  %v1395_v5 = vld [vmem:[%s1519_s26 + $0x30] sm:$0xff]   ;;  %v1394_v10 = vld [vmem:[%s1519_s26 + $0x8] sm:$0xff]   ;;  %v457_v33 = vadd.f32 1e-05, %v456_v32  ;;  %s1700_s29 = scalar_lea.vmem %s1779_s10, %s1513_s23 }
  0x13   : > { %1324 = vmatprep.mubr.bf16.mxu0 %v1393_v4  ;;  %1336 = vmatprep.mubr.bf16.mxu1 %v1395_v5  ;;  %v1396_v11 = vld [vmem:[%s1519_s26 + $0x38] sm:$0xff]   ;;  %v1397_v12 = vld [vmem:[%s1519_s26 + $0x10] sm:$0xff]   ;;  %v1399_v13 = vld [vmem:[%s1519_s26 + $0x40] sm:$0xff]   ;;  %1403 = vrsqrt.f32 %v443_v31 }
  0x14   : > { %1315 = vmatpush3.bf16.msra.mxu0 %v1388_v3  ;;  %1355 = vmatpush3.bf16.msra.mxu1 %v1388_v3  ;;  %v1398_v14 = vld [vmem:[%s1519_s26 + $0x18] sm:$0xff]   ;;  %v1400_v15 = vld [vmem:[%s1519_s26 + $0x48] sm:$0xff]   ;;  %v1401_v16 = vld [vmem:[%s1519_s26 + $0x20] sm:$0xff]   ;;  %1405 = vrsqrt.f32 %v457_v33 }
  0x15   : > { %1316 = vmatprep.subr.bf16.mxu0 %v1389_v6  ;;  %1348 = vmatprep.subr.bf16.mxu1 %v1389_v6  ;;  %v1402_v17 = vld [vmem:[%s1519_s26 + $0x28] sm:$0xff]   ;;  %v1183_v46 = vld [vmem:[%s1565_s13] sm:$0xff]   ;;  %v1278_v59 = vld [vmem:[%s1565_s13 + $0x38] sm:$0xff]  }
  0x16   : > { %v1272_v44 = vld [vmem:[%s1565_s13 + $0x8] sm:$0xff]   ;;  %v1184_v50 = vunpack.c.l.bf16 %v1183_v46  ;;  %v1185_v58 = vunpack.c.h.bf16 %v1183_v46  ;;  %v1277_v60 = vld [vmem:[%s1565_s13 + $0x30] sm:$0xff]   ;;  %v1274_v61 = vld [vmem:[%s1565_s13 + $0x18] sm:$0xff]   ;;  %v1212_v3 = vunpack.c.l.bf16 %v1278_v59 }
  0x17   : > { %v1188_v48 = vunpack.c.l.bf16 %v1272_v44  ;;  %v1189_v56 = vunpack.c.h.bf16 %v1272_v44  ;;  %v1273_v0 = vld [vmem:[%s1565_s13 + $0x10] sm:$0xff]   ;;  %v1208_v4 = vunpack.c.l.bf16 %v1277_v60  ;;  %v1280_v5 = vld [vmem:[%s1565_s13 + $0x48] sm:$0xff]  }
  0x18   : > { %1317 = vmatpush3.bf16.msra.mxu0 %v1389_v6  ;;  %1356 = vmatpush3.bf16.msra.mxu1 %v1389_v6  ;;  %v1279_v6 = vld [vmem:[%s1565_s13 + $0x40] sm:$0xff]  }
  0x19   : > { %1318 = vmatprep.subr.bf16.mxu0 %v1390_v7  ;;  %1349 = vmatprep.subr.bf16.mxu1 %v1390_v7  ;;  %v1216_v18 = vunpack.c.l.bf16 %v1279_v6  ;;  %v1217_v23 = vunpack.c.h.bf16 %v1279_v6 }
  0x1c   : > { %1319 = vmatpush3.bf16.msra.mxu0 %v1390_v7  ;;  %1357 = vmatpush3.bf16.msra.mxu1 %v1390_v7  ;;  %v1276_v7 = vld [vmem:[%s1565_s13 + $0x28] sm:$0xff]  }
  0x1d   : > { %1320 = vmatprep.subr.bf16.mxu0 %v1391_v8  ;;  %1350 = vmatprep.subr.bf16.mxu1 %v1391_v8  ;;  %v1404_v35 = vpop.eup %1403  ;;  %v1204_v20 = vunpack.c.l.bf16 %v1276_v7  ;;  %v1205_v44 = vunpack.c.h.bf16 %v1276_v7 }
  0x1e   : > { %v446_v37 = vmul.f32 %v1404_v35, %v445_v36  ;;  %v1406_v39 = vpop.eup %1405 }
  0x1f   : > { %v460_v45 = vmul.f32 %v1406_v39, %v459_v40 }
  0x20   : > { %1321 = vmatpush3.bf16.msra.mxu0 %v1391_v8  ;;  %1358 = vmatpush3.bf16.msra.mxu1 %v1391_v8  ;;  %v448_v41 = vmul.f32 %v446_v37, %v438_v19  ;;  %v1575_v49 = vrot.slane %v446_v37, %v770_v42  ;;  %v1221_v19 = vunpack.c.h.bf16 %v1280_v5 }
  0x21   : > { %1322 = vmatprep.subr.bf16.mxu0 %v1392_v9  ;;  %1351 = vmatprep.subr.bf16.mxu1 %v1392_v9  ;;  %v462_v51 = vmul.f32 %v460_v45, %v452_v24  ;;  %v1590_v63 = vrot.slane %v460_v45, %v770_v42 }
  0x22   : > { %v449_v47 = vsub.f32 %v447_v43, %v448_v41  ;;  %v774_v53 = vmul.f32 %v1188_v48, %v1575_v49  ;;  %v772_v55 = vmul.f32 %v1184_v50, %v1575_v49  ;;  %v775_v2 = vmul.f32 %v1189_v56, %v1575_v49  ;;  %v1627_v41 = vld [vmem:[%s1778_s9] ss:$0 sm:$0xff] }
  0x23   : > { %v463_v57 = vsub.f32 %v461_v52, %v462_v51  ;;  %v786_v21 = vmul.f32 %v1212_v3, %v1575_v49  ;;  %v784_v22 = vmul.f32 %v1208_v4, %v1575_v49  ;;  %v788_v34 = vmul.f32 %v1216_v18, %v1575_v49 }
  0x24   : > { %1323 = vmatpush3.bf16.msra.mxu0 %v1392_v9  ;;  %1359 = vmatpush3.bf16.msra.mxu1 %v1392_v9  ;;  %v1581_v54 = vrot.slane %v449_v47, %v770_v42  ;;  %v773_v9 = vmul.f32 %v1185_v58, %v1575_v49  ;;  %v791_v35 = vmul.f32 %v1221_v19, %v1575_v49 }
  0x25   : > { %v1600_v8 = vrot.slane %v463_v57, %v770_v42  ;;  %v782_v36 = vmul.f32 %v1204_v20, %v1575_v49  ;;  %v789_v39 = vmul.f32 %v1217_v23, %v1575_v49  ;;  %v1666_v7 = vmul.f32 %v1205_v44, %v1575_v49 }
  0x26   : > { %v1588_v62 = vadd.f32 %v1581_v54, %v774_v53  ;;  %v1594_v1 = vadd.f32 %v1581_v54, %v772_v55  ;;  %v801_v25 = vadd.f32 %v1581_v54, %v775_v2  ;;  %v1608_v26 = vadd.f32 %v1581_v54, %v773_v9 }
  0x27   : > { %1325 = vmatmul.mubr.bf16.vlgmr.msra.gmra.mrb[0].mxu0 %v1394_v10  ;;  %1337 = vmatmul.mubr.bf16.vlgmr.msra.gmra.mrb[0].mxu1 %v1396_v11  ;;  %v1213_v10 = vunpack.c.h.bf16 %v1278_v59  ;;  %v1196_v11 = vunpack.c.l.bf16 %v1274_v61  ;;  %v812_v37 = vadd.f32 %v1581_v54, %v786_v21  ;;  %v810_v38 = vadd.f32 %v1581_v54, %v784_v22 }
  0x28   : > { %1328 = vmatprep.mubr.bf16.mxu0 %v1397_v12  ;;  %1340 = vmatprep.mubr.bf16.mxu1 %v1399_v13  ;;  %v1275_v12 = vld [vmem:[%s1565_s13 + $0x20] sm:$0xff]   ;;  %v1209_v13 = vunpack.c.h.bf16 %v1277_v60  ;;  %v1647_v55 = vadd.f32 %v1581_v54, %v788_v34  ;;  %v1650_v56 = vadd.f32 %v1581_v54, %v791_v35  ;;  %v1653_v57 = vadd.f32 %v1581_v54, %v782_v36 }
  0x29   : > { %v1200_v24 = vunpack.c.l.bf16 %v1275_v12  ;;  %v787_v27 = vmul.f32 %v1213_v10, %v1575_v49  ;;  %v778_v28 = vmul.f32 %v1196_v11, %v1575_v49  ;;  %v1201_v45 = vunpack.c.h.bf16 %v1275_v12 }
  0x2a   : > { %v785_v29 = vmul.f32 %v1209_v13, %v1575_v49 }
  0x2b   : > { %v780_v40 = vmul.f32 %v1200_v24, %v1575_v49  ;;  %v813_v42 = vadd.f32 %v1581_v54, %v787_v27  ;;  %v1631_v43 = vadd.f32 %v1581_v54, %v778_v28  ;;  %v1669_v9 = vmul.f32 %v1201_v45, %v1575_v49 }
  0x2c   : > { %v811_v46 = vadd.f32 %v1581_v54, %v785_v29 }
  0x2d   : > { %v1661_v2 = vadd.f32 %v1581_v54, %v780_v40 }
  0x2f   : > { %1329 = vmatmul.mubr.bf16.gmra.mrb[4].mxu0 %v1398_v14  ;;  %1341 = vmatmul.mubr.bf16.gmra.mrb[4].mxu1 %v1400_v15  ;;  %v1192_v14 = vunpack.c.l.bf16 %v1273_v0  ;;  %v1197_v15 = vunpack.c.h.bf16 %v1274_v61 }
  0x30   : > { %1332 = vmatprep.mubr.bf16.mxu0 %v1401_v16  ;;  %v1193_v16 = vunpack.c.h.bf16 %v1273_v0  ;;  %v1658_v0 = vadd.f32 %v1581_v54, %v789_v39 }
  0x31   : > { %v776_v30 = vmul.f32 %v1192_v14, %v1575_v49  ;;  %v779_v31 = vmul.f32 %v1197_v15, %v1575_v49 }
  0x32   : > { %v777_v32 = vmul.f32 %v1193_v16, %v1575_v49 }
  0x33   : > { %v1635_v47 = vadd.f32 %v1581_v54, %v776_v30  ;;  %v1638_v48 = vadd.f32 %v1581_v54, %v779_v31 }
  0x34   : > { %v1641_v50 = vadd.f32 %v1581_v54, %v777_v32 }
  0x37   : > { %1333 = vmatmul.mubr.bf16.gmra.mrb[8].mxu0 %v1402_v17  ;;  %v1220_v17 = vunpack.c.l.bf16 %v1280_v5 }
  0x39   : > { %v790_v33 = vmul.f32 %v1220_v17, %v1575_v49 }
  0x3b   : > { %v1644_v53 = vadd.f32 %v1581_v54, %v790_v33 }
  0xfa   : > { %v1326_v51 = vpop.f32.mrb[0].mxu0  ;;  %v1338_v52 = vpop.f32.mrb[0].mxu1 }
  0xfb   : > { %v658_v58 = vadd.f32 %v1326_v51, %v1627_v41  ;;  %v649_v59 = vpop.f32.mrb[1].mxu0  ;;  %v706_v60 = vadd.f32 %v1338_v52, %v1627_v41  ;;  %v697_v61 = vpop.f32.mrb[1].mxu1 }
  0xfc   : > { %v650_v3 = vadd.f32 %v1627_v41, %v649_v59  ;;  %v1327_v4 = vpop.f32.mrb[2].mxu0  ;;  %v698_v5 = vadd.f32 %v1627_v41, %v697_v61  ;;  %v1339_v6 = vpop.f32.mrb[2].mxu1 }
  0xfd   : > { %v824_v10 = vmul.f32 %v1590_v63, %v658_v58  ;;  %v661_v11 = vadd.f32 %v1327_v4, %v1627_v41  ;;  %v652_v12 = vpop.f32.mrb[3].mxu0  ;;  %v836_v13 = vmul.f32 %v1590_v63, %v706_v60  ;;  %v709_v14 = vadd.f32 %v1339_v6, %v1627_v41  ;;  %v700_v15 = vpop.f32.mrb[3].mxu1 }
  0xfe   : > { %v822_v16 = vmul.f32 %v1590_v63, %v650_v3  ;;  %v653_v17 = vadd.f32 %v1627_v41, %v652_v12  ;;  %v834_v18 = vmul.f32 %v1590_v63, %v698_v5  ;;  %v701_v19 = vadd.f32 %v1627_v41, %v700_v15 }
  0xff   : > { %v844_v49 = vadd.f32 %v824_v10, %v1588_v62  ;;  %v825_v20 = vmul.f32 %v1590_v63, %v661_v11  ;;  %v856_v21 = vadd.f32 %v836_v13, %v812_v37  ;;  %v837_v22 = vmul.f32 %v1590_v63, %v709_v14 }
 0x100   : > { %v842_v23 = vadd.f32 %v822_v16, %v1594_v1  ;;  %v823_v24 = vmul.f32 %v1590_v63, %v653_v17  ;;  %v854_v27 = vadd.f32 %v834_v18, %v810_v38  ;;  %v835_v28 = vmul.f32 %v1590_v63, %v701_v19 }
 0x101   : > { %v870_v29 = vadd.f32 %v1600_v8, %v844_v49  ;;  %v845_v30 = vadd.f32 %v825_v20, %v801_v25  ;;  %v882_v31 = vadd.f32 %v1600_v8, %v856_v21  ;;  %v857_v32 = vadd.f32 %v837_v22, %v813_v42 }
 0x102   : > { %v868_v62 = vadd.f32 %v1600_v8, %v842_v23  ;;  %v843_v33 = vadd.f32 %v823_v24, %v1608_v26  ;;  %v880_v34 = vadd.f32 %v1600_v8, %v854_v27  ;;  %v1330_v35 = vpop.f32.mrb[4].mxu0  ;;  %v855_v36 = vadd.f32 %v835_v28, %v811_v46  ;;  %v1342_v1 = vpop.f32.mrb[4].mxu1 }
 0x103   : > { %v890_v37 = vmax.f32 %v870_v29, 0.0  ;;  %v871_v38 = vadd.f32 %v1600_v8, %v845_v30  ;;  %v902_v39 = vmax.f32 %v882_v31, 0.0  ;;  %v883_v40 = vadd.f32 %v1600_v8, %v857_v32  ;;  %v665_v25 = vpop.f32.mrb[5].mxu0  ;;  %v713_v44 = vpop.f32.mrb[5].mxu1 }
 0x104   : > { %v888_v45 = vmax.f32 %v868_v62, 0.0  ;;  %v869_v42 = vadd.f32 %v1600_v8, %v843_v33  ;;  %v900_v51 = vmax.f32 %v880_v34, 0.0  ;;  %v674_v26 = vadd.f32 %v1330_v35, %v1627_v41  ;;  %v1331_v52 = vpop.f32.mrb[6].mxu0  ;;  %v1343_v58 = vpop.f32.mrb[6].mxu1 }
 0x105   : > { %v891_v59 = vmax.f32 %v871_v38, 0.0  ;;  %v903_v46 = vmax.f32 %v883_v40, 0.0  ;;  %v881_v60 = vadd.f32 %v1600_v8, %v855_v36  ;;  %v666_v61 = vadd.f32 %v1627_v41, %v665_v25  ;;  %v668_v3 = vpop.f32.mrb[7].mxu0  ;;  %v716_v4 = vpop.f32.mrb[7].mxu1 }
 0x106   : > { %v889_v5 = vmax.f32 %v869_v42, 0.0  ;;  %v828_v6 = vmul.f32 %v1590_v63, %v674_v26  ;;  %v677_v10 = vadd.f32 %v1331_v52, %v1627_v41  ;;  %v669_v11 = vadd.f32 %v1627_v41, %v668_v3 }
 0x107   : > { %v1230_v12 = vpack.c.bf16 %v891_v59, %v890_v37  ;;  %v1260_v13 = vpack.c.bf16 %v903_v46, %v902_v39  ;;  %v901_v14 = vmax.f32 %v881_v60, 0.0  ;;  %v826_v15 = vmul.f32 %v1590_v63, %v666_v61 }
 0x108   : > { %v1225_v16 = vpack.c.bf16 %v889_v5, %v888_v45  ;;  %v848_v17 = vadd.f32 %v828_v6, %v1631_v43  ;;  %v829_v18 = vmul.f32 %v1590_v63, %v677_v10  ;;  %v827_v19 = vmul.f32 %v1590_v63, %v669_v11 }
 0x109   : > { %1281 = vst [vmem:[%s1700_s29 + $0x8] sm:$0xff] %v1230_v12   ;;  %1287 = vst [vmem:[%s1700_s29 + $0x38] sm:$0xff] %v1260_v13   ;;  %v1255_v49 = vpack.c.bf16 %v901_v14, %v900_v51  ;;  %v846_v20 = vadd.f32 %v826_v15, %v1635_v47  ;;  %v722_v21 = vadd.f32 %v1342_v1, %v1627_v41 }
 0x10a   : > { %v714_v22 = vadd.f32 %v1627_v41, %v713_v44  ;;  %1226 = vst [vmem:[%s1700_s29] sm:$0xff] %v1225_v16   ;;  %v874_v23 = vadd.f32 %v1600_v8, %v848_v17  ;;  %v849_v24 = vadd.f32 %v829_v18, %v1638_v48  ;;  %v847_v43 = vadd.f32 %v827_v19, %v1641_v50  ;;  %v1334_v28 = vpop.f32.mrb[8].mxu0 }
 0x10b   : > { %v725_v27 = vadd.f32 %v1343_v58, %v1627_v41  ;;  %1286 = vst [vmem:[%s1700_s29 + $0x30] sm:$0xff] %v1255_v49   ;;  %v872_v29 = vadd.f32 %v1600_v8, %v846_v20  ;;  %v840_v30 = vmul.f32 %v1590_v63, %v722_v21  ;;  %v690_v31 = vadd.f32 %v1334_v28, %v1627_v41  ;;  %v681_v32 = vpop.f32.mrb[9].mxu0 }
 0x10c   : > { %v838_v47 = vmul.f32 %v1590_v63, %v714_v22  ;;  %v894_v62 = vmax.f32 %v874_v23, 0.0  ;;  %v875_v33 = vadd.f32 %v1600_v8, %v849_v24  ;;  %v873_v48 = vadd.f32 %v1600_v8, %v847_v43  ;;  %v1335_v34 = vpop.f32.mrb[10].mxu0 }
 0x10d   : > { %v841_v50 = vmul.f32 %v1590_v63, %v725_v27  ;;  %v892_v35 = vmax.f32 %v872_v29, 0.0  ;;  %v860_v36 = vadd.f32 %v840_v30, %v1644_v53  ;;  %v832_v37 = vmul.f32 %v1590_v63, %v690_v31  ;;  %v684_v38 = vpop.f32.mrb[11].mxu0 }
 0x10e   : > { %v858_v1 = vadd.f32 %v838_v47, %v1647_v55  ;;  %v895_v39 = vmax.f32 %v875_v33, 0.0  ;;  %v893_v40 = vmax.f32 %v873_v48, 0.0  ;;  %v717_v44 = vadd.f32 %v1627_v41, %v716_v4 }
 0x10f   : > { %v861_v25 = vadd.f32 %v841_v50, %v1650_v56  ;;  %v886_v45 = vadd.f32 %v1600_v8, %v860_v36  ;;  %v682_v51 = vadd.f32 %v1627_v41, %v681_v32  ;;  %v809_v53 = vadd.f32 %v1581_v54, %v1666_v7 }
 0x110   : > { %v884_v42 = vadd.f32 %v1600_v8, %v858_v1  ;;  %v1240_v55 = vpack.c.bf16 %v895_v39, %v894_v62  ;;  %v1235_v26 = vpack.c.bf16 %v893_v40, %v892_v35  ;;  %v839_v58 = vmul.f32 %v1590_v63, %v717_v44 }
 0x111   : > { %v887_v52 = vadd.f32 %v1600_v8, %v861_v25  ;;  %v906_v59 = vmax.f32 %v886_v45, 0.0  ;;  %v852_v56 = vadd.f32 %v832_v37, %v1653_v57  ;;  %v830_v46 = vmul.f32 %v1590_v63, %v682_v51 }
 0x112   : > { %v807_v60 = vadd.f32 %v1581_v54, %v1669_v9  ;;  %1283 = vst [vmem:[%s1700_s29 + $0x18] sm:$0xff] %v1240_v55   ;;  %1282 = vst [vmem:[%s1700_s29 + $0x10] sm:$0xff] %v1235_v26   ;;  %v859_v7 = vadd.f32 %v839_v58, %v1658_v0  ;;  %v693_v3 = vadd.f32 %v1335_v34, %v1627_v41  ;;  %v904_v5 = vmax.f32 %v884_v42, 0.0 }
 0x113   : > { %v907_v61 = vmax.f32 %v887_v52, 0.0  ;;  %v685_v4 = vadd.f32 %v1627_v41, %v684_v38  ;;  %v850_v6 = vadd.f32 %v830_v46, %v1661_v2  ;;  %v878_v9 = vadd.f32 %v1600_v8, %v852_v56 }
 0x114   : > { %v885_v10 = vadd.f32 %v1600_v8, %v859_v7  ;;  %v833_v11 = vmul.f32 %v1590_v63, %v693_v3 }
 0x115   : > { %v1270_v57 = vpack.c.bf16 %v907_v61, %v906_v59  ;;  %v831_v54 = vmul.f32 %v1590_v63, %v685_v4  ;;  %v876_v12 = vadd.f32 %v1600_v8, %v850_v6  ;;  %v898_v16 = vmax.f32 %v878_v9, 0.0 }
 0x116   : > { %v905_v0 = vmax.f32 %v885_v10, 0.0  ;;  %v853_v41 = vadd.f32 %v833_v11, %v809_v53 }
 0x117   : > { %1289 = vst [vmem:[%s1700_s29 + $0x48] sm:$0xff] %v1270_v57   ;;  %v851_v13 = vadd.f32 %v831_v54, %v807_v60  ;;  %v896_v17 = vmax.f32 %v876_v12, 0.0 }
 0x118   : > { %v1265_v14 = vpack.c.bf16 %v905_v0, %v904_v5  ;;  %v879_v2 = vadd.f32 %v1600_v8, %v853_v41 }
 0x119   : > { %v877_v15 = vadd.f32 %v1600_v8, %v851_v13 }
 0x11a   : > { %1288 = vst [vmem:[%s1700_s29 + $0x40] sm:$0xff] %v1265_v14   ;;  %v899_v18 = vmax.f32 %v879_v2, 0.0 }
 0x11b   : > { %v897_v63 = vmax.f32 %v877_v15, 0.0 }
 0x11c   : > { %v1250_v19 = vpack.c.bf16 %v899_v18, %v898_v16 }
 0x11d   : > { %v1245_v49 = vpack.c.bf16 %v897_v63, %v896_v17 }
 0x11e   : > { %1285 = vst [vmem:[%s1700_s29 + $0x28] sm:$0xff] %v1250_v19  }
 0x11f   : > { %1284 = vst [vmem:[%s1700_s29 + $0x20] sm:$0xff] %v1245_v49  }
 0x120 PF: > { %s20_s15 = sadd.s32 1, %s1429_s15   ;;  %s1780_s13 = smov %s1425_s14 }
 0x121   : > { %p17_p5 = scmp.ge.s32.totalorder %s20_s15, 4   ;;  %s1781_s14 = smov %s1783_s16 }
 0x123   :  { %19 = sbr.rel (!%p17_p5) target bundleno = 2 (0x2), region = 93 }

// kernel: bottleneck_forward.6
= control target key start
LH: loop header
LB: loop body
LE: loop exit
PB: predicated region body
PF: predicated region fallthrough
CT: control target
= control target key end

     0   :  { %s1507_s27 = smov 0   ;;  %s1509_s28 = smov 0   ;;  %s1825_s0 = inlined_call_operand.vmem [shape: bf16[2,160,128], index: 0, kind: input, shape index: {}]   ;;  %s1826_s1 = inlined_call_operand.vmem [shape: f32[160,1], index: 1, kind: input, shape index: {}]   ;;  %s1827_s2 = inlined_call_operand.vmem [shape: f32[2,128], index: 2, kind: input, shape index: {}]   ;;  %s1828_s3 = inlined_call_operand.vmem [shape: f32[1,128], index: 3, kind: input, shape index: {}]   ;;  %s1829_s4 = inlined_call_operand.vmem [shape: f32[1,128], index: 4, kind: input, shape index: {}]   ;;  %s1830_s5 = inlined_call_operand.vmem [shape: bf16[128,128], index: 5, kind: input, shape index: {}]   ;;  %s1831_s6 = inlined_call_operand.vmem [shape: f32[1,128], index: 6, kind: input, shape index: {}]   ;;  %s1832_s7 = inlined_call_operand.vmem [shape: bf16[2,160,128], index: 7, kind: output, shape index: {0}]   ;;  %s1833_s8 = inlined_call_operand.vmem [shape: f32[2,1,2,128], index: 8, kind: output, shape index: {1}]  }
   0x1   :  { %s1511_s29 = smov 0  }
   0x2 LB: > { %s31_s30 = sadd.s32 1, %s1455_s28  ;;  %p1166_p0 = scmp.ge.s32.totalorder %s1459_s29, 1  ;;  %s1459_s29 = sphi %s1511_s29, %s19_s29   ;;  %s1455_s28 = sphi %s1509_s28, %s1835_s28   ;;  %s1451_s27 = sphi %s1507_s27, %s1834_s27  }
   0x3   : > { %p33_p1 = scmp.ge.s32.totalorder %s31_s30, 2  ;;  %p299_p2 = scmp.lt.s32.totalorder %s1459_s29, 3 }
   0x5   : > { %s1837_s30 = smov (%p33_p1, %s31_s30), 0  ;;  %p300_p3 = pnand %p1166_p0, %p299_p2 }
   0x6   : > { %v1427_v0 = vld [vmem:[%s1830_s5] sm:$0xff] (!%p300_p3)   ;;  %v1428_v1 = vld [vmem:[%s1830_s5 + $0x8] sm:$0xff] (!%p300_p3)   ;;  %v1429_v2 = vld [vmem:[%s1830_s5 + $0x10] sm:$0xff] (!%p300_p3)   ;;  %v1461_v3 = vmov (!%p300_p3), 0   ;;  %p354_p4 = scmp.lt.s32.totalorder (!%p300_p3), %s1451_s27, 1  ;;  %v461_v22 = vlaneseq (!%p300_p3)  ;;  %vm1015_vm0 = vcmask (!%p300_p3), 1040384  }
   0x7   : > { %303 = sbr.rel (%p300_p3) target bundleno = 318 (0x13e), region = 48  ;;  %1347 = vmatprep.subr.bf16.mxu0 (!%p300_p3), %v1427_v0  ;;  %1383 = vmatprep.subr.bf16.mxu1 (!%p300_p3), %v1427_v0  ;;  %v1430_v4 = vld [vmem:[%s1830_s5 + $0x18] sm:$0xff] (!%p300_p3)   ;;  %v407_v5 = vld [vmem:[%s1827_s2] sm:$0x1] (!%p300_p3)  ;;  %v408_v6 = vld [vmem:[%s1827_s2 + $0x1] sm:$0x1] (!%p300_p3) }
   0x8   : > { %1348 = vmatpush3.bf16.msra.mxu0 (!%p300_p3), %v1427_v0  ;;  %1391 = vmatpush3.bf16.msra.mxu1 (!%p300_p3), %v1427_v0  ;;  %v1545_v7 = vmul.f32 (!%p300_p3), 0.0078125, %v407_v5  ;;  %v410_v8 = vmul.f32 (!%p300_p3), 0.0078125, %v408_v6  ;;  %v1431_v10 = vld [vmem:[%s1830_s5 + $0x20] sm:$0xff] (!%p300_p3)   ;;  %v389_v13 = vld [vmem:[%s1826_s1 + $0x10] sm:$0xff] (!%p300_p3)  ;;  %v388_v14 = vld [vmem:[%s1826_s1 + $0x8] sm:$0xff] (!%p300_p3)  ;;  %v1597_v26 = vshrl.u32 (!%p300_p3), %v461_v22, 7 }
   0x9   : > { %1349 = vmatprep.subr.bf16.mxu0 (!%p300_p3), %v1428_v1  ;;  %1384 = vmatprep.subr.bf16.mxu1 (!%p300_p3), %v1428_v1  ;;  %v387_v11 = vld [vmem:[%s1826_s1] sm:$0xff] (!%p300_p3)  ;;  %v390_v16 = vld [vmem:[%s1826_s1 + $0x18] sm:$0xff] (!%p300_p3)  ;;  %v1432_v17 = vld [vmem:[%s1830_s5 + $0x28] sm:$0xff] (!%p300_p3)  }
   0xa   : > { %1425 = vset.pattern.permute.xlu0 (!%p300_p3), %v1461_v3  ;;  %1426 = vset.pattern.permute.xlu1 (!%p300_p3), %v1461_v3  ;;  %v411_v9 = vmul.f32 (!%p300_p3), %v1545_v7, %v1545_v7  ;;  %v391_v19 = vld [vmem:[%s1826_s1 + $0x20] sm:$0xff] (!%p300_p3)  ;;  %v392_v20 = vld [vmem:[%s1826_s1 + $0x28] sm:$0xff] (!%p300_p3)  ;;  %v1433_v21 = vld [vmem:[%s1830_s5 + $0x30] sm:$0xff] (!%p300_p3)   ;;  %v463_v37 = vsub.s32 (!%p300_p3), 0, %v1597_v26 }
   0xb   : > { %827 = vperm.xlu0 (!%p300_p3), %1425, %v387_v11   ;;  %837 = vperm.xlu1 (!%p300_p3), %1426, %v389_v13   ;;  %v393_v23 = vld [vmem:[%s1826_s1 + $0x30] sm:$0xff] (!%p300_p3)  ;;  %v394_v24 = vld [vmem:[%s1826_s1 + $0x38] sm:$0xff] (!%p300_p3)  ;;  %v395_v31 = vld [vmem:[%s1826_s1 + $0x40] sm:$0xff] (!%p300_p3) }
   0xc   : > { %1350 = vmatpush3.bf16.msra.mxu0 (!%p300_p3), %v1428_v1  ;;  %1392 = vmatpush3.bf16.msra.mxu1 (!%p300_p3), %v1428_v1  ;;  %v412_v12 = vsub.f32 (!%p300_p3), %v410_v8, %v411_v9  ;;  %v1434_v25 = vld [vmem:[%s1830_s5 + $0x38] sm:$0xff] (!%p300_p3)   ;;  %v416_v32 = vld [vmem:[%s1828_s3] sm:$0x1] (!%p300_p3)  ;;  %v396_v34 = vld [vmem:[%s1826_s1 + $0x48] sm:$0xff] (!%p300_p3) }
   0xd   : > { %1351 = vmatprep.subr.bf16.mxu0 (!%p300_p3), %v1429_v2  ;;  %1385 = vmatprep.subr.bf16.mxu1 (!%p300_p3), %v1429_v2  ;;  %v397_v53 = vld [vmem:[%s1826_s1 + $0x50] sm:$0xff] (!%p300_p3)  ;;  %v418_v54 = vld [vmem:[%s1829_s4] sm:$0x1] (!%p300_p3)  ;;  %v398_v59 = vld [vmem:[%s1826_s1 + $0x58] sm:$0xff] (!%p300_p3) }
   0xe   : > { %s1839_s27 = smov (!%p354_p4, %s1451_s27), 1  ;;  %v413_v15 = vmax.f32 %v412_v12, 0.0  ;;  %v399_v8 = vld [vmem:[%s1826_s1 + $0x60] sm:$0xff]  ;;  %v400_v13 = vld [vmem:[%s1826_s1 + $0x68] sm:$0xff]  ;;  %v401_v26 = vld [vmem:[%s1826_s1 + $0x70] sm:$0xff] }
   0xf   : > { %832 = vperm.xlu0 %1425, %v388_v14   ;;  %s1399_s15 = smul.u32 80, %s1839_s27  ;;  %842 = vperm.xlu1 %1426, %v390_v16  }
  0x10   : > { %1352 = vmatpush3.bf16.msra.mxu0 %v1429_v2  ;;  %1393 = vmatpush3.bf16.msra.mxu1 %v1429_v2  ;;  %v414_v18 = vadd.f32 1e-05, %v413_v15 }
  0x11   : > { %1353 = vmatprep.subr.bf16.mxu0 %v1430_v4  ;;  %1386 = vmatprep.subr.bf16.mxu1 %v1430_v4  ;;  %s1586_s24 = scalar_lea.vmem %s1825_s0, %s1399_s15  ;;  %s1741_s11 = scalar_lea.vmem %s1832_s7, %s1399_s15 }
  0x12   : > { %1435 = vrsqrt.f32 %v414_v18  ;;  %v1222_v27 = vld [vmem:[%s1586_s24] sm:$0xff]   ;;  %v1316_v28 = vld [vmem:[%s1586_s24 + $0x30] sm:$0xff]   ;;  %v1311_v29 = vld [vmem:[%s1586_s24 + $0x8] sm:$0xff]   ;;  %s1169_s15 = sshll.u32 %s1839_s27, 1 }
  0x13   : > { %847 = vperm.xlu0 %1425, %v391_v19   ;;  %852 = vperm.xlu1 %1426, %v392_v20   ;;  %v1317_v30 = vld [vmem:[%s1586_s24 + $0x38] sm:$0xff]   ;;  %v1312_v33 = vld [vmem:[%s1586_s24 + $0x10] sm:$0xff]   ;;  %v1223_v35 = vunpack.c.l.bf16 %v1222_v27  ;;  %v1224_v36 = vunpack.c.h.bf16 %v1222_v27  ;;  %v1247_v38 = vunpack.c.l.bf16 %v1316_v28  ;;  %v1318_v39 = vld [vmem:[%s1586_s24 + $0x40] sm:$0xff]   ;;  %v1248_v42 = vunpack.c.h.bf16 %v1316_v28  ;;  %s385_s14 = scalar_lea.vmem %s1833_s8, %s1169_s15 }
  0x14   : > { %1354 = vmatpush3.bf16.msra.mxu0 %v1430_v4  ;;  %1394 = vmatpush3.bf16.msra.mxu1 %v1430_v4  ;;  %v1313_v40 = vld [vmem:[%s1586_s24 + $0x18] sm:$0xff]   ;;  %v1227_v43 = vunpack.c.l.bf16 %v1311_v29  ;;  %v1228_v44 = vunpack.c.h.bf16 %v1311_v29  ;;  %v1251_v45 = vunpack.c.l.bf16 %v1317_v30  ;;  %v1617_v46 = vld [vmem:[%s1586_s24 + $0x48] sm:$0xff]   ;;  %v1252_v48 = vunpack.c.h.bf16 %v1317_v30  ;;  %v1620_v51 = vld [vmem:[%s1586_s24 + $0x20] sm:$0xff]  }
  0x15   : > { %1355 = vmatprep.subr.bf16.mxu0 %v1431_v10  ;;  %1387 = vmatprep.subr.bf16.mxu1 %v1431_v10  ;;  %v1231_v49 = vunpack.c.l.bf16 %v1312_v33  ;;  %v1232_v50 = vunpack.c.h.bf16 %v1312_v33  ;;  %v1623_v52 = vld [vmem:[%s1586_s24 + $0x28] sm:$0xff]   ;;  %v1255_v55 = vunpack.c.l.bf16 %v1318_v39  ;;  %v1256_v56 = vunpack.c.h.bf16 %v1318_v39 }
  0x16   : > { %v1235_v57 = vunpack.c.l.bf16 %v1313_v40  ;;  %v1236_v58 = vunpack.c.h.bf16 %v1313_v40  ;;  %v1259_v62 = vunpack.c.l.bf16 %v1617_v46  ;;  %v1260_v63 = vunpack.c.h.bf16 %v1617_v46  ;;  %v405_v46 = vld [vmem:[%s1826_s1 + $0x90] sm:$0xff] }
  0x17   : > { %857 = vperm.xlu0 %1425, %v393_v23   ;;  %862 = vperm.xlu1 %1426, %v394_v24   ;;  %v1239_v0 = vunpack.c.l.bf16 %v1620_v51  ;;  %v1240_v1 = vunpack.c.h.bf16 %v1620_v51  ;;  %v1243_v2 = vunpack.c.l.bf16 %v1623_v52  ;;  %v1244_v3 = vunpack.c.h.bf16 %v1623_v52 }
  0x18   : > { %1356 = vmatpush3.bf16.msra.mxu0 %v1431_v10  ;;  %1395 = vmatpush3.bf16.msra.mxu1 %v1431_v10 }
  0x19   : > { %1357 = vmatprep.subr.bf16.mxu0 %v1432_v17  ;;  %1388 = vmatprep.subr.bf16.mxu1 %v1432_v17 }
  0x1b   : > { %867 = vperm.xlu0 %1425, %v395_v31   ;;  %872 = vperm.xlu1 %1426, %v396_v34   ;;  %v402_v31 = vld [vmem:[%s1826_s1 + $0x78] sm:$0xff] }
  0x1c   : > { %1358 = vmatpush3.bf16.msra.mxu0 %v1432_v17  ;;  %1396 = vmatpush3.bf16.msra.mxu1 %v1432_v17  ;;  %v1436_v41 = vpop.eup %1435 }
  0x1d   : > { %1359 = vmatprep.subr.bf16.mxu0 %v1433_v21  ;;  %1389 = vmatprep.subr.bf16.mxu1 %v1433_v21  ;;  %v417_v47 = vmul.f32 %v1436_v41, %v416_v32 }
  0x1f   : > { %v419_v60 = vmul.f32 %v417_v47, %v1545_v7  ;;  %v1635_v61 = vrot.slane %v417_v47, %v463_v37  ;;  %877 = vperm.xlu0 %1425, %v397_v53   ;;  %882 = vperm.xlu1 %1426, %v398_v59  }
  0x20   : > { %1360 = vmatpush3.bf16.msra.mxu0 %v1433_v21  ;;  %1397 = vmatpush3.bf16.msra.mxu1 %v1433_v21 }
  0x21   : > { %1361 = vmatprep.subr.bf16.mxu0 %v1434_v25  ;;  %1390 = vmatprep.subr.bf16.mxu1 %v1434_v25  ;;  %v420_v4 = vsub.f32 %v418_v54, %v419_v60  ;;  %v465_v5 = vmul.f32 %v1223_v35, %v1635_v61  ;;  %v466_v6 = vmul.f32 %v1224_v36, %v1635_v61 }
  0x22   : > { %v477_v7 = vmul.f32 %v1247_v38, %v1635_v61  ;;  %v478_v9 = vmul.f32 %v1248_v42, %v1635_v61  ;;  %v467_v10 = vmul.f32 %v1227_v43, %v1635_v61  ;;  %v468_v11 = vmul.f32 %v1228_v44, %v1635_v61 }
  0x23   : > { %v479_v12 = vmul.f32 %v1251_v45, %v1635_v61  ;;  %v1656_v14 = vrot.slane %v420_v4, %v463_v37  ;;  %v480_v15 = vmul.f32 %v1252_v48, %v1635_v61  ;;  %v469_v16 = vmul.f32 %v1231_v49, %v1635_v61  ;;  %887 = vperm.xlu0 %1425, %v399_v8   ;;  %v403_v49 = vld [vmem:[%s1826_s1 + $0x80] sm:$0xff] }
  0x24   : > { %1362 = vmatpush3.bf16.msra.mxu0 %v1434_v25  ;;  %1398 = vmatpush3.bf16.msra.mxu1 %v1434_v25  ;;  %v470_v17 = vmul.f32 %v1232_v50, %v1635_v61  ;;  %v481_v18 = vmul.f32 %v1255_v55, %v1635_v61  ;;  %v482_v19 = vmul.f32 %v1256_v56, %v1635_v61  ;;  %v404_v50 = vld [vmem:[%s1826_s1 + $0x88] sm:$0xff] }
  0x25   : > { %v471_v20 = vmul.f32 %v1235_v57, %v1635_v61  ;;  %v472_v21 = vmul.f32 %v1236_v58, %v1635_v61  ;;  %v491_v22 = vadd.f32 %v1656_v14, %v465_v5  ;;  %v492_v23 = vadd.f32 %v1656_v14, %v466_v6  ;;  %892 = vperm.xlu1 %1426, %v400_v13  }
  0x26   : > { %v503_v24 = vadd.f32 %v1656_v14, %v477_v7  ;;  %v504_v25 = vadd.f32 %v1656_v14, %v478_v9  ;;  %v493_v27 = vadd.f32 %v1656_v14, %v467_v10  ;;  %v494_v28 = vadd.f32 %v1656_v14, %v468_v11 }
  0x27   : > { %v505_v29 = vadd.f32 %v1656_v14, %v479_v12  ;;  %v506_v30 = vadd.f32 %v1656_v14, %v480_v15  ;;  %v511_v32 = vmax.f32 %v491_v22, 0.0  ;;  %v512_v33 = vmax.f32 %v492_v23, 0.0  ;;  %897 = vperm.xlu0 %1425, %v401_v26  }
  0x28   : > { %v523_v34 = vmax.f32 %v503_v24, 0.0  ;;  %v524_v35 = vmax.f32 %v504_v25, 0.0  ;;  %v513_v36 = vmax.f32 %v493_v27, 0.0  ;;  %v514_v37 = vmax.f32 %v494_v28, 0.0  ;;  %v1728_v27 = vld [vmem:[%s1831_s6] ss:$0 sm:$0xff] }
  0x29   : > { %v525_v38 = vmax.f32 %v505_v29, 0.0  ;;  %v526_v39 = vmax.f32 %v506_v30, 0.0  ;;  %v531_v40 = vpack.c.bf16 %v512_v33, %v511_v32  ;;  %v495_v42 = vadd.f32 %v1656_v14, %v469_v16  ;;  %902 = vperm.xlu1 %1426, %v402_v31  }
  0x2a   : > { %v537_v41 = vpack.c.bf16 %v524_v35, %v523_v34  ;;  %v496_v43 = vadd.f32 %v1656_v14, %v470_v17  ;;  %v532_v44 = vpack.c.bf16 %v514_v37, %v513_v36  ;;  %v507_v47 = vadd.f32 %v1656_v14, %v481_v18 }
  0x2b   : > { %v538_v45 = vpack.c.bf16 %v526_v39, %v525_v38  ;;  %v508_v48 = vadd.f32 %v1656_v14, %v482_v19  ;;  %1363 = vmatprep.mubr.bf16.mxu0 %v531_v40  ;;  %v515_v53 = vmax.f32 %v495_v42, 0.0  ;;  %v497_v55 = vadd.f32 %v1656_v14, %v471_v20  ;;  %907 = vperm.xlu0 %1425, %v403_v49  }
  0x2c   : > { %1375 = vmatprep.mubr.bf16.mxu1 %v537_v41  ;;  %v516_v54 = vmax.f32 %v496_v43, 0.0  ;;  %v498_v56 = vadd.f32 %v1656_v14, %v472_v21  ;;  %1364 = vmatmul.mubr.bf16.vlgmr.msra.gmra.mrb[0].mxu0 %v532_v44  ;;  %v527_v57 = vmax.f32 %v507_v47, 0.0  ;;  %v483_v59 = vmul.f32 %v1259_v62, %v1635_v61 }
  0x2d   : > { %1376 = vmatmul.mubr.bf16.vlgmr.msra.gmra.mrb[0].mxu1 %v538_v45  ;;  %v528_v58 = vmax.f32 %v508_v48, 0.0  ;;  %v484_v60 = vmul.f32 %v1260_v63, %v1635_v61  ;;  %v517_v5 = vmax.f32 %v497_v55, 0.0  ;;  %v473_v7 = vmul.f32 %v1239_v0, %v1635_v61  ;;  %912 = vperm.xlu1 %1426, %v404_v50   ;;  %v406_v63 = vld [vmem:[%s1826_s1 + $0x98] sm:$0xff] }
  0x2e   : > { %v533_v4 = vpack.c.bf16 %v516_v54, %v515_v53  ;;  %v518_v6 = vmax.f32 %v498_v56, 0.0  ;;  %v509_v9 = vadd.f32 %v1656_v14, %v483_v59  ;;  %v474_v62 = vmul.f32 %v1240_v1, %v1635_v61 }
  0x2f   : > { %v539_v8 = vpack.c.bf16 %v528_v58, %v527_v57  ;;  %v510_v10 = vadd.f32 %v1656_v14, %v484_v60  ;;  %v499_v0 = vadd.f32 %v1656_v14, %v473_v7  ;;  %v475_v11 = vmul.f32 %v1243_v2, %v1635_v61  ;;  %917 = vperm.xlu0 %1425, %v405_v46  }
  0x30   : > { %1367 = vmatprep.mubr.bf16.mxu0 %v533_v4  ;;  %v476_v51 = vmul.f32 %v1244_v3, %v1635_v61  ;;  %v534_v1 = vpack.c.bf16 %v518_v6, %v517_v5  ;;  %v529_v12 = vmax.f32 %v509_v9, 0.0  ;;  %v500_v15 = vadd.f32 %v1656_v14, %v474_v62 }
  0x31   : > { %1379 = vmatprep.mubr.bf16.mxu1 %v539_v8  ;;  %v530_v13 = vmax.f32 %v510_v10, 0.0  ;;  %v519_v16 = vmax.f32 %v499_v0, 0.0  ;;  %v501_v17 = vadd.f32 %v1656_v14, %v475_v11  ;;  %922 = vperm.xlu1 %1426, %v406_v63  }
  0x32   : > { %v502_v18 = vadd.f32 %v1656_v14, %v476_v51  ;;  %v520_v20 = vmax.f32 %v500_v15, 0.0 }
  0x33   : > { %v540_v19 = vpack.c.bf16 %v530_v13, %v529_v12  ;;  %v521_v52 = vmax.f32 %v501_v17, 0.0 }
  0x34   : > { %1368 = vmatmul.mubr.bf16.gmra.mrb[4].mxu0 %v534_v1  ;;  %v535_v2 = vpack.c.bf16 %v520_v20, %v519_v16  ;;  %v522_v61 = vmax.f32 %v502_v18, 0.0 }
  0x35   : > { %1380 = vmatmul.mubr.bf16.gmra.mrb[4].mxu1 %v540_v19 }
  0x36   : > { %1371 = vmatprep.mubr.bf16.mxu0 %v535_v2  ;;  %v536_v3 = vpack.c.bf16 %v522_v61, %v521_v52 }
  0x3c   : > { %1372 = vmatmul.mubr.bf16.gmra.mrb[8].mxu0 %v536_v3 }
  0x8a   : > { %v828_v21 = vpop.permute.xlu0 %827  ;;  %v838_v22 = vpop.permute.xlu1 %837 }
  0x8e   : > { %v833_v23 = vpop.permute.xlu0 %832  ;;  %v843_v24 = vpop.permute.xlu1 %842 }
  0x92   : > { %v848_v25 = vpop.permute.xlu0 %847  ;;  %v1721_v26 = vpop.permute.xlu1 %852 }
  0x96   : > { %v1723_v14 = vpop.permute.xlu0 %857  ;;  %v863_v48 = vpop.permute.xlu1 %862 }
  0x9a   : > { %v1755_v49 = vpop.permute.xlu0 %867  ;;  %v873_v13 = vpop.permute.xlu1 %872 }
  0xff   : > { %v1365_v28 = vpop.f32.mrb[0].mxu0 }
 0x100   : > { %v1377_v29 = vpop.f32.mrb[0].mxu1  ;;  %v646_v30 = vpop.f32.mrb[1].mxu0  ;;  %v655_v35 = vadd.f32 %v1365_v28, %v1728_v27 }
 0x101   : > { %v694_v31 = vpop.f32.mrb[1].mxu1  ;;  %v647_v32 = vadd.f32 %v1728_v27, %v646_v30  ;;  %v1366_v33 = vpop.f32.mrb[2].mxu0  ;;  %v1734_v39 = vadd.f32 %v1377_v29, %v1728_v27 }
 0x102   : > { %v1378_v34 = vpop.f32.mrb[2].mxu1  ;;  %v658_v36 = vadd.f32 %v1366_v33, %v1728_v27  ;;  %v649_v37 = vpop.f32.mrb[3].mxu0  ;;  %v1748_v43 = vadd.f32 %v1728_v27, %v694_v31  ;;  %v927_v50 = vmul.f32 %v838_v22, %v655_v35 }
 0x103   : > { %v697_v38 = vpop.f32.mrb[3].mxu1  ;;  %v1744_v40 = vadd.f32 %v1378_v34, %v1728_v27  ;;  %v650_v41 = vadd.f32 %v1728_v27, %v649_v37  ;;  %v925_v42 = vmul.f32 %v828_v21, %v647_v32  ;;  %v883_v34 = vpop.permute.xlu1 %882 }
 0x104   : > { %v1269_v44 = vpack.c.bf16 %v658_v36, %v655_v35  ;;  %v1751_v45 = vadd.f32 %v1728_v27, %v697_v38  ;;  %v928_v56 = vmul.f32 %v843_v24, %v658_v36  ;;  %v972_v10 = vmul.f32 %v927_v50, %v655_v35  ;;  %v878_v24 = vpop.permute.xlu0 %877 }
 0x105   : > { %v1299_v47 = vpack.c.bf16 %v1744_v40, %v1734_v39  ;;  %v1264_v53 = vpack.c.bf16 %v650_v41, %v647_v32  ;;  %v926_v54 = vmul.f32 %v833_v23, %v650_v41  ;;  %v970_v59 = vmul.f32 %v925_v42, %v647_v32 }
 0x106   : > { %1320 = vst [vmem:[%s1741_s11 + $0x8] sm:$0xff] %v1269_v44   ;;  %v1294_v55 = vpack.c.bf16 %v1751_v45, %v1748_v43  ;;  %v973_v11 = vmul.f32 %v928_v56, %v658_v36 }
 0x107   : > { %1326 = vst [vmem:[%s1741_s11 + $0x38] sm:$0xff] %v1299_v47   ;;  %v1369_v57 = vpop.f32.mrb[4].mxu0  ;;  %1265 = vst [vmem:[%s1741_s11] sm:$0xff] %v1264_v53   ;;  %v945_v60 = vadd.f32 %v926_v54, %v925_v42  ;;  %v971_v4 = vmul.f32 %v926_v54, %v650_v41 }
 0x108   : > { %v1381_v58 = vpop.f32.mrb[4].mxu1  ;;  %1325 = vst [vmem:[%s1741_s11 + $0x30] sm:$0xff] %v1294_v55   ;;  %v662_v5 = vpop.f32.mrb[5].mxu0  ;;  %v671_v51 = vadd.f32 %v1369_v57, %v1728_v27 }
 0x109   : > { %v710_v6 = vpop.f32.mrb[5].mxu1  ;;  %v663_v7 = vadd.f32 %v1728_v27, %v662_v5  ;;  %v1370_v8 = vpop.f32.mrb[6].mxu0  ;;  %v946_v62 = vadd.f32 %v945_v60, %v927_v50  ;;  %v990_v46 = vadd.f32 %v971_v4, %v970_v59  ;;  %v1767_v16 = vadd.f32 %v1381_v58, %v1728_v27 }
 0x10a   : > { %v1382_v9 = vpop.f32.mrb[6].mxu1  ;;  %v665_v63 = vpop.f32.mrb[7].mxu0  ;;  %v674_v12 = vadd.f32 %v1370_v8, %v1728_v27  ;;  %v1775_v3 = vadd.f32 %v1728_v27, %v710_v6 }
 0x10b   : > { %v713_v0 = vpop.f32.mrb[7].mxu1  ;;  %v929_v1 = vmul.f32 %v848_v25, %v663_v7  ;;  %v991_v15 = vadd.f32 %v990_v46, %v972_v10  ;;  %v947_v17 = vadd.f32 %v946_v62, %v928_v56  ;;  %v1770_v18 = vadd.f32 %v1382_v9, %v1728_v27  ;;  %v888_v57 = vpop.permute.xlu0 %887 }
 0x10c   : > { %v1279_v20 = vpack.c.bf16 %v674_v12, %v671_v51  ;;  %v666_v21 = vadd.f32 %v1728_v27, %v665_v63  ;;  %v1780_v22 = vadd.f32 %v1728_v27, %v713_v0  ;;  %v931_v25 = vmul.f32 %v1723_v14, %v671_v51  ;;  %v893_v4 = vpop.permute.xlu1 %892 }
 0x10d   : > { %v974_v19 = vmul.f32 %v929_v1, %v663_v7  ;;  %v948_v2 = vadd.f32 %v947_v17, %v929_v1  ;;  %v992_v52 = vadd.f32 %v991_v15, %v973_v11  ;;  %v1309_v61 = vpack.c.bf16 %v1770_v18, %v1767_v16 }
 0x10e   : > { %1322 = vst [vmem:[%s1741_s11 + $0x18] sm:$0xff] %v1279_v20   ;;  %v1274_v30 = vpack.c.bf16 %v666_v21, %v663_v7  ;;  %v930_v31 = vmul.f32 %v1721_v26, %v666_v21  ;;  %v1304_v32 = vpack.c.bf16 %v1780_v22, %v1775_v3  ;;  %v932_v38 = vmul.f32 %v863_v48, %v674_v12 }
 0x10f   : > { %v1373_v23 = vpop.f32.mrb[8].mxu0  ;;  %v993_v28 = vadd.f32 %v992_v52, %v974_v19  ;;  %1328 = vst [vmem:[%s1741_s11 + $0x48] sm:$0xff] %v1309_v61   ;;  %v976_v44 = vmul.f32 %v931_v25, %v671_v51  ;;  %v898_v10 = vpop.permute.xlu0 %897  ;;  %v937_v62 = vmul.f32 %v888_v57, %v1748_v43  ;;  %v938_v51 = vmul.f32 %v893_v4, %v1751_v45 }
 0x110   : > { %v678_v29 = vpop.f32.mrb[9].mxu0  ;;  %v687_v35 = vadd.f32 %v1373_v23, %v1728_v27  ;;  %1321 = vst [vmem:[%s1741_s11 + $0x10] sm:$0xff] %v1274_v30   ;;  %v949_v41 = vadd.f32 %v948_v2, %v930_v31  ;;  %v975_v42 = vmul.f32 %v930_v31, %v666_v21  ;;  %1327 = vst [vmem:[%s1741_s11 + $0x40] sm:$0xff] %v1304_v32   ;;  %v903_v11 = vpop.permute.xlu1 %902 }
 0x111   : > { %v1374_v33 = vpop.f32.mrb[10].mxu0  ;;  %v679_v36 = vadd.f32 %v1728_v27, %v678_v29  ;;  %v977_v58 = vmul.f32 %v932_v38, %v674_v12  ;;  %v939_v15 = vmul.f32 %v898_v10, %v1734_v39  ;;  %v982_v17 = vmul.f32 %v937_v62, %v1748_v43 }
 0x112   : > { %v690_v37 = vadd.f32 %v1374_v33, %v1728_v27  ;;  %v681_v14 = vpop.f32.mrb[11].mxu0  ;;  %v950_v53 = vadd.f32 %v949_v41, %v931_v25  ;;  %v994_v54 = vadd.f32 %v993_v28, %v975_v42  ;;  %v935_v5 = vmul.f32 %v878_v24, %v687_v35 }
 0x113   : > { %v682_v26 = vadd.f32 %v1728_v27, %v681_v14  ;;  %v933_v47 = vmul.f32 %v1755_v49, %v679_v36  ;;  %v908_v2 = vpop.permute.xlu0 %907  ;;  %v940_v52 = vmul.f32 %v903_v11, %v1744_v40  ;;  %v983_v61 = vmul.f32 %v938_v51, %v1751_v45 }
 0x114   : > { %v1289_v50 = vpack.c.bf16 %v690_v37, %v687_v35  ;;  %v995_v59 = vadd.f32 %v994_v54, %v976_v44  ;;  %v951_v48 = vadd.f32 %v950_v53, %v932_v38  ;;  %v936_v9 = vmul.f32 %v883_v34, %v690_v37  ;;  %v913_v24 = vpop.permute.xlu1 %912 }
 0x115   : > { %v1284_v55 = vpack.c.bf16 %v682_v26, %v679_v36  ;;  %v934_v56 = vmul.f32 %v873_v13, %v682_v26  ;;  %v978_v60 = vmul.f32 %v933_v47, %v679_v36  ;;  %v980_v46 = vmul.f32 %v935_v5, %v687_v35 }
 0x116   : > { %1324 = vst [vmem:[%s1741_s11 + $0x28] sm:$0xff] %v1289_v50   ;;  %v952_v6 = vadd.f32 %v951_v48, %v933_v47  ;;  %v996_v7 = vadd.f32 %v995_v59, %v977_v58  ;;  %v981_v1 = vmul.f32 %v936_v9, %v690_v37  ;;  %v984_v25 = vmul.f32 %v939_v15, %v1734_v39 }
 0x117   : > { %1323 = vst [vmem:[%s1741_s11 + $0x20] sm:$0xff] %v1284_v55   ;;  %v979_v27 = vmul.f32 %v934_v56, %v682_v26  ;;  %v941_v28 = vmul.f32 %v908_v2, %v1775_v3  ;;  %v985_v31 = vmul.f32 %v940_v52, %v1744_v40  ;;  %v942_v43 = vmul.f32 %v913_v24, %v1780_v22  ;;  %v918_v34 = vpop.permute.xlu0 %917 }
 0x118   : > { %v997_v8 = vadd.f32 %v996_v7, %v978_v60  ;;  %v953_v49 = vadd.f32 %v952_v6, %v934_v56  ;;  %v943_v35 = vmul.f32 %v918_v34, %v1767_v16  ;;  %v923_v14 = vpop.permute.xlu1 %922 }
 0x119   : > { %v986_v45 = vmul.f32 %v941_v28, %v1775_v3  ;;  %v944_v39 = vmul.f32 %v923_v14, %v1770_v18  ;;  %v987_v38 = vmul.f32 %v942_v43, %v1780_v22 }
 0x11a   : > { %v954_v63 = vadd.f32 %v953_v49, %v935_v5  ;;  %v998_v0 = vadd.f32 %v997_v8, %v979_v27  ;;  %v988_v40 = vmul.f32 %v943_v35, %v1767_v16 }
 0x11b   : > { %v989_v47 = vmul.f32 %v944_v39, %v1770_v18 }
 0x11c   : > { %v955_v12 = vadd.f32 %v954_v63, %v936_v9  ;;  %v999_v13 = vadd.f32 %v998_v0, %v980_v46 }
 0x11e   : > { %v956_v19 = vadd.f32 %v955_v12, %v937_v62  ;;  %v1000_v20 = vadd.f32 %v999_v13, %v981_v1 }
 0x120   : > { %v957_v21 = vadd.f32 %v956_v19, %v938_v51  ;;  %v1001_v23 = vadd.f32 %v1000_v20, %v982_v17 }
 0x122   : > { %v958_v29 = vadd.f32 %v957_v21, %v939_v15  ;;  %v1002_v30 = vadd.f32 %v1001_v23, %v983_v61 }
 0x124   : > { %v959_v32 = vadd.f32 %v958_v29, %v940_v52  ;;  %v1003_v33 = vadd.f32 %v1002_v30, %v984_v25 }
 0x126   : > { %v960_v36 = vadd.f32 %v959_v32, %v941_v28  ;;  %v1004_v37 = vadd.f32 %v1003_v33, %v985_v31 }
 0x128   : > { %v961_v41 = vadd.f32 %v960_v36, %v942_v43  ;;  %v1005_v42 = vadd.f32 %v1004_v37, %v986_v45 }
 0x12a   : > { %v962_v26 = vadd.f32 %v961_v41, %v943_v35  ;;  %v1006_v44 = vadd.f32 %v1005_v42, %v987_v38 }
 0x12c   : > { %v963_v50 = vadd.f32 %v962_v26, %v944_v39  ;;  %v1007_v53 = vadd.f32 %v1006_v44, %v988_v40 }
 0x12e   : > { %v964_v54 = vrot.slane %v963_v50, 4  ;;  %v1008_v3 = vadd.f32 %v1007_v53, %v989_v47 }
 0x130   : > { %v965_v55 = vadd.f32 %v964_v54, %v963_v50  ;;  %v1009_v56 = vrot.slane %v1008_v3, 4 }
 0x132   : > { %v966_v57 = vrot.slane %v965_v55, 2  ;;  %v1010_v58 = vadd.f32 %v1009_v56, %v1008_v3 }
 0x134   : > { %v967_v59 = vadd.f32 %v966_v57, %v965_v55  ;;  %v1011_v48 = vrot.slane %v1010_v58, 2 }
 0x136   : > { %v968_v22 = vrot.slane %v967_v59, 1  ;;  %v1012_v60 = vadd.f32 %v1011_v48, %v1010_v58 }
 0x138   : > { %v1013_v4 = vrot.slane %v1012_v60, 1  ;;  %v969_v16 = vadd.f32 %v968_v22, %v967_v59 }
 0x13a   : > { %v1014_v18 = vadd.f32 %v1013_v4, %v1012_v60 }
 0x13c   : > { %v1016_v5 = vsel %vm1015_vm0, %v969_v16, %v1014_v18 }
 0x13d   : > { %1017 = vst [vmem:[%s385_s14] sm:$0x3] %v1016_v5 }
 0x13e PF: > { %s19_s29 = sadd.s32 1, %s1459_s29   ;;  %s1834_s27 = smov %s1455_s28 }
 0x13f   : > { %p16_p5 = scmp.ge.s32.totalorder %s19_s29, 4   ;;  %s1835_s28 = smov %s1837_s30 }
 0x141   :  { %18 = sbr.rel (!%p16_p5) target bundleno = 2 (0x2), region = 93 }

// kernel: bottleneck_forward.4
= control target key start
LH: loop header
LB: loop body
LE: loop exit
PB: predicated region body
PF: predicated region fallthrough
CT: control target
= control target key end

     0   :  { %s1536_s21 = smov 0   ;;  %s1538_s22 = smov 0   ;;  %s1870_s0 = inlined_call_operand.vmem [shape: bf16[2,160,128], index: 0, kind: input, shape index: {}]   ;;  %s1871_s1 = inlined_call_operand.vmem [shape: f32[160,1], index: 1, kind: input, shape index: {}]   ;;  %s1872_s2 = inlined_call_operand.vmem [shape: bf16[128,256], index: 2, kind: input, shape index: {}]   ;;  %s1873_s3 = inlined_call_operand.vmem [shape: f32[1,256], index: 3, kind: input, shape index: {}]   ;;  %s1874_s4 = inlined_call_operand.vmem [shape: bf16[2,160,128], index: 4, kind: output, shape index: {0}]   ;;  %s1875_s5 = inlined_call_operand.vmem [shape: f32[2,1,2,128], index: 5, kind: output, shape index: {1}]   ;;  %s1876_s6 = inlined_call_operand.vmem [shape: f32[2,1,2,128], index: 6, kind: output, shape index: {2}]  }
   0x1   :  { %s1540_s23 = smov 0  }
   0x2 LB: > { %s29_s24 = sadd.s32 1, %s1494_s22  ;;  %p1266_p0 = scmp.ge.s32.totalorder %s1498_s23, 1  ;;  %s1498_s23 = sphi %s1540_s23, %s17_s23   ;;  %s1494_s22 = sphi %s1538_s22, %s1878_s22   ;;  %s1490_s21 = sphi %s1536_s21, %s1877_s21  }
   0x3   : > { %p31_p1 = scmp.ge.s32.totalorder %s29_s24, 2  ;;  %p253_p2 = scmp.lt.s32.totalorder %s1498_s23, 3 }
   0x5   : > { %s1880_s24 = smov (%p31_p1, %s29_s24), 0  ;;  %p254_p3 = pnand %p1266_p0, %p253_p2 }
   0x6   : > { %v1442_v0 = vld [vmem:[%s1872_s2 + $0x4] ss:$8 sps:$4 sm:$0xff] (!%p254_p3)   ;;  %p311_p4 = scmp.lt.s32.totalorder (!%p254_p3), %s1490_s21, 1  ;;  %v1444_v1 = vld [vmem:[%s1872_s2] ss:$8 sps:$4 sm:$0xff] (!%p254_p3)   ;;  %v1500_v2 = vmov (!%p254_p3), 0   ;;  %v409_v47 = vlaneseq (!%p254_p3) }
   0x7   : > { %257 = sbr.rel (%p254_p3) target bundleno = 330 (0x14a), region = 36  ;;  %591 = vmatprep.mubr.bf16.mxu0 (!%p254_p3), %v1500_v2  ;;  %641 = vmatprep.mubr.bf16.mxu1 (!%p254_p3), %v1500_v2  ;;  %v1445_v3 = vld [vmem:[%s1872_s2 + $0x14] ss:$8 sps:$4 sm:$0xff] (!%p254_p3)   ;;  %v1447_v4 = vld [vmem:[%s1872_s2 + $0x10] ss:$8 sps:$4 sm:$0xff] (!%p254_p3)   ;;  %v371_v14 = vld [vmem:[%s1871_s1] sm:$0xff] (!%p254_p3) }
   0x8   : > { %559 = vmatprep.subr.bf16.mxu0 (!%p254_p3), %v1442_v0  ;;  %1398 = vmatprep.subr.bf16.mxu1 (!%p254_p3), %v1442_v0  ;;  %v1448_v5 = vld [vmem:[%s1872_s2 + $0x24] ss:$8 sps:$4 sm:$0xff] (!%p254_p3)   ;;  %v1450_v6 = vld [vmem:[%s1872_s2 + $0x20] ss:$8 sps:$4 sm:$0xff] (!%p254_p3)   ;;  %v1451_v7 = vld [vmem:[%s1872_s2 + $0x34] ss:$8 sps:$4 sm:$0xff] (!%p254_p3)  }
   0x9   : > { %560 = vmatpush1.bf16.msra.mxu0 (!%p254_p3), %v1444_v1  ;;  %1406 = vmatpush1.bf16.msra.mxu1 (!%p254_p3), %v1444_v1  ;;  %v1453_v8 = vld [vmem:[%s1872_s2 + $0x30] ss:$8 sps:$4 sm:$0xff] (!%p254_p3)   ;;  %v1454_v9 = vld [vmem:[%s1872_s2 + $0x44] ss:$8 sps:$4 sm:$0xff] (!%p254_p3)   ;;  %v1456_v10 = vld [vmem:[%s1872_s2 + $0x40] ss:$8 sps:$4 sm:$0xff] (!%p254_p3)  }
   0xa   : > { %561 = vmatprep.subr.bf16.mxu0 (!%p254_p3), %v1445_v3  ;;  %1399 = vmatprep.subr.bf16.mxu1 (!%p254_p3), %v1445_v3  ;;  %v1457_v11 = vld [vmem:[%s1872_s2 + $0x54] ss:$8 sps:$4 sm:$0xff] (!%p254_p3)   ;;  %v1459_v12 = vld [vmem:[%s1872_s2 + $0x50] ss:$8 sps:$4 sm:$0xff] (!%p254_p3)   ;;  %v1460_v13 = vld [vmem:[%s1872_s2 + $0x64] ss:$8 sps:$4 sm:$0xff] (!%p254_p3)  }
   0xb   : > { %1440 = vset.pattern.permute.xlu0 (!%p254_p3), %v1500_v2  ;;  %1441 = vset.pattern.permute.xlu1 (!%p254_p3), %v1500_v2  ;;  %v373_v15 = vld [vmem:[%s1871_s1 + $0x10] sm:$0xff] (!%p254_p3)  ;;  %v372_v16 = vld [vmem:[%s1871_s1 + $0x8] sm:$0xff] (!%p254_p3)  ;;  %v374_v18 = vld [vmem:[%s1871_s1 + $0x18] sm:$0xff] (!%p254_p3)  ;;  %v410_v48 = vshrl.u32 (!%p254_p3), %v409_v47, 7  ;;  %vm982_vm0 = vcmask (!%p254_p3), 1040384  }
   0xc   : > { %794 = vperm.xlu0 (!%p254_p3), %1440, %v371_v14   ;;  %804 = vperm.xlu1 (!%p254_p3), %1441, %v373_v15   ;;  %v1462_v17 = vld [vmem:[%s1872_s2 + $0x60] ss:$8 sps:$4 sm:$0xff] (!%p254_p3)   ;;  %v1463_v19 = vld [vmem:[%s1872_s2 + $0x74] ss:$8 sps:$4 sm:$0xff] (!%p254_p3)   ;;  %v1465_v21 = vld [vmem:[%s1872_s2 + $0x70] ss:$8 sps:$4 sm:$0xff] (!%p254_p3)  }
   0xd   : > { %562 = vmatpush1.bf16.msra.mxu0 (!%p254_p3), %v1447_v4  ;;  %1407 = vmatpush1.bf16.msra.mxu1 (!%p254_p3), %v1447_v4  ;;  %v375_v20 = vld [vmem:[%s1871_s1 + $0x20] sm:$0xff] (!%p254_p3)  ;;  %v376_v22 = vld [vmem:[%s1871_s1 + $0x28] sm:$0xff] (!%p254_p3)  ;;  %v377_v25 = vld [vmem:[%s1871_s1 + $0x30] sm:$0xff] (!%p254_p3)  ;;  %v411_v51 = vsub.s32 (!%p254_p3), 0, %v410_v48  ;;  %v415_v53 = vsub.s32 (!%p254_p3), 1, %v410_v48 }
   0xe   : > { %s1882_s21 = smov (!%p311_p4, %s1490_s21), 1  ;;  %563 = vmatprep.subr.bf16.mxu0 %v1448_v5  ;;  %1400 = vmatprep.subr.bf16.mxu1 %v1448_v5  ;;  %v378_v26 = vld [vmem:[%s1871_s1 + $0x38] sm:$0xff]  ;;  %v379_v27 = vld [vmem:[%s1871_s1 + $0x40] sm:$0xff]  ;;  %v380_v28 = vld [vmem:[%s1871_s1 + $0x48] sm:$0xff] }
   0xf   : > { %s1414_s11 = smul.u32 80, %s1882_s21  ;;  %v381_v31 = vld [vmem:[%s1871_s1 + $0x50] sm:$0xff]  ;;  %v382_v32 = vld [vmem:[%s1871_s1 + $0x58] sm:$0xff]  ;;  %v383_v33 = vld [vmem:[%s1871_s1 + $0x60] sm:$0xff] }
  0x10   : > { %799 = vperm.xlu0 %1440, %v372_v16   ;;  %809 = vperm.xlu1 %1441, %v374_v18   ;;  %v384_v34 = vld [vmem:[%s1871_s1 + $0x68] sm:$0xff]  ;;  %v385_v37 = vld [vmem:[%s1871_s1 + $0x70] sm:$0xff]  ;;  %v386_v38 = vld [vmem:[%s1871_s1 + $0x78] sm:$0xff] }
  0x11   : > { %s1587_s18 = scalar_lea.vmem %s1870_s0, %s1414_s11  ;;  %564 = vmatpush1.bf16.msra.mxu0 %v1450_v6  ;;  %1408 = vmatpush1.bf16.msra.mxu1 %v1450_v6  ;;  %v387_v39 = vld [vmem:[%s1871_s1 + $0x80] sm:$0xff]  ;;  %v388_v40 = vld [vmem:[%s1871_s1 + $0x88] sm:$0xff]  ;;  %v389_v43 = vld [vmem:[%s1871_s1 + $0x90] sm:$0xff]  ;;  %s1713_s30 = scalar_lea.vmem %s1874_s4, %s1414_s11 }
  0x12   : > { %565 = vmatprep.subr.bf16.mxu0 %v1451_v7  ;;  %1401 = vmatprep.subr.bf16.mxu1 %v1451_v7  ;;  %v1466_v23 = vld [vmem:[%s1587_s18] sm:$0xff]   ;;  %v1467_v24 = vld [vmem:[%s1587_s18 + $0x28] sm:$0xff]   ;;  %v1469_v30 = vld [vmem:[%s1587_s18 + $0x30] sm:$0xff]   ;;  %s1269_s11 = sshll.u32 %s1882_s21, 1 }
  0x13   : > { %v1468_v29 = vld [vmem:[%s1587_s18 + $0x8] sm:$0xff]   ;;  %v1470_v35 = vld [vmem:[%s1587_s18 + $0x10] sm:$0xff]   ;;  %v1471_v36 = vld [vmem:[%s1587_s18 + $0x38] sm:$0xff]   ;;  %s342_s9 = scalar_lea.vmem %s1875_s5, %s1269_s11  ;;  %s349_s13 = scalar_lea.vmem %s1876_s6, %s1269_s11 }
  0x14   : > { %814 = vperm.xlu0 %1440, %v375_v20   ;;  %819 = vperm.xlu1 %1441, %v376_v22   ;;  %v1472_v41 = vld [vmem:[%s1587_s18 + $0x18] sm:$0xff]   ;;  %v1473_v42 = vld [vmem:[%s1587_s18 + $0x40] sm:$0xff]   ;;  %v1475_v46 = vld [vmem:[%s1587_s18 + $0x48] sm:$0xff]  }
  0x15   : > { %566 = vmatpush1.bf16.msra.mxu0 %v1453_v8  ;;  %1409 = vmatpush1.bf16.msra.mxu1 %v1453_v8  ;;  %v390_v44 = vld [vmem:[%s1871_s1 + $0x98] sm:$0xff]  ;;  %v1474_v45 = vld [vmem:[%s1587_s18 + $0x20] sm:$0xff]  }
  0x16   : > { %567 = vmatprep.subr.bf16.mxu0 %v1454_v9  ;;  %1402 = vmatprep.subr.bf16.mxu1 %v1454_v9  ;;  %v407_v52 = vld [vmem:[%s1873_s3] sm:$0x3] }
  0x17   : > { %v1697_v54 = vrot.slane %v407_v52, %v411_v51  ;;  %v1699_v55 = vrot.slane %v407_v52, %v415_v53 }
  0x18   : > { %824 = vperm.xlu0 %1440, %v377_v25   ;;  %829 = vperm.xlu1 %1441, %v378_v26  }
  0x19   : > { %568 = vmatpush1.bf16.msra.mxu0 %v1456_v10  ;;  %1410 = vmatpush1.bf16.msra.mxu1 %v1456_v10 }
  0x1a   : > { %569 = vmatprep.subr.bf16.mxu0 %v1457_v11  ;;  %1403 = vmatprep.subr.bf16.mxu1 %v1457_v11 }
  0x1c   : > { %834 = vperm.xlu0 %1440, %v379_v27   ;;  %839 = vperm.xlu1 %1441, %v380_v28  }
  0x1d   : > { %570 = vmatpush1.bf16.msra.mxu0 %v1459_v12  ;;  %1411 = vmatpush1.bf16.msra.mxu1 %v1459_v12 }
  0x1e   : > { %571 = vmatprep.subr.bf16.mxu0 %v1460_v13  ;;  %1404 = vmatprep.subr.bf16.mxu1 %v1460_v13 }
  0x20   : > { %844 = vperm.xlu0 %1440, %v381_v31   ;;  %849 = vperm.xlu1 %1441, %v382_v32  }
  0x21   : > { %572 = vmatpush1.bf16.msra.mxu0 %v1462_v17  ;;  %1412 = vmatpush1.bf16.msra.mxu1 %v1462_v17 }
  0x22   : > { %573 = vmatprep.subr.bf16.mxu0 %v1463_v19  ;;  %1405 = vmatprep.subr.bf16.mxu1 %v1463_v19 }
  0x24   : > { %854 = vperm.xlu0 %1440, %v383_v33   ;;  %859 = vperm.xlu1 %1441, %v384_v34  }
  0x25   : > { %574 = vmatpush1.bf16.msra.mxu0 %v1465_v21  ;;  %1413 = vmatpush1.bf16.msra.mxu1 %v1465_v21 }
  0x28   : > { %592 = vmatmul.mubr.bf16.vlgmr.msra.gmra.mrb[0].mxu0 %v1466_v23  ;;  %642 = vmatmul.mubr.bf16.vlgmr.msra.gmra.mrb[0].mxu1 %v1467_v24 }
  0x29   : > { %601 = vmatprep.mubr.bf16.mxu0 %v1500_v2  ;;  %651 = vmatprep.mubr.bf16.mxu1 %v1500_v2 }
  0x2a   : > { %864 = vperm.xlu0 %1440, %v385_v37   ;;  %869 = vperm.xlu1 %1441, %v386_v38  }
  0x2e   : > { %874 = vperm.xlu0 %1440, %v387_v39   ;;  %879 = vperm.xlu1 %1441, %v388_v40  }
  0x30   : > { %602 = vmatmul.mubr.bf16.gmra.mrb[4].mxu0 %v1468_v29  ;;  %652 = vmatmul.mubr.bf16.gmra.mrb[4].mxu1 %v1469_v30 }
  0x31   : > { %611 = vmatprep.mubr.bf16.mxu0 %v1500_v2  ;;  %661 = vmatprep.mubr.bf16.mxu1 %v1500_v2 }
  0x32   : > { %884 = vperm.xlu0 %1440, %v389_v43   ;;  %889 = vperm.xlu1 %1441, %v390_v44  }
  0x38   : > { %612 = vmatmul.mubr.bf16.gmra.mrb[8].mxu0 %v1470_v35  ;;  %662 = vmatmul.mubr.bf16.gmra.mrb[8].mxu1 %v1471_v36 }
  0x39   : > { %621 = vmatprep.mubr.bf16.mxu0 %v1500_v2  ;;  %671 = vmatprep.mubr.bf16.mxu1 %v1500_v2 }
  0x40   : > { %622 = vmatmul.mubr.bf16.gmra.mrb[12].mxu0 %v1472_v41  ;;  %672 = vmatmul.mubr.bf16.gmra.mrb[12].mxu1 %v1473_v42 }
  0x41   : > { %631 = vmatprep.mubr.bf16.mxu0 %v1500_v2  ;;  %681 = vmatprep.mubr.bf16.mxu1 %v1500_v2 }
  0x48   : > { %632 = vmatmul.mubr.bf16.gmra.mrb[16].mxu0 %v1474_v45  ;;  %682 = vmatmul.mubr.bf16.gmra.mrb[16].mxu1 %v1475_v46 }
  0x8b   : > { %v795_v49 = vpop.permute.xlu0 %794  ;;  %v805_v50 = vpop.permute.xlu1 %804 }
  0x8f   : > { %v800_v56 = vpop.permute.xlu0 %799  ;;  %v810_v57 = vpop.permute.xlu1 %809 }
  0x93   : > { %v815_v14 = vpop.permute.xlu0 %814  ;;  %v1724_v15 = vpop.permute.xlu1 %819 }
  0x97   : > { %v825_v47 = vpop.permute.xlu0 %824  ;;  %v1742_v48 = vpop.permute.xlu1 %829 }
  0xfb   : > { %v593_v58 = vpop.f32.mrb[0].mxu0  ;;  %v643_v59 = vpop.f32.mrb[0].mxu1 }
  0xfc   : > { %v594_v60 = vadd.f32 %v593_v58, %v1697_v54  ;;  %v595_v61 = vpop.f32.mrb[1].mxu0  ;;  %v1702_v62 = vpop.f32.mrb[1].mxu1  ;;  %v1717_v8 = vadd.f32 %v643_v59, %v1697_v54 }
  0xfd   : > { %v596_v63 = vadd.f32 %v595_v61, %v1699_v55  ;;  %v597_v0 = vpop.f32.mrb[2].mxu0  ;;  %v647_v1 = vpop.f32.mrb[2].mxu1 }
  0xfe   : > { %v892_v2 = vmul.f32 %v795_v49, %v594_v60  ;;  %v598_v3 = vadd.f32 %v597_v0, %v1697_v54  ;;  %v599_v4 = vpop.f32.mrb[3].mxu0  ;;  %v1706_v5 = vpop.f32.mrb[3].mxu1  ;;  %v1720_v9 = vadd.f32 %v647_v1, %v1697_v54 }
  0xff   : > { %v985_v6 = vmul.f32 %v795_v49, %v596_v63  ;;  %v600_v7 = vadd.f32 %v599_v4, %v1699_v55 }
 0x100   : > { %v1342_v10 = vpack.c.bf16 %v598_v3, %v594_v60  ;;  %v893_v11 = vmul.f32 %v800_v56, %v598_v3  ;;  %v1367_v13 = vpack.c.bf16 %v1720_v9, %v1717_v8  ;;  %v937_v16 = vmul.f32 %v892_v2, %v594_v60 }
 0x101   : > { %v986_v12 = vmul.f32 %v800_v56, %v600_v7  ;;  %v1030_v19 = vmul.f32 %v985_v6, %v596_v63 }
 0x102   : > { %1343 = vst [vmem:[%s1713_s30] sm:$0xff] %v1342_v10   ;;  %v912_v17 = vadd.f32 %v893_v11, %v892_v2  ;;  %v938_v18 = vmul.f32 %v893_v11, %v598_v3  ;;  %1393 = vst [vmem:[%s1713_s30 + $0x28] sm:$0xff] %v1367_v13  }
 0x103   : > { %v1005_v20 = vadd.f32 %v986_v12, %v985_v6  ;;  %v1031_v21 = vmul.f32 %v986_v12, %v600_v7  ;;  %v603_v22 = vpop.f32.mrb[4].mxu0  ;;  %v653_v23 = vpop.f32.mrb[4].mxu1 }
 0x104   : > { %v957_v24 = vadd.f32 %v938_v18, %v937_v16  ;;  %v604_v25 = vadd.f32 %v603_v22, %v1697_v54  ;;  %v605_v26 = vpop.f32.mrb[5].mxu0  ;;  %v1729_v27 = vpop.f32.mrb[5].mxu1  ;;  %v1737_v38 = vadd.f32 %v653_v23, %v1697_v54 }
 0x105   : > { %v1050_v28 = vadd.f32 %v1031_v21, %v1030_v19  ;;  %v606_v29 = vadd.f32 %v605_v26, %v1699_v55  ;;  %v607_v30 = vpop.f32.mrb[6].mxu0  ;;  %v657_v31 = vpop.f32.mrb[6].mxu1 }
 0x106   : > { %v894_v32 = vmul.f32 %v805_v50, %v604_v25  ;;  %v608_v33 = vadd.f32 %v607_v30, %v1697_v54  ;;  %v609_v34 = vpop.f32.mrb[7].mxu0  ;;  %v1733_v35 = vpop.f32.mrb[7].mxu1  ;;  %v1740_v46 = vadd.f32 %v657_v31, %v1697_v54 }
 0x107   : > { %v987_v36 = vmul.f32 %v805_v50, %v606_v29  ;;  %v610_v37 = vadd.f32 %v609_v34, %v1699_v55  ;;  %v1761_v22 = vpop.permute.xlu0 %834  ;;  %v1763_v23 = vpop.permute.xlu1 %839 }
 0x108   : > { %v913_v39 = vadd.f32 %v912_v17, %v894_v32  ;;  %v939_v40 = vmul.f32 %v894_v32, %v604_v25  ;;  %v1347_v41 = vpack.c.bf16 %v608_v33, %v604_v25  ;;  %v895_v42 = vmul.f32 %v810_v57, %v608_v33 }
 0x109   : > { %v1006_v43 = vadd.f32 %v1005_v20, %v987_v36  ;;  %v1032_v44 = vmul.f32 %v987_v36, %v606_v29  ;;  %v988_v45 = vmul.f32 %v810_v57, %v610_v37  ;;  %v1372_v58 = vpack.c.bf16 %v1740_v46, %v1737_v38 }
 0x10a   : > { %v958_v49 = vadd.f32 %v957_v24, %v939_v40  ;;  %1389 = vst [vmem:[%s1713_s30 + $0x8] sm:$0xff] %v1347_v41   ;;  %v914_v50 = vadd.f32 %v913_v39, %v895_v42  ;;  %v940_v51 = vmul.f32 %v895_v42, %v608_v33 }
 0x10b   : > { %v1051_v52 = vadd.f32 %v1050_v28, %v1032_v44  ;;  %v1007_v53 = vadd.f32 %v1006_v43, %v988_v45  ;;  %v1033_v56 = vmul.f32 %v988_v45, %v610_v37  ;;  %v613_v59 = vpop.f32.mrb[8].mxu0  ;;  %v663_v60 = vpop.f32.mrb[8].mxu1  ;;  %1394 = vst [vmem:[%s1713_s30 + $0x30] sm:$0xff] %v1372_v58  }
 0x10c   : > { %v959_v57 = vadd.f32 %v958_v49, %v940_v51  ;;  %v614_v61 = vadd.f32 %v613_v59, %v1697_v54  ;;  %v615_v63 = vpop.f32.mrb[9].mxu0  ;;  %v1748_v0 = vpop.f32.mrb[9].mxu1  ;;  %v1756_v12 = vadd.f32 %v663_v60, %v1697_v54 }
 0x10d   : > { %v1052_v1 = vadd.f32 %v1051_v52, %v1033_v56  ;;  %v616_v2 = vadd.f32 %v615_v63, %v1699_v55  ;;  %v617_v3 = vpop.f32.mrb[10].mxu0  ;;  %v667_v4 = vpop.f32.mrb[10].mxu1 }
 0x10e   : > { %v896_v6 = vmul.f32 %v815_v14, %v614_v61  ;;  %v618_v7 = vadd.f32 %v617_v3, %v1697_v54  ;;  %v619_v10 = vpop.f32.mrb[11].mxu0  ;;  %v1753_v11 = vpop.f32.mrb[11].mxu1  ;;  %v1759_v19 = vadd.f32 %v667_v4, %v1697_v54 }
 0x10f   : > { %v989_v13 = vmul.f32 %v815_v14, %v616_v2  ;;  %v620_v28 = vadd.f32 %v619_v10, %v1699_v55 }
 0x110   : > { %v915_v16 = vadd.f32 %v914_v50, %v896_v6  ;;  %v941_v17 = vmul.f32 %v896_v6, %v614_v61  ;;  %v1352_v18 = vpack.c.bf16 %v618_v7, %v614_v61  ;;  %v897_v25 = vmul.f32 %v1724_v15, %v618_v7  ;;  %v850_v61 = vpop.permute.xlu1 %849 }
 0x111   : > { %v1008_v20 = vadd.f32 %v1007_v53, %v989_v13  ;;  %v1034_v21 = vmul.f32 %v989_v13, %v616_v2  ;;  %v1377_v14 = vpack.c.bf16 %v1759_v19, %v1756_v12  ;;  %v990_v37 = vmul.f32 %v1724_v15, %v620_v28 }
 0x112   : > { %v960_v24 = vadd.f32 %v959_v57, %v941_v17  ;;  %1390 = vst [vmem:[%s1713_s30 + $0x10] sm:$0xff] %v1352_v18   ;;  %v916_v31 = vadd.f32 %v915_v16, %v897_v25  ;;  %v942_v32 = vmul.f32 %v897_v25, %v618_v7  ;;  %v646_v15 = vadd.f32 %v1702_v62, %v1699_v55  ;;  %v845_v57 = vpop.permute.xlu0 %844 }
 0x113   : > { %v1053_v26 = vadd.f32 %v1052_v1, %v1034_v21  ;;  %v623_v29 = vpop.f32.mrb[12].mxu0  ;;  %v673_v30 = vpop.f32.mrb[12].mxu1  ;;  %1395 = vst [vmem:[%s1713_s30 + $0x38] sm:$0xff] %v1377_v14   ;;  %v1009_v50 = vadd.f32 %v1008_v20, %v990_v37  ;;  %v1035_v51 = vmul.f32 %v990_v37, %v620_v28  ;;  %v902_v13 = vmul.f32 %v845_v57, %v1717_v8 }
 0x114   : > { %v624_v33 = vadd.f32 %v623_v29, %v1697_v54  ;;  %v625_v34 = vpop.f32.mrb[13].mxu0  ;;  %v1772_v36 = vpop.f32.mrb[13].mxu1  ;;  %v961_v42 = vadd.f32 %v960_v24, %v942_v32  ;;  %v1783_v1 = vadd.f32 %v673_v30, %v1697_v54  ;;  %v995_v32 = vmul.f32 %v845_v57, %v646_v15 }
 0x115   : > { %v626_v39 = vadd.f32 %v625_v34, %v1699_v55  ;;  %v627_v40 = vpop.f32.mrb[14].mxu0  ;;  %v677_v41 = vpop.f32.mrb[14].mxu1  ;;  %v1054_v58 = vadd.f32 %v1053_v26, %v1035_v51  ;;  %v947_v37 = vmul.f32 %v902_v13, %v1717_v8 }
 0x116   : > { %v898_v43 = vmul.f32 %v825_v47, %v624_v33  ;;  %v628_v44 = vadd.f32 %v627_v40, %v1697_v54  ;;  %v629_v45 = vpop.f32.mrb[15].mxu0  ;;  %v1777_v49 = vpop.f32.mrb[15].mxu1 }
 0x117   : > { %v991_v56 = vmul.f32 %v825_v47, %v626_v39  ;;  %v1787_v47 = vadd.f32 %v677_v41, %v1697_v54  ;;  %v630_v62 = vadd.f32 %v629_v45, %v1699_v55  ;;  %v855_v41 = vpop.permute.xlu0 %854 }
 0x118   : > { %v917_v52 = vadd.f32 %v916_v31, %v898_v43  ;;  %v943_v53 = vmul.f32 %v898_v43, %v624_v33  ;;  %v1357_v59 = vpack.c.bf16 %v628_v44, %v624_v33  ;;  %v899_v60 = vmul.f32 %v1742_v48, %v628_v44 }
 0x119   : > { %v1010_v2 = vadd.f32 %v1009_v50, %v991_v56  ;;  %v1036_v3 = vmul.f32 %v991_v56, %v626_v39  ;;  %v1382_v24 = vpack.c.bf16 %v1787_v47, %v1783_v1  ;;  %v992_v25 = vmul.f32 %v1742_v48, %v630_v62 }
 0x11a   : > { %v962_v63 = vadd.f32 %v961_v42, %v943_v53  ;;  %1391 = vst [vmem:[%s1713_s30 + $0x18] sm:$0xff] %v1357_v59   ;;  %v918_v4 = vadd.f32 %v917_v52, %v899_v60  ;;  %v944_v6 = vmul.f32 %v899_v60, %v628_v44  ;;  %v650_v39 = vadd.f32 %v1706_v5, %v1699_v55  ;;  %v860_v52 = vpop.permute.xlu1 %859 }
 0x11b   : > { %v633_v7 = vpop.f32.mrb[16].mxu0  ;;  %v683_v10 = vpop.f32.mrb[16].mxu1  ;;  %v1055_v16 = vadd.f32 %v1054_v58, %v1036_v3  ;;  %1396 = vst [vmem:[%s1713_s30 + $0x40] sm:$0xff] %v1382_v24   ;;  %v1011_v33 = vadd.f32 %v1010_v2, %v992_v25  ;;  %v1037_v34 = vmul.f32 %v992_v25, %v630_v62  ;;  %v903_v42 = vmul.f32 %v850_v61, %v1720_v9 }
 0x11c   : > { %v634_v17 = vadd.f32 %v633_v7, %v1697_v54  ;;  %v635_v18 = vpop.f32.mrb[17].mxu0  ;;  %v1792_v20 = vpop.f32.mrb[17].mxu1  ;;  %v963_v21 = vadd.f32 %v962_v63, %v944_v6  ;;  %v1809_v51 = vadd.f32 %v683_v10, %v1697_v54  ;;  %v656_v53 = vadd.f32 %v1729_v27, %v1699_v55 }
 0x11d   : > { %v637_v14 = vpop.f32.mrb[18].mxu0  ;;  %v687_v26 = vpop.f32.mrb[18].mxu1  ;;  %v636_v29 = vadd.f32 %v635_v18, %v1699_v55  ;;  %v1056_v43 = vadd.f32 %v1055_v16, %v1037_v34  ;;  %v996_v59 = vmul.f32 %v850_v61, %v650_v39  ;;  %v904_v2 = vmul.f32 %v855_v41, %v1737_v38 }
 0x11e   : > { %v900_v28 = vmul.f32 %v1761_v22, %v634_v17  ;;  %v639_v30 = vpop.f32.mrb[19].mxu0  ;;  %v1799_v31 = vpop.f32.mrb[19].mxu1  ;;  %v638_v45 = vadd.f32 %v637_v14, %v1697_v54  ;;  %v1812_v8 = vadd.f32 %v687_v26, %v1697_v54  ;;  %v1040_v54 = vmul.f32 %v995_v32, %v646_v15 }
 0x11f   : > { %v993_v44 = vmul.f32 %v1761_v22, %v636_v29  ;;  %v640_v5 = vadd.f32 %v639_v30, %v1699_v55  ;;  %v660_v3 = vadd.f32 %v1733_v35, %v1699_v55  ;;  %v948_v27 = vmul.f32 %v903_v42, %v1720_v9  ;;  %v865_v7 = vpop.permute.xlu0 %864  ;;  %v870_v25 = vpop.permute.xlu1 %869 }
 0x120   : > { %v919_v40 = vadd.f32 %v918_v4, %v900_v28  ;;  %v945_v48 = vmul.f32 %v900_v28, %v634_v17  ;;  %v1362_v22 = vpack.c.bf16 %v638_v45, %v634_v17  ;;  %v901_v60 = vmul.f32 %v1763_v23, %v638_v45 }
 0x121   : > { %v1012_v56 = vadd.f32 %v1011_v33, %v993_v44  ;;  %v1038_v58 = vmul.f32 %v993_v44, %v636_v29  ;;  %v1387_v57 = vpack.c.bf16 %v1812_v8, %v1809_v51  ;;  %v994_v63 = vmul.f32 %v1763_v23, %v640_v5 }
 0x122   : > { %v964_v50 = vadd.f32 %v963_v21, %v945_v48  ;;  %1392 = vst [vmem:[%s1713_s30 + $0x20] sm:$0xff] %v1362_v22   ;;  %v920_v6 = vadd.f32 %v919_v40, %v901_v60  ;;  %v946_v62 = vmul.f32 %v901_v60, %v638_v45  ;;  %v997_v10 = vmul.f32 %v855_v41, %v656_v53 }
 0x123   : > { %v1057_v4 = vadd.f32 %v1056_v43, %v1038_v58  ;;  %1397 = vst [vmem:[%s1713_s30 + $0x48] sm:$0xff] %v1387_v57   ;;  %v1013_v61 = vadd.f32 %v1012_v56, %v994_v63  ;;  %v905_v16 = vmul.f32 %v860_v52, %v1740_v46  ;;  %v666_v23 = vadd.f32 %v1748_v0, %v1699_v55  ;;  %v875_v41 = vpop.permute.xlu0 %874 }
 0x124   : > { %v1039_v15 = vmul.f32 %v994_v63, %v640_v5  ;;  %v1041_v17 = vmul.f32 %v996_v59, %v650_v39  ;;  %v921_v18 = vadd.f32 %v920_v6, %v902_v13  ;;  %v965_v21 = vadd.f32 %v964_v50, %v946_v62 }
 0x125   : > { %v1014_v35 = vadd.f32 %v1013_v61, %v995_v32  ;;  %v949_v24 = vmul.f32 %v904_v2, %v1737_v38  ;;  %v998_v9 = vmul.f32 %v860_v52, %v660_v3  ;;  %v906_v14 = vmul.f32 %v865_v7, %v1756_v12 }
 0x126   : > { %v1058_v26 = vadd.f32 %v1057_v4, %v1039_v15  ;;  %v670_v28 = vadd.f32 %v1753_v11, %v1699_v55  ;;  %v922_v29 = vadd.f32 %v921_v18, %v903_v42  ;;  %v966_v30 = vadd.f32 %v965_v21, %v947_v37 }
 0x127   : > { %v1015_v33 = vadd.f32 %v1014_v35, %v996_v59  ;;  %v1042_v34 = vmul.f32 %v997_v10, %v656_v53  ;;  %v950_v0 = vmul.f32 %v905_v16, %v1740_v46  ;;  %v999_v39 = vmul.f32 %v865_v7, %v666_v23  ;;  %v880_v46 = vpop.permute.xlu1 %879  ;;  %v885_v6 = vpop.permute.xlu0 %884 }
 0x128   : > { %v1059_v13 = vadd.f32 %v1058_v26, %v1040_v54  ;;  %v907_v32 = vmul.f32 %v870_v25, %v1759_v19  ;;  %v923_v40 = vadd.f32 %v922_v29, %v904_v2  ;;  %v967_v38 = vadd.f32 %v966_v30, %v948_v27 }
 0x129   : > { %v1016_v48 = vadd.f32 %v1015_v33, %v997_v10  ;;  %v1043_v43 = vmul.f32 %v998_v9, %v660_v3  ;;  %v951_v44 = vmul.f32 %v906_v14, %v1756_v12  ;;  %v676_v11 = vadd.f32 %v1772_v36, %v1699_v55 }
 0x12a   : > { %v1060_v42 = vadd.f32 %v1059_v13, %v1041_v17  ;;  %v1000_v37 = vmul.f32 %v870_v25, %v670_v28  ;;  %v924_v45 = vadd.f32 %v923_v40, %v905_v16  ;;  %v968_v50 = vadd.f32 %v967_v38, %v949_v24 }
 0x12b   : > { %v1017_v5 = vadd.f32 %v1016_v48, %v998_v9  ;;  %v1044_v52 = vmul.f32 %v999_v39, %v666_v23  ;;  %v908_v53 = vmul.f32 %v875_v41, %v1783_v1  ;;  %v680_v56 = vadd.f32 %v1777_v49, %v1699_v55  ;;  %v890_v15 = vpop.permute.xlu1 %889 }
 0x12c   : > { %v1061_v58 = vadd.f32 %v1060_v42, %v1042_v34  ;;  %v952_v22 = vmul.f32 %v907_v32, %v1759_v19  ;;  %v969_v59 = vadd.f32 %v968_v50, %v950_v0  ;;  %v925_v12 = vadd.f32 %v924_v45, %v906_v14 }
 0x12d   : > { %v1018_v60 = vadd.f32 %v1017_v5, %v999_v39  ;;  %v1001_v57 = vmul.f32 %v875_v41, %v676_v11  ;;  %v909_v36 = vmul.f32 %v880_v46, %v1787_v47  ;;  %v686_v63 = vadd.f32 %v1792_v20, %v1699_v55 }
 0x12e   : > { %v1062_v54 = vadd.f32 %v1061_v58, %v1043_v43  ;;  %v1045_v2 = vmul.f32 %v1000_v37, %v670_v28  ;;  %v926_v3 = vadd.f32 %v925_v12, %v907_v32  ;;  %v970_v4 = vadd.f32 %v969_v59, %v951_v44 }
 0x12f   : > { %v1019_v27 = vadd.f32 %v1018_v60, %v1000_v37  ;;  %v953_v49 = vmul.f32 %v908_v53, %v1783_v1  ;;  %v1002_v62 = vmul.f32 %v880_v46, %v680_v56  ;;  %v690_v19 = vadd.f32 %v1799_v31, %v1699_v55 }
 0x130   : > { %v1063_v61 = vadd.f32 %v1062_v54, %v1044_v52  ;;  %v910_v7 = vmul.f32 %v885_v6, %v1809_v51  ;;  %v927_v10 = vadd.f32 %v926_v3, %v908_v53  ;;  %v971_v16 = vadd.f32 %v970_v4, %v952_v22 }
 0x131   : > { %v1020_v23 = vadd.f32 %v1019_v27, %v1001_v57  ;;  %v1046_v20 = vmul.f32 %v1001_v57, %v676_v11  ;;  %v954_v17 = vmul.f32 %v909_v36, %v1787_v47  ;;  %v1003_v18 = vmul.f32 %v885_v6, %v686_v63 }
 0x132   : > { %v1064_v21 = vadd.f32 %v1063_v61, %v1045_v2  ;;  %v911_v35 = vmul.f32 %v890_v15, %v1812_v8  ;;  %v928_v24 = vadd.f32 %v927_v10, %v909_v36  ;;  %v972_v1 = vadd.f32 %v971_v16, %v953_v49 }
 0x133   : > { %v1021_v25 = vadd.f32 %v1020_v23, %v1002_v62  ;;  %v1047_v9 = vmul.f32 %v1002_v62, %v680_v56  ;;  %v1004_v14 = vmul.f32 %v890_v15, %v690_v19  ;;  %v955_v31 = vmul.f32 %v910_v7, %v1809_v51 }
 0x134   : > { %v1065_v55 = vadd.f32 %v1064_v21, %v1046_v20  ;;  %v929_v26 = vadd.f32 %v928_v24, %v910_v7  ;;  %v973_v28 = vadd.f32 %v972_v1, %v954_v17  ;;  %v1048_v30 = vmul.f32 %v1003_v18, %v686_v63 }
 0x135   : > { %v1022_v29 = vadd.f32 %v1021_v25, %v1003_v18  ;;  %v956_v47 = vmul.f32 %v911_v35, %v1812_v8  ;;  %v1049_v13 = vmul.f32 %v1004_v14, %v690_v19 }
 0x136   : > { %v1066_v33 = vadd.f32 %v1065_v55, %v1047_v9  ;;  %v930_v34 = vadd.f32 %v929_v26, %v911_v35  ;;  %v974_v0 = vadd.f32 %v973_v28, %v955_v31 }
 0x137   : > { %v1023_v39 = vadd.f32 %v1022_v29, %v1004_v14 }
 0x138   : > { %v1067_v32 = vadd.f32 %v1066_v33, %v1048_v30  ;;  %v931_v40 = vrot.slane %v930_v34, 4  ;;  %v975_v38 = vadd.f32 %v974_v0, %v956_v47 }
 0x139   : > { %v1024_v48 = vrot.slane %v1023_v39, 4 }
 0x13a   : > { %v1068_v41 = vadd.f32 %v1067_v32, %v1049_v13  ;;  %v932_v43 = vadd.f32 %v931_v40, %v930_v34  ;;  %v976_v44 = vrot.slane %v975_v38, 4 }
 0x13b   : > { %v1025_v51 = vadd.f32 %v1024_v48, %v1023_v39 }
 0x13c   : > { %v1069_v11 = vrot.slane %v1068_v41, 4  ;;  %v933_v42 = vrot.slane %v932_v43, 2  ;;  %v977_v37 = vadd.f32 %v976_v44, %v975_v38 }
 0x13d   : > { %v1026_v45 = vrot.slane %v1025_v51, 2 }
 0x13e   : > { %v1070_v50 = vadd.f32 %v1069_v11, %v1068_v41  ;;  %v934_v5 = vadd.f32 %v933_v42, %v932_v43  ;;  %v978_v46 = vrot.slane %v977_v37, 2 }
 0x13f   : > { %v1027_v8 = vadd.f32 %v1026_v45, %v1025_v51 }
 0x140   : > { %v1071_v52 = vrot.slane %v1070_v50, 2  ;;  %v935_v53 = vrot.slane %v934_v5, 1  ;;  %v979_v56 = vadd.f32 %v978_v46, %v977_v37 }
 0x141   : > { %v1028_v58 = vrot.slane %v1027_v8, 1 }
 0x142   : > { %v1072_v22 = vadd.f32 %v1071_v52, %v1070_v50  ;;  %v980_v59 = vrot.slane %v979_v56, 1  ;;  %v936_v60 = vadd.f32 %v935_v53, %v934_v5 }
 0x143   : > { %v1029_v36 = vadd.f32 %v1028_v58, %v1027_v8 }
 0x144   : > { %v1073_v12 = vrot.slane %v1072_v22, 1  ;;  %v981_v57 = vadd.f32 %v980_v59, %v979_v56 }
 0x146   : > { %v1074_v63 = vadd.f32 %v1073_v12, %v1072_v22  ;;  %v983_v54 = vsel %vm982_vm0, %v936_v60, %v981_v57 }
 0x147   : > { %984 = vst [vmem:[%s342_s9] sm:$0x3] %v983_v54 }
 0x148   : > { %v1075_v2 = vsel %vm982_vm0, %v1029_v36, %v1074_v63 }
 0x149   : > { %1076 = vst [vmem:[%s349_s13] sm:$0x3] %v1075_v2 }
 0x14a PF: > { %s17_s23 = sadd.s32 1, %s1498_s23   ;;  %s1877_s21 = smov %s1494_s22 }
 0x14b   : > { %p14_p5 = scmp.ge.s32.totalorder %s17_s23, 4   ;;  %s1878_s22 = smov %s1880_s24 }
 0x14d   :  { %16 = sbr.rel (!%p14_p5) target bundleno = 2 (0x2), region = 93 }

// kernel: bottleneck_forward.5
= control target key start
LH: loop header
LB: loop body
LE: loop exit
PB: predicated region body
PF: predicated region fallthrough
CT: control target
= control target key end

     0   :  { %s3459_s27 = smov 0   ;;  %s4406_s0 = inlined_call_operand.vmem [shape: bf16[2,160,128], index: 0, kind: input, shape index: {}]   ;;  %s4407_s1 = inlined_call_operand.vmem [shape: f32[160,1], index: 1, kind: input, shape index: {}]   ;;  %s4408_s2 = inlined_call_operand.vmem [shape: f32[2,128], index: 2, kind: input, shape index: {}]   ;;  %s4409_s3 = inlined_call_operand.vmem [shape: f32[1,128], index: 3, kind: input, shape index: {}]   ;;  %s4410_s4 = inlined_call_operand.vmem [shape: f32[1,128], index: 4, kind: input, shape index: {}]   ;;  %s4411_s5 = inlined_call_operand.vmem [shape: bf16[3,384,128], index: 5, kind: input, shape index: {}]   ;;  %s4412_s6 = inlined_call_operand.vmem [shape: f32[1,128], index: 6, kind: input, shape index: {}]   ;;  %s4413_s7 = inlined_call_operand.vmem [shape: bf16[2,160,128], index: 7, kind: output, shape index: {0}]   ;;  %s4414_s8 = inlined_call_operand.vmem [shape: f32[2,2,128], index: 8, kind: output, shape index: {1}]  }
   0x1 LB: > { %s2485_s28 = sadd.s32 4294967295, %s3411_s27   ;;  %p2489_p0 = scmp.ge.s32.totalorder %s3411_s27, 1  ;;  %s3411_s27 = sphi %s3459_s27, %s19_s27  }
   0x2   : > { %p265_p1 = scmp.lt.s32.totalorder %s3411_s27, 3 }
   0x4   : > { %p266_p2 = pnand %p2489_p0, %p265_p1 }
   0x6   : > { %269 = sbr.rel (%p266_p2) target bundleno = 594 (0x252), region = 48 }
   0xd   : > { %v320_v0 = vld [vmem:[%s4407_s1 + $0x10] sm:$0xff]  ;;  %v318_v1 = vld [vmem:[%s4407_s1] sm:$0xff]  ;;  %v3413_v2 = vmov 0   ;;  %v321_v3 = vld [vmem:[%s4407_s1 + $0x18] sm:$0xff]  ;;  %p303_p3 = scmp.lt.s32.totalorder %s2485_s28, 1  ;;  %v392_v55 = vlaneseq  ;;  %vm2396_vm2 = vcmask 1040384  }
   0xe   : > { %3329 = vset.pattern.permute.xlu1 %v3413_v2  ;;  %582 = vst [vmem:[#allocation2] sm:$0xff] %v3413_v2  ;;  %583 = vst [vmem:[#allocation2 + $0x8] sm:$0xff] %v3413_v2  ;;  %3328 = vset.pattern.permute.xlu0 %v3413_v2  ;;  %v319_v4 = vld [vmem:[%s4407_s1 + $0x8] sm:$0xff]  ;;  %v322_v6 = vld [vmem:[%s4407_s1 + $0x20] sm:$0xff]  ;;  %vm619_vm0 = vsmask.f32 256 }
   0xf   : > { %586 = vst [vmem:[#allocation2 + $0x110] sm:$0xff] %v3413_v2  ;;  %474 = vperm.xlu1 %3329, %v320_v0   ;;  %464 = vperm.xlu0 %3328, %v318_v1   ;;  %v323_v5 = vld [vmem:[%s4407_s1 + $0x28] sm:$0xff]  ;;  %v3330_v7 = vld [vmem:[%s4411_s5 + $0x100] sm:$0xff]   ;;  %v325_v9 = vld [vmem:[%s4407_s1 + $0x38] sm:$0xff]  ;;  %s4428_s28 = smov (!%p303_p3, %s2485_s28), 1  ;;  %v393_v59 = vshrl.u32 %v392_v55, 7 }
  0x10   : > { %v3331_v8 = vld [vmem:[%s4411_s5 + $0xc0] sm:$0xff]   ;;  %2812 = vmatprep.subr.bf16.mxu0 %v3330_v7  ;;  %v324_v10 = vld [vmem:[%s4407_s1 + $0x30] sm:$0xff]  ;;  %v3333_v12 = vld [vmem:[%s4411_s5 + $0x108] sm:$0xff]   ;;  %s3318_s25 = smul.u32 80, %s4428_s28  ;;  %vm735_vm1 = vsmask.f32 7424 }
  0x11   : > { %2813 = vmatpush3.bf16.msra.mxu0 %v3331_v8  ;;  %v3332_v11 = vld [vmem:[%s4411_s5 + $0x140] sm:$0xff]   ;;  %v327_v13 = vld [vmem:[%s4407_s1 + $0x48] sm:$0xff]  ;;  %v3336_v17 = vld [vmem:[%s4411_s5 + $0x110] sm:$0xff]   ;;  %v394_v62 = vsub.s32 0, %v393_v59 }
  0x12   : > { %v326_v14 = vld [vmem:[%s4407_s1 + $0x40] sm:$0xff]  ;;  %3094 = vmatprep.subr.bf16.mxu1 %v3332_v11  ;;  %v3334_v15 = vld [vmem:[%s4411_s5 + $0xc8] sm:$0xff]   ;;  %2814 = vmatprep.subr.bf16.mxu0 %v3333_v12  ;;  %v3337_v18 = vld [vmem:[%s4411_s5 + $0xd0] sm:$0xff]   ;;  %s3626_s30 = scalar_lea.vmem %s4406_s0, %s3318_s25  ;;  %s4312_s12 = scalar_lea.vmem %s4413_s7, %s3318_s25 }
  0x13   : > { %479 = vperm.xlu1 %3329, %v321_v3   ;;  %469 = vperm.xlu0 %3328, %v319_v4   ;;  %v3335_v16 = vld [vmem:[%s4411_s5 + $0x148] sm:$0xff]   ;;  %v329_v19 = vld [vmem:[%s4407_s1 + $0x58] sm:$0xff]  ;;  %v328_v20 = vld [vmem:[%s4407_s1 + $0x50] sm:$0xff]  ;;  %s2492_s25 = sshll.u32 %s4428_s28, 1 }
  0x14   : > { %3095 = vmatpush3.bf16.msra.mxu1 %v3332_v11  ;;  %v3338_v21 = vld [vmem:[%s4411_s5 + $0x150] sm:$0xff]   ;;  %v3339_v22 = vld [vmem:[%s4411_s5 + $0x118] sm:$0xff]   ;;  %v331_v24 = vld [vmem:[%s4407_s1 + $0x68] sm:$0xff]  ;;  %s316_s15 = scalar_lea.vmem %s4414_s8, %s2492_s25 }
  0x15   : > { %2815 = vmatpush3.bf16.msra.mxu0 %v3334_v15  ;;  %3096 = vmatprep.subr.bf16.mxu1 %v3335_v16  ;;  %v3340_v23 = vld [vmem:[%s4411_s5 + $0xd8] sm:$0xff]   ;;  %v3342_v26 = vld [vmem:[%s4411_s5 + $0x120] sm:$0xff]   ;;  %v3345_v31 = vld [vmem:[%s4411_s5 + $0x128] sm:$0xff]  }
  0x16   : > { %2816 = vmatprep.subr.bf16.mxu0 %v3336_v17  ;;  %v3341_v25 = vld [vmem:[%s4411_s5 + $0x158] sm:$0xff]   ;;  %v330_v27 = vld [vmem:[%s4407_s1 + $0x60] sm:$0xff]  ;;  %v332_v32 = vld [vmem:[%s4407_s1 + $0x70] sm:$0xff] }
  0x17   : > { %489 = vperm.xlu1 %3329, %v323_v5   ;;  %484 = vperm.xlu0 %3328, %v322_v6   ;;  %v3343_v28 = vld [vmem:[%s4411_s5 + $0xe0] sm:$0xff]   ;;  %v333_v30 = vld [vmem:[%s4407_s1 + $0x78] sm:$0xff]  ;;  %v3346_v33 = vld [vmem:[%s4411_s5 + $0xe8] sm:$0xff]  }
  0x18   : > { %3097 = vmatpush3.bf16.msra.mxu1 %v3335_v16  ;;  %v3344_v29 = vld [vmem:[%s4411_s5 + $0x160] sm:$0xff]   ;;  %v3347_v34 = vld [vmem:[%s4411_s5 + $0x168] sm:$0xff]   ;;  %v3348_v35 = vld [vmem:[%s4411_s5 + $0x130] sm:$0xff]  }
  0x19   : > { %2817 = vmatpush3.bf16.msra.mxu0 %v3337_v18  ;;  %3098 = vmatprep.subr.bf16.mxu1 %v3338_v21  ;;  %v335_v36 = vld [vmem:[%s4407_s1 + $0x88] sm:$0xff]  ;;  %v334_v37 = vld [vmem:[%s4407_s1 + $0x80] sm:$0xff]  ;;  %v3349_v38 = vld [vmem:[%s4411_s5 + $0xf0] sm:$0xff]  }
  0x1a   : > { %2818 = vmatprep.subr.bf16.mxu0 %v3339_v22  ;;  %v337_v39 = vld [vmem:[%s4407_s1 + $0x98] sm:$0xff]  ;;  %v3350_v40 = vld [vmem:[%s4411_s5 + $0x170] sm:$0xff]   ;;  %v3354_v45 = vld [vmem:[%s4411_s5 + $0x1c0] sm:$0xff]  }
  0x1b   : > { %499 = vperm.xlu1 %3329, %v325_v9   ;;  %494 = vperm.xlu0 %3328, %v324_v10   ;;  %v336_v41 = vld [vmem:[%s4407_s1 + $0x90] sm:$0xff]  ;;  %v3351_v42 = vld [vmem:[%s4411_s5 + $0x138] sm:$0xff]   ;;  %v3357_v46 = vld [vmem:[%s4411_s5 + $0x40] sm:$0xff]  }
  0x1c   : > { %3099 = vmatpush3.bf16.msra.mxu1 %v3338_v21  ;;  %v3352_v43 = vld [vmem:[%s4411_s5 + $0xf8] sm:$0xff]   ;;  %v338_v47 = vld [vmem:[%s4408_s2] sm:$0x1]  ;;  %v339_v48 = vld [vmem:[%s4408_s2 + $0x1] sm:$0x1] }
  0x1d   : > { %2819 = vmatpush3.bf16.msra.mxu0 %v3340_v23  ;;  %3100 = vmatprep.subr.bf16.mxu1 %v3341_v25  ;;  %v3353_v44 = vld [vmem:[%s4411_s5 + $0x178] sm:$0xff]   ;;  %v340_v49 = vmul.f32 0.0078125, %v338_v47  ;;  %v341_v50 = vmul.f32 0.0078125, %v339_v48  ;;  %v347_v57 = vld [vmem:[%s4409_s3] sm:$0x1]  ;;  %v2794_v60 = vld [vmem:[%s3626_s30 + $0x8] sm:$0xff]  }
  0x1e   : > { %2820 = vmatprep.subr.bf16.mxu0 %v3342_v26  ;;  %v349_v63 = vld [vmem:[%s4410_s4] sm:$0x1]  ;;  %v2710_v1 = vunpack.c.l.bf16 %v2794_v60  ;;  %v2711_v2 = vunpack.c.h.bf16 %v2794_v60  ;;  %v2795_v3 = vld [vmem:[%s3626_s30 + $0x10] sm:$0xff]   ;;  %v2796_v8 = vld [vmem:[%s3626_s30 + $0x18] sm:$0xff]  }
  0x1f   : > { %509 = vperm.xlu1 %3329, %v327_v13   ;;  %504 = vperm.xlu0 %3328, %v326_v14   ;;  %v342_v51 = vmul.f32 %v340_v49, %v340_v49  ;;  %v2705_v0 = vld [vmem:[%s3626_s30] sm:$0xff]   ;;  %v2715_v10 = vunpack.c.h.bf16 %v2795_v3  ;;  %v2714_v11 = vunpack.c.l.bf16 %v2795_v3  ;;  %v2719_v12 = vunpack.c.h.bf16 %v2796_v8  ;;  %v2798_v18 = vld [vmem:[%s3626_s30 + $0x28] sm:$0xff]  }
  0x20   : > { %3101 = vmatpush3.bf16.msra.mxu1 %v3341_v25  ;;  %v2706_v6 = vunpack.c.l.bf16 %v2705_v0  ;;  %v2707_v7 = vunpack.c.h.bf16 %v2705_v0  ;;  %v2797_v13 = vld [vmem:[%s3626_s30 + $0x20] sm:$0xff]   ;;  %v2727_v26 = vunpack.c.h.bf16 %v2798_v18 }
  0x21   : > { %2821 = vmatpush3.bf16.msra.mxu0 %v3343_v28  ;;  %3102 = vmatprep.subr.bf16.mxu1 %v3344_v29  ;;  %v343_v52 = vsub.f32 %v341_v50, %v342_v51  ;;  %v2723_v23 = vunpack.c.h.bf16 %v2797_v13 }
  0x22   : > { %2822 = vmatprep.subr.bf16.mxu0 %v3345_v31 }
  0x23   : > { %519 = vperm.xlu1 %3329, %v329_v19   ;;  %514 = vperm.xlu0 %3328, %v328_v20   ;;  %v344_v53 = vmax.f32 %v343_v52, 0.0  ;;  %v2799_v19 = vld [vmem:[%s3626_s30 + $0x30] sm:$0xff]   ;;  %v2718_v20 = vunpack.c.l.bf16 %v2796_v8 }
  0x24   : > { %3103 = vmatpush3.bf16.msra.mxu1 %v3344_v29  ;;  %v2731_v28 = vunpack.c.h.bf16 %v2799_v19  ;;  %v2730_v50 = vunpack.c.l.bf16 %v2799_v19 }
  0x25   : > { %2823 = vmatpush3.bf16.msra.mxu0 %v3346_v33  ;;  %3104 = vmatprep.subr.bf16.mxu1 %v3347_v34  ;;  %v345_v54 = vadd.f32 1e-05, %v344_v53 }
  0x26   : > { %2824 = vmatprep.subr.bf16.mxu0 %v3348_v35 }
  0x27   : > { %529 = vperm.xlu1 %3329, %v331_v24   ;;  %524 = vperm.xlu0 %3328, %v330_v27   ;;  %3402 = vrsqrt.f32 %v345_v54  ;;  %v2722_v24 = vunpack.c.l.bf16 %v2797_v13  ;;  %v2726_v27 = vunpack.c.l.bf16 %v2798_v18 }
  0x28   : > { %3105 = vmatpush3.bf16.msra.mxu1 %v3347_v34 }
  0x29   : > { %2825 = vmatpush3.bf16.msra.mxu0 %v3349_v38  ;;  %3106 = vmatprep.subr.bf16.mxu1 %v3350_v40  ;;  %v2800_v38 = vld [vmem:[%s3626_s30 + $0x38] sm:$0xff]  }
  0x2a   : > { %2826 = vmatprep.subr.bf16.mxu0 %v3351_v42  ;;  %v2735_v51 = vunpack.c.h.bf16 %v2800_v38  ;;  %v2734_v52 = vunpack.c.l.bf16 %v2800_v38 }
  0x2b   : > { %539 = vperm.xlu1 %3329, %v333_v30   ;;  %534 = vperm.xlu0 %3328, %v332_v32  }
  0x2c   : > { %3107 = vmatpush3.bf16.msra.mxu1 %v3350_v40 }
  0x2d   : > { %2827 = vmatpush3.bf16.msra.mxu0 %v3352_v43  ;;  %3108 = vmatprep.subr.bf16.mxu1 %v3353_v44 }
  0x2e   : > { %3000 = vmatprep.subr.bf16.mxu0 %v3354_v45 }
  0x2f   : > { %549 = vperm.xlu1 %3329, %v335_v36   ;;  %544 = vperm.xlu0 %3328, %v334_v37  }
  0x30   : > { %3109 = vmatpush3.bf16.msra.mxu1 %v3353_v44 }
  0x31   : > { %2906 = vmatprep.subr.bf16.mxu1 %v3357_v46  ;;  %v3403_v56 = vpop.eup %3402 }
  0x32   : > { %v348_v58 = vmul.f32 %v3403_v56, %v347_v57  ;;  %v608_v57 = vld [vmem:[#allocation2 + $0x8] sm:$0x80] }
  0x33   : > { %559 = vperm.xlu1 %3329, %v337_v39   ;;  %554 = vperm.xlu0 %3328, %v336_v41   ;;  %v621_v8 = vshrl.u32 %v608_v57, 16 }
  0x34   : > { %v350_v61 = vmul.f32 %v348_v58, %v340_v49  ;;  %v3634_v5 = vrot.slane %v348_v58, %v394_v62 }
  0x36   : > { %v351_v4 = vsub.f32 %v349_v63, %v350_v61  ;;  %v398_v9 = vmul.f32 %v2710_v1, %v3634_v5  ;;  %v396_v15 = vmul.f32 %v2706_v6, %v3634_v5  ;;  %v399_v16 = vmul.f32 %v2711_v2, %v3634_v5 }
  0x37   : > { %v397_v17 = vmul.f32 %v2707_v7, %v3634_v5  ;;  %v401_v22 = vmul.f32 %v2715_v10, %v3634_v5  ;;  %v400_v25 = vmul.f32 %v2714_v11, %v3634_v5  ;;  %v403_v32 = vmul.f32 %v2719_v12, %v3634_v5 }
  0x38   : > { %v3639_v14 = vrot.slane %v351_v4, %v394_v62  ;;  %v402_v33 = vmul.f32 %v2718_v20, %v3634_v5  ;;  %v405_v36 = vmul.f32 %v2723_v23, %v3634_v5  ;;  %v404_v37 = vmul.f32 %v2722_v24, %v3634_v5  ;;  %v3714_v24 = vld [vmem:[%s3626_s30 + $0x40] sm:$0xff]  }
  0x39   : > { %v407_v42 = vmul.f32 %v2727_v26, %v3634_v5  ;;  %v406_v43 = vmul.f32 %v2726_v27, %v3634_v5  ;;  %v409_v44 = vmul.f32 %v2731_v28, %v3634_v5  ;;  %v408_v6 = vmul.f32 %v2730_v50, %v3634_v5  ;;  %v3356_v50 = vld [vmem:[%s4411_s5 + $0x1c8] sm:$0xff]  }
  0x3a   : > { %v424_v21 = vadd.f32 %v3639_v14, %v398_v9  ;;  %v422_v29 = vadd.f32 %v3639_v14, %v396_v15  ;;  %v425_v30 = vadd.f32 %v3639_v14, %v399_v16  ;;  %v423_v31 = vadd.f32 %v3639_v14, %v397_v17 }
  0x3b   : > { %v427_v35 = vadd.f32 %v3639_v14, %v401_v22  ;;  %v426_v41 = vadd.f32 %v3639_v14, %v400_v25  ;;  %v429_v48 = vadd.f32 %v3639_v14, %v403_v32  ;;  %v428_v49 = vadd.f32 %v3639_v14, %v402_v33 }
  0x3c   : > { %v444_v34 = vmax.f32 %v424_v21, 0.0  ;;  %v442_v45 = vmax.f32 %v422_v29, 0.0  ;;  %v445_v46 = vmax.f32 %v425_v30, 0.0  ;;  %v443_v47 = vmax.f32 %v423_v31, 0.0 }
  0x3d   : > { %v447_v54 = vmax.f32 %v427_v35, 0.0  ;;  %v3670_v55 = vadd.f32 %v3639_v14, %v405_v36  ;;  %v3673_v56 = vadd.f32 %v3639_v14, %v404_v37  ;;  %v446_v60 = vmax.f32 %v426_v41, 0.0 }
  0x3e   : > { %v3680_v61 = vadd.f32 %v3639_v14, %v407_v42  ;;  %v3683_v62 = vadd.f32 %v3639_v14, %v406_v43  ;;  %v3686_v63 = vadd.f32 %v3639_v14, %v409_v44  ;;  %v449_v3 = vmax.f32 %v429_v48, 0.0 }
  0x3f   : > { %v448_v4 = vmax.f32 %v428_v49, 0.0  ;;  %v411_v7 = vmul.f32 %v2735_v51, %v3634_v5  ;;  %v451_v11 = vmax.f32 %v3670_v55, 0.0  ;;  %v450_v12 = vmax.f32 %v3673_v56, 0.0  ;;  %v2802_v55 = vld [vmem:[%s3626_s30 + $0x48] sm:$0xff]  }
  0x40   : > { %v453_v16 = vmax.f32 %v3680_v61, 0.0  ;;  %v452_v17 = vmax.f32 %v3683_v62, 0.0  ;;  %v455_v18 = vmax.f32 %v3686_v63, 0.0  ;;  %v410_v19 = vmul.f32 %v2734_v52, %v3634_v5  ;;  %v3365_v61 = vld [vmem:[%s4411_s5 + $0x190] sm:$0xff]   ;;  %v3372_v63 = vld [vmem:[%s4411_s5 + $0x198] sm:$0xff]  }
  0x41   : > { %v3719_v27 = vadd.f32 %v3639_v14, %v408_v6  ;;  %v623_v28 = vrot.slane %v621_v8, 7  ;;  %v3728_v36 = vadd.f32 %v3639_v14, %v411_v7  ;;  %v2739_v38 = vunpack.c.h.bf16 %v3714_v24 }
  0x42   : > { %v3731_v37 = vadd.f32 %v3639_v14, %v410_v19  ;;  %v2738_v52 = vunpack.c.l.bf16 %v3714_v24  ;;  %v3358_v19 = vld [vmem:[%s4411_s5 + $0x188] sm:$0xff]  }
  0x8e   : > { %v3658_v39 = vpop.permute.xlu1 %474  ;;  %v3660_v40 = vpop.permute.xlu0 %464 }
  0x8f   : > { %v564_v53 = vmul.f32 %v3658_v39, %v444_v34  ;;  %v562_v0 = vmul.f32 %v3660_v40, %v442_v45  ;;  %v3355_v45 = vld [vmem:[%s4411_s5 + $0x180] sm:$0xff]  }
  0x92   : > { %v3675_v58 = vpop.permute.xlu1 %479  ;;  %v3677_v59 = vpop.permute.xlu0 %469 }
  0x93   : > { %v565_v1 = vmul.f32 %v3675_v58, %v445_v46  ;;  %v563_v2 = vmul.f32 %v3677_v59, %v443_v47 }
  0x95   : > { %v3693_v9 = vpack.c.bf16 %v565_v1, %v564_v53  ;;  %v3695_v10 = vpack.c.bf16 %v563_v2, %v562_v0  ;;  %v454_v1 = vmax.f32 %v3719_v27, 0.0 }
  0x96   : > { %v3699_v13 = vpop.permute.xlu1 %489  ;;  %v3701_v15 = vpop.permute.xlu0 %484 }
  0x97   : > { %599 = vst [vmem:[#allocation2 + $0x38] sm:$0xff] %v3693_v9  ;;  %v633_v20 = vshrl.u32 %v3693_v9, 16  ;;  %v636_v21 = vshll.u32 %v3693_v9, 16  ;;  %v625_v22 = vshrl.u32 %v3695_v10, 16  ;;  %v628_v23 = vshll.u32 %v3695_v10, 16  ;;  %1146 = vmatprep.mubr.bf16.mxu0 %v3695_v10 }
  0x98   : > { %v567_v25 = vmul.f32 %v3699_v13, %v447_v54  ;;  %v566_v26 = vmul.f32 %v3701_v15, %v446_v60 }
  0x99   : > { %v635_v29 = vrot.slane %v633_v20, 7  ;;  %v627_v30 = vrot.slane %v625_v22, 7  ;;  %v741_v31 = vrot.slane %v628_v23, 1  ;;  %v746_v32 = vrot.slane %v636_v21, 1 }
  0x9a   : > { %v3721_v33 = vpack.c.bf16 %v567_v25, %v566_v26  ;;  %v3723_v34 = vpop.permute.xlu1 %499  ;;  %v3725_v35 = vpop.permute.xlu0 %494 }
  0x9b   : > { %v569_v41 = vmul.f32 %v3723_v34, %v449_v3  ;;  %v568_v42 = vmul.f32 %v3725_v35, %v448_v4  ;;  %v630_v43 = vor.u32 %v628_v23, %v627_v30  ;;  %v742_v44 = vor.u32 %v741_v31, %v625_v22  ;;  %v3359_v3 = vld [vmem:[%s4411_s5] sm:$0xff]  }
  0x9c   : > { %600 = vst [vmem:[#allocation2 + $0x50] sm:$0xff] %v3721_v33  ;;  %v641_v46 = vshrl.u32 %v3721_v33, 16  ;;  %v644_v47 = vshll.u32 %v3721_v33, 16  ;;  %v750_v48 = vor.u32 %v746_v32, %v633_v20  ;;  %v638_v49 = vor.u32 %v636_v21, %v635_v29  ;;  %v3360_v20 = vld [vmem:[%s4411_s5 + $0x48] sm:$0xff]  }
  0x9d   : > { %v3745_v51 = vpack.c.bf16 %v569_v41, %v568_v42  ;;  %v3749_v53 = vsel %vm619_vm0, %v623_v28, %v630_v43  ;;  %v3752_v54 = vsel %vm735_vm1, %v742_v44, %v746_v32  ;;  %v2743_v22 = vunpack.c.h.bf16 %v2802_v55  ;;  %v3361_v43 = vld [vmem:[%s4411_s5 + $0x8] sm:$0xff]  }
  0x9e   : > { %v3755_v56 = vrot.slane %v641_v46, 7  ;;  %v754_v57 = vrot.slane %v644_v47, 1  ;;  %v3757_v60 = vpop.permute.xlu1 %509  ;;  %v3759_v0 = vpop.permute.xlu0 %504  ;;  %1147 = vmatmul.mubr.bf16.vlgmr.msra.gmra.mrb[0].mxu0 %v3749_v53  ;;  %3110 = vmatprep.mubr.bf16.mxu1 %v3752_v54  ;;  %v3765_v2 = vsel %vm619_vm0, %v627_v30, %v638_v49  ;;  %v2742_v23 = vunpack.c.l.bf16 %v2802_v55 }
  0x9f   : > { %v649_v4 = vshrl.u32 %v3745_v51, 16  ;;  %v652_v6 = vshll.u32 %v3745_v51, 16  ;;  %v571_v7 = vmul.f32 %v3757_v60, %v451_v11  ;;  %v570_v8 = vmul.f32 %v3759_v0, %v450_v12  ;;  %3001 = vmatpush3.bf16.msra.mxu0 %v3355_v45  ;;  %1154 = vmatprep.mubr.bf16.mxu0 %v3693_v9  ;;  %v3364_v12 = vld [vmem:[%s4411_s5 + $0x1d0] sm:$0xff]  }
  0xa0   : > { %v3782_v21 = vsel %vm735_vm1, %v750_v48, %v754_v57  ;;  %3002 = vmatprep.subr.bf16.mxu0 %v3356_v50  ;;  %v646_v11 = vor.u32 %v644_v47, %v3755_v56  ;;  %v413_v28 = vmul.f32 %v2739_v38, %v3634_v5  ;;  %v457_v32 = vmax.f32 %v3728_v36, 0.0  ;;  %v3362_v48 = vld [vmem:[%s4411_s5 + $0x50] sm:$0xff]  }
  0xa1   : > { %v3788_v24 = vrot.slane %v649_v4, 7  ;;  %v762_v25 = vrot.slane %v652_v6, 1  ;;  %v3790_v26 = vpack.c.bf16 %v571_v7, %v570_v8  ;;  %3111 = vmatmul.mubr.bf16.vlgmr.msra.gmra.mrb[0].mxu1 %v3782_v21  ;;  %v412_v41 = vmul.f32 %v2738_v52, %v3634_v5 }
  0xa2   : > { %v3794_v30 = vpop.permute.xlu1 %519  ;;  %v3796_v31 = vpop.permute.xlu0 %514  ;;  %v758_v42 = vor.u32 %v754_v57, %v641_v46  ;;  %2907 = vmatpush3.bf16.msra.mxu1 %v3359_v3  ;;  %v3804_v44 = vsel %vm619_vm0, %v635_v29, %v646_v11  ;;  %v415_v29 = vmul.f32 %v2743_v22, %v3634_v5  ;;  %v414_v49 = vmul.f32 %v2742_v23, %v3634_v5  ;;  %v3370_v5 = vld [vmem:[%s4411_s5 + $0x1d8] sm:$0xff]  }
  0xa3   : > { %v657_v38 = vshrl.u32 %v3790_v26, 16  ;;  %v660_v45 = vshll.u32 %v3790_v26, 16  ;;  %v573_v47 = vmul.f32 %v3794_v30, %v453_v16  ;;  %v572_v46 = vmul.f32 %v3796_v31, %v452_v17  ;;  %3003 = vmatpush3.bf16.msra.mxu0 %v3358_v19  ;;  %2908 = vmatprep.subr.bf16.mxu1 %v3360_v20  ;;  %v3363_v19 = vld [vmem:[%s4411_s5 + $0x10] sm:$0xff]  }
  0xa4   : > { %v3820_v50 = vsel %vm735_vm1, %v758_v42, %v762_v25  ;;  %3004 = vmatprep.subr.bf16.mxu0 %v3364_v12  ;;  %v654_v62 = vor.u32 %v652_v6, %v3788_v24  ;;  %v3831_v55 = vadd.f32 %v3639_v14, %v413_v28  ;;  %v456_v6 = vmax.f32 %v3731_v37, 0.0 }
  0xa5   : > { %v3826_v16 = vrot.slane %v657_v38, 7  ;;  %v770_v17 = vrot.slane %v660_v45, 1  ;;  %v3828_v52 = vpack.c.bf16 %v573_v47, %v572_v46  ;;  %3114 = vmatprep.mubr.bf16.mxu1 %v3820_v50  ;;  %v438_v7 = vadd.f32 %v3639_v14, %v412_v41  ;;  %v3378_v41 = vld [vmem:[%s4411_s5 + $0x1e0] sm:$0xff]  }
  0xa6   : > { %v3837_v57 = vpop.permute.xlu1 %529  ;;  %v3839_v3 = vpop.permute.xlu0 %524  ;;  %1155 = vmatmul.mubr.bf16.gmra.mrb[4].mxu0 %v3765_v2  ;;  %v766_v8 = vor.u32 %v762_v25, %v649_v4  ;;  %2909 = vmatpush3.bf16.msra.mxu1 %v3361_v43  ;;  %v3849_v20 = vsel %vm619_vm0, %v3755_v56, %v654_v62  ;;  %v3366_v56 = vld [vmem:[%s4411_s5 + $0x58] sm:$0xff]   ;;  %v3864_v11 = vadd.f32 %v3639_v14, %v415_v29 }
  0xa7   : > { %v665_v22 = vshrl.u32 %v3828_v52, 16  ;;  %v668_v23 = vshll.u32 %v3828_v52, 16  ;;  %v575_v37 = vmul.f32 %v3837_v57, %v455_v18  ;;  %v574_v4 = vmul.f32 %v3839_v3, %v454_v1  ;;  %1162 = vmatprep.mubr.bf16.mxu0 %v3721_v33  ;;  %2910 = vmatprep.subr.bf16.mxu1 %v3362_v48 }
  0xa8   : > { %v3867_v12 = vsel %vm735_vm1, %v766_v8, %v770_v17  ;;  %3005 = vmatpush3.bf16.msra.mxu0 %v3365_v61  ;;  %v662_v18 = vor.u32 %v660_v45, %v3826_v16  ;;  %v3878_v28 = vadd.f32 %v3639_v14, %v414_v49  ;;  %v459_v45 = vmax.f32 %v3831_v55, 0.0  ;;  %v3367_v14 = vld [vmem:[%s4411_s5 + $0x18] sm:$0xff]   ;;  %v3379_v55 = vld [vmem:[%s4411_s5 + $0x1a0] sm:$0xff]  }
  0xa9   : > { %v3873_v27 = vrot.slane %v665_v22, 7  ;;  %v778_v1 = vrot.slane %v668_v23, 1  ;;  %v3875_v25 = vpack.c.bf16 %v575_v37, %v574_v4  ;;  %3115 = vmatmul.mubr.bf16.gmra.mrb[4].mxu1 %v3867_v12  ;;  %3006 = vmatprep.subr.bf16.mxu0 %v3370_v5  ;;  %v458_v47 = vmax.f32 %v438_v7, 0.0  ;;  %v3369_v4 = vld [vmem:[%s4411_s5 + $0x20] sm:$0xff]  }
  0xaa   : > { %v3884_v42 = vpop.permute.xlu1 %539  ;;  %v3886_v43 = vpop.permute.xlu0 %534  ;;  %v774_v46 = vor.u32 %v770_v17, %v657_v38  ;;  %2911 = vmatpush3.bf16.msra.mxu1 %v3363_v19  ;;  %v3894_v48 = vsel %vm619_vm0, %v3788_v24, %v662_v18  ;;  %v3368_v38 = vld [vmem:[%s4411_s5 + $0x60] sm:$0xff]   ;;  %v461_v19 = vmax.f32 %v3864_v11, 0.0 }
  0xab   : > { %v673_v29 = vshrl.u32 %v3875_v25, 16  ;;  %v676_v49 = vshll.u32 %v3875_v25, 16  ;;  %v577_v61 = vmul.f32 %v3884_v42, %v457_v32  ;;  %v576_v62 = vmul.f32 %v3886_v43, %v456_v6  ;;  %2912 = vmatprep.subr.bf16.mxu1 %v3366_v56  ;;  %v3380_v6 = vld [vmem:[%s4411_s5 + $0x1e8] sm:$0xff]  }
  0xac   : > { %v3906_v17 = vsel %vm735_vm1, %v774_v46, %v778_v1  ;;  %3007 = vmatpush3.bf16.msra.mxu0 %v3372_v63  ;;  %v670_v24 = vor.u32 %v668_v23, %v3873_v27  ;;  %v460_v23 = vmax.f32 %v3878_v28, 0.0  ;;  %v782_v37 = vor.u32 %v778_v1, %v665_v22  ;;  %v3371_v22 = vld [vmem:[%s4411_s5 + $0x68] sm:$0xff]  }
  0xad   : > { %v675_v36 = vrot.slane %v673_v29, 7  ;;  %v786_v5 = vrot.slane %v676_v49, 1  ;;  %v3912_v32 = vpack.c.bf16 %v577_v61, %v576_v62  ;;  %3118 = vmatprep.mubr.bf16.mxu1 %v3906_v17  ;;  %3008 = vmatprep.subr.bf16.mxu0 %v3378_v41  ;;  %v3381_v41 = vld [vmem:[%s4411_s5 + $0x1a8] sm:$0xff]   ;;  %v3383_v61 = vld [vmem:[%s4411_s5 + $0x1f0] sm:$0xff]  }
  0xae   : > { %v3918_v7 = vpop.permute.xlu1 %549  ;;  %v3920_v8 = vpop.permute.xlu0 %544  ;;  %1163 = vmatmul.mubr.bf16.gmra.mrb[8].mxu0 %v3804_v44  ;;  %2913 = vmatpush3.bf16.msra.mxu1 %v3367_v14  ;;  %v3930_v56 = vsel %vm619_vm0, %v3826_v16, %v670_v24  ;;  %v3373_v24 = vld [vmem:[%s4411_s5 + $0x28] sm:$0xff]  }
  0xaf   : > { %4419 = vst [vmem:[#allocation3_spill] sm:$0xff] %v3918_v7  ;;  %4420 = vst [vmem:[#allocation4_spill] sm:$0xff] %v3920_v8  ;;  %v681_v63 = vshrl.u32 %v3912_v32, 16  ;;  %v684_v18 = vshll.u32 %v3912_v32, 16  ;;  %v579_v11 = vmul.f32 %v3918_v7, %v459_v45  ;;  %v578_v28 = vmul.f32 %v3920_v8, %v458_v47  ;;  %1170 = vmatprep.mubr.bf16.mxu0 %v3745_v51  ;;  %v734_v47 = vld [vmem:[#allocation2 + $0x110] sm:$0x1] }
  0xb0   : > { %2914 = vmatprep.subr.bf16.mxu1 %v3368_v38  ;;  %v3941_v1 = vsel %vm735_vm1, %v782_v37, %v786_v5  ;;  %3009 = vmatpush3.bf16.msra.mxu0 %v3379_v55  ;;  %v678_v16 = vor.u32 %v676_v49, %v675_v36  ;;  %v790_v49 = vor.u32 %v786_v5, %v673_v29  ;;  %v3374_v29 = vld [vmem:[%s4411_s5 + $0x70] sm:$0xff]  }
  0xb1   : > { %v683_v46 = vrot.slane %v681_v63, 7  ;;  %v794_v45 = vrot.slane %v684_v18, 1  ;;  %v3946_v14 = vpack.c.bf16 %v579_v11, %v578_v28  ;;  %3119 = vmatmul.mubr.bf16.gmra.mrb[8].mxu1 %v3941_v1  ;;  %3010 = vmatprep.subr.bf16.mxu0 %v3380_v6 }
  0xb2   : > { %v3952_v62 = vpop.permute.xlu1 %559  ;;  %v3954_v38 = vpop.permute.xlu0 %554  ;;  %2915 = vmatpush3.bf16.msra.mxu1 %v3369_v4  ;;  %v3961_v55 = vsel %vm619_vm0, %v3873_v27, %v678_v16  ;;  %v816_v4 = vshll.u32 %v734_v47, 16  ;;  %v3384_v16 = vld [vmem:[%s4411_s5 + $0x1b0] sm:$0xff]  }
  0xb3   : > { %4421 = vst [vmem:[#allocation5_spill] sm:$0xff] %v3952_v62  ;;  %4422 = vst [vmem:[#allocation6_spill] sm:$0xff] %v3954_v38  ;;  %v689_v6 = vshrl.u32 %v3946_v14, 16  ;;  %v692_v37 = vshll.u32 %v3946_v14, 16  ;;  %v581_v11 = vmul.f32 %v3952_v62, %v461_v19  ;;  %v580_v28 = vmul.f32 %v3954_v38, %v460_v23  ;;  %2916 = vmatprep.subr.bf16.mxu1 %v3371_v22  ;;  %v3386_v22 = vld [vmem:[%s4411_s5 + $0x1f8] sm:$0xff]  }
  0xb4   : > { %v3971_v5 = vsel %vm735_vm1, %v790_v49, %v794_v45  ;;  %3011 = vmatpush3.bf16.msra.mxu0 %v3381_v41  ;;  %v686_v27 = vor.u32 %v684_v18, %v683_v46  ;;  %v798_v23 = vor.u32 %v794_v45, %v681_v63  ;;  %v3375_v18 = vld [vmem:[%s4411_s5 + $0x30] sm:$0xff]   ;;  %v3376_v45 = vld [vmem:[%s4411_s5 + $0x78] sm:$0xff]  }
  0xb5   : > { %v691_v7 = vrot.slane %v689_v6, 7  ;;  %v802_v8 = vrot.slane %v692_v37, 1  ;;  %v3976_v19 = vpack.c.bf16 %v581_v11, %v580_v28  ;;  %3122 = vmatprep.mubr.bf16.mxu1 %v3971_v5  ;;  %3012 = vmatprep.subr.bf16.mxu0 %v3383_v61 }
  0xb6   : > { %1171 = vmatmul.mubr.bf16.gmra.mrb[12].mxu0 %v3849_v20  ;;  %2917 = vmatpush3.bf16.msra.mxu1 %v3373_v24  ;;  %v3987_v41 = vsel %vm619_vm0, %v675_v36, %v686_v27  ;;  %v3387_v36 = vld [vmem:[%s4411_s5 + $0x1b8] sm:$0xff]   ;;  %v818_v27 = vrot.slane %v816_v4, 1 }
  0xb7   : > { %v697_v47 = vshrl.u32 %v3976_v19, 16  ;;  %v700_v49 = vshll.u32 %v3976_v19, 16  ;;  %1178 = vmatprep.mubr.bf16.mxu0 %v3790_v26  ;;  %v3993_v63 = vsel %vm735_vm1, %v798_v23, %v802_v8  ;;  %2918 = vmatprep.subr.bf16.mxu1 %v3374_v29  ;;  %v694_v61 = vor.u32 %v692_v37, %v691_v7  ;;  %v4005_v29 = vld [vmem:[%s4411_s5 + $0x200] sm:$0xff]   ;;  %v3377_v37 = vld [vmem:[%s4411_s5 + $0x38] sm:$0xff]  }
  0xb8   : > { %3013 = vmatpush3.bf16.msra.mxu0 %v3384_v16  ;;  %v806_v28 = vor.u32 %v802_v8, %v689_v6  ;;  %v3382_v8 = vld [vmem:[%s4411_s5 + $0x80] sm:$0xff]  }
  0xb9   : > { %v699_v24 = vrot.slane %v697_v47, 7  ;;  %v810_v11 = vrot.slane %v700_v49, 1  ;;  %3123 = vmatmul.mubr.bf16.gmra.mrb[12].mxu1 %v3993_v63  ;;  %3014 = vmatprep.subr.bf16.mxu0 %v3386_v22  ;;  %v4011_v16 = vsel %vm619_vm0, %v683_v46, %v694_v61  ;;  %v4030_v46 = vld [vmem:[#allocation2] sm:$0xff]  ;;  %v3390_v22 = vld [vmem:[%s4411_s5 + $0x98] sm:$0xff]  }
  0xba   : > { %2919 = vmatpush3.bf16.msra.mxu1 %v3375_v18  ;;  %v3394_v18 = vld [vmem:[%s4411_s5 + $0xa8] sm:$0xff]   ;;  %v3395_v61 = vld [vmem:[%s4411_s5 + $0x218] sm:$0xff]  }
  0xbb   : > { %v702_v23 = vor.u32 %v700_v49, %v699_v24  ;;  %v814_v62 = vor.u32 %v810_v11, %v697_v47  ;;  %v4014_v38 = vsel %vm735_vm1, %v806_v28, %v810_v11  ;;  %2920 = vmatprep.subr.bf16.mxu1 %v3376_v45  ;;  %v3391_v47 = vld [vmem:[%s4411_s5 + $0x208] sm:$0xff]   ;;  %v1714_v49 = vld [vmem:[#allocation2 + $0x50] sm:$0xff] }
  0xbc   : > { %3126 = vmatprep.mubr.bf16.mxu1 %v4014_v38  ;;  %3015 = vmatpush3.bf16.msra.mxu0 %v3387_v36  ;;  %v3393_v45 = vld [vmem:[%s4411_s5 + $0x210] sm:$0xff]   ;;  %v3399_v36 = vld [vmem:[%s4411_s5 + $0x228] sm:$0xff]  }
  0xbd   : > { %v4021_v6 = vsel %vm735_vm1, %v814_v62, %v818_v27  ;;  %v4024_v4 = vsel %vm619_vm0, %v691_v7, %v702_v23  ;;  %3166 = vmatprep.subr.bf16.mxu0 %v4005_v29  ;;  %v3385_v7 = vld [vmem:[%s4411_s5 + $0x88] sm:$0xff]   ;;  %v3388_v62 = vld [vmem:[%s4411_s5 + $0x90] sm:$0xff]  }
  0xbe   : > { %1179 = vmatmul.mubr.bf16.gmra.mrb[16].mxu0 %v3894_v48  ;;  %2921 = vmatpush3.bf16.msra.mxu1 %v3377_v37 }
  0xbf   : > { %1186 = vmatprep.mubr.bf16.mxu0 %v3828_v52  ;;  %3130 = vmatprep.subr.bf16.mxu1 %v3382_v8 }
  0xc1   : > { %3127 = vmatmul.mubr.bf16.gmra.mrb[16].mxu1 %v4021_v6 }
  0xc2   : > { %1516 = vmatprep.mubr.bf16.mxu1 %v4030_v46 }
  0xc6   : > { %1187 = vmatmul.mubr.bf16.gmra.mrb[20].mxu0 %v3930_v56 }
  0xc7   : > { %1194 = vmatprep.mubr.bf16.mxu0 %v3875_v25 }
  0xc9   : > { %1517 = vmatmul.mubr.bf16.vlgmr.msra.gmra.mrb[20].mxu1 %v4030_v46 }
  0xca   : > { %1524 = vmatprep.mubr.bf16.mxu1 %v3695_v10  ;;  %3131 = vmatpush3.bf16.msra.mxu1 %v3382_v8  ;;  %v3392_v10 = vld [vmem:[%s4411_s5 + $0xa0] sm:$0xff]  }
  0xcb   : > { %3132 = vmatprep.subr.bf16.mxu1 %v3385_v7 }
  0xce   : > { %1195 = vmatmul.mubr.bf16.gmra.mrb[24].mxu0 %v3961_v55  ;;  %3133 = vmatpush3.bf16.msra.mxu1 %v3385_v7 }
  0xcf   : > { %1202 = vmatprep.mubr.bf16.mxu0 %v3912_v32  ;;  %3134 = vmatprep.subr.bf16.mxu1 %v3388_v62 }
  0xd1   : > { %1525 = vmatmul.mubr.bf16.gmra.mrb[24].mxu1 %v3749_v53  ;;  %v3397_v53 = vld [vmem:[%s4411_s5 + $0xb8] sm:$0xff]  }
  0xd2   : > { %1532 = vmatprep.mubr.bf16.mxu1 %v3693_v9  ;;  %3135 = vmatpush3.bf16.msra.mxu1 %v3388_v62  ;;  %v3396_v9 = vld [vmem:[%s4411_s5 + $0xb0] sm:$0xff]  }
  0xd3   : > { %3136 = vmatprep.subr.bf16.mxu1 %v3390_v22 }
  0xd6   : > { %1203 = vmatmul.mubr.bf16.gmra.mrb[28].mxu0 %v3987_v41  ;;  %3137 = vmatpush3.bf16.msra.mxu1 %v3390_v22 }
  0xd7   : > { %1210 = vmatprep.mubr.bf16.mxu0 %v3946_v14  ;;  %3138 = vmatprep.subr.bf16.mxu1 %v3392_v10 }
  0xd9   : > { %1533 = vmatmul.mubr.bf16.gmra.mrb[28].mxu1 %v3765_v2 }
  0xda   : > { %1540 = vmatprep.mubr.bf16.mxu1 %v3721_v33  ;;  %3139 = vmatpush3.bf16.msra.mxu1 %v3392_v10  ;;  %v1711_v33 = vld [vmem:[#allocation2 + $0x38] sm:$0xff] }
  0xdb   : > { %3140 = vmatprep.subr.bf16.mxu1 %v3394_v18 }
  0xde   : > { %1211 = vmatmul.mubr.bf16.gmra.mrb[32].mxu0 %v4011_v16  ;;  %3141 = vmatpush3.bf16.msra.mxu1 %v3394_v18 }
  0xdf   : > { %1218 = vmatprep.mubr.bf16.mxu0 %v3976_v19  ;;  %3142 = vmatprep.subr.bf16.mxu1 %v3396_v9 }
  0xe1   : > { %1541 = vmatmul.mubr.bf16.gmra.mrb[32].mxu1 %v3804_v44 }
  0xe2   : > { %1548 = vmatprep.mubr.bf16.mxu1 %v3745_v51  ;;  %3143 = vmatpush3.bf16.msra.mxu1 %v3396_v9 }
  0xe3   : > { %3144 = vmatprep.subr.bf16.mxu1 %v3397_v53 }
  0xe6   : > { %1219 = vmatmul.mubr.bf16.gmra.mrb[36].mxu0 %v4024_v4  ;;  %3145 = vmatpush3.bf16.msra.mxu1 %v3397_v53 }
  0xe7   : > { %1965 = vmatprep.mubr.bf16.mxu0 %v1711_v33  ;;  %3202 = vmatprep.subr.bf16.mxu1 %v4005_v29 }
  0xe9   : > { %1549 = vmatmul.mubr.bf16.gmra.mrb[36].mxu1 %v3849_v20 }
  0xea   : > { %1556 = vmatprep.mubr.bf16.mxu1 %v3790_v26 }
  0xee   : > { %1966 = vmatmul.mubr.bf16.vlgmr.msra.gmra.mrb[40].mxu0 %v3765_v2  ;;  %v3398_v2 = vld [vmem:[%s4411_s5 + $0x220] sm:$0xff]  }
  0xef   : > { %3167 = vmatpush3.bf16.msra.mxu0 %v4005_v29  ;;  %1973 = vmatprep.mubr.bf16.mxu0 %v1714_v49 }
  0xf0   : > { %3168 = vmatprep.subr.bf16.mxu0 %v3391_v47 }
  0xf1   : > { %1557 = vmatmul.mubr.bf16.gmra.mrb[40].mxu1 %v3894_v48 }
  0xf2   : > { %1564 = vmatprep.mubr.bf16.mxu1 %v3828_v52 }
  0xf3   : > { %3169 = vmatpush3.bf16.msra.mxu0 %v3391_v47 }
  0xf4   : > { %3170 = vmatprep.subr.bf16.mxu0 %v3393_v45 }
  0xf6   : > { %1974 = vmatmul.mubr.bf16.gmra.mrb[44].mxu0 %v3804_v44  ;;  %v3401_v44 = vld [vmem:[%s4411_s5 + $0x238] sm:$0xff]  }
  0xf7   : > { %1981 = vmatprep.mubr.bf16.mxu0 %v3745_v51  ;;  %3171 = vmatpush3.bf16.msra.mxu0 %v3393_v45  ;;  %v3400_v51 = vld [vmem:[%s4411_s5 + $0x230] sm:$0xff]  }
  0xf8   : > { %3172 = vmatprep.subr.bf16.mxu0 %v3395_v61 }
  0xf9   : > { %1565 = vmatmul.mubr.bf16.gmra.mrb[44].mxu1 %v3930_v56 }
  0xfa   : > { %1572 = vmatprep.mubr.bf16.mxu1 %v3875_v25 }
  0xfb   : > { %3173 = vmatpush3.bf16.msra.mxu0 %v3395_v61 }
  0xfc   : > { %3174 = vmatprep.subr.bf16.mxu0 %v3398_v2 }
  0xfe   : > { %1982 = vmatmul.mubr.bf16.gmra.mrb[48].mxu0 %v3849_v20 }
  0xff   : > { %1989 = vmatprep.mubr.bf16.mxu0 %v3790_v26  ;;  %3175 = vmatpush3.bf16.msra.mxu0 %v3398_v2 }
 0x100   : > { %3176 = vmatprep.subr.bf16.mxu0 %v3399_v36 }
 0x101   : > { %1573 = vmatmul.mubr.bf16.gmra.mrb[48].mxu1 %v3961_v55 }
 0x102   : > { %1580 = vmatprep.mubr.bf16.mxu1 %v3912_v32 }
 0x103   : > { %3177 = vmatpush3.bf16.msra.mxu0 %v3399_v36 }
 0x104   : > { %3178 = vmatprep.subr.bf16.mxu0 %v3400_v51 }
 0x106   : > { %1990 = vmatmul.mubr.bf16.gmra.mrb[52].mxu0 %v3894_v48 }
 0x107   : > { %1997 = vmatprep.mubr.bf16.mxu0 %v3828_v52  ;;  %3179 = vmatpush3.bf16.msra.mxu0 %v3400_v51 }
 0x108   : > { %3180 = vmatprep.subr.bf16.mxu0 %v3401_v44 }
 0x109   : > { %1581 = vmatmul.mubr.bf16.gmra.mrb[52].mxu1 %v3987_v41 }
 0x10a   : > { %1588 = vmatprep.mubr.bf16.mxu1 %v3946_v14 }
 0x10b   : > { %3181 = vmatpush3.bf16.msra.mxu0 %v3401_v44 }
 0x10e   : > { %1998 = vmatmul.mubr.bf16.gmra.mrb[56].mxu0 %v3930_v56 }
 0x10f   : > { %2005 = vmatprep.mubr.bf16.mxu0 %v3875_v25 }
 0x111   : > { %1589 = vmatmul.mubr.bf16.gmra.mrb[56].mxu1 %v4011_v16 }
 0x112   : > { %3146 = vmatprep.mubr.bf16.mxu1 %v4030_v46 }
 0x116   : > { %2006 = vmatmul.mubr.bf16.gmra.mrb[60].mxu0 %v3961_v55 }
 0x117   : > { %2013 = vmatprep.mubr.bf16.mxu0 %v3912_v32 }
 0x119   : > { %3147 = vmatmul.mubr.bf16.vlgmr.msra.gmra.mrb[0].mxu1 %v3752_v54 }
 0x11a   : > { %3150 = vmatprep.mubr.bf16.mxu1 %v3782_v21  ;;  %3210 = vmatpush3.bf16.msra.mxu1 %v4005_v29 }
 0x11b   : > { %3203 = vmatprep.subr.bf16.mxu1 %v3391_v47 }
 0x11e   : > { %2014 = vmatmul.mubr.bf16.gmra.mrb[64].mxu0 %v3987_v41  ;;  %3211 = vmatpush3.bf16.msra.mxu1 %v3391_v47 }
 0x11f   : > { %2021 = vmatprep.mubr.bf16.mxu0 %v3946_v14  ;;  %3204 = vmatprep.subr.bf16.mxu1 %v3393_v45 }
 0x121   : > { %3151 = vmatmul.mubr.bf16.gmra.mrb[4].mxu1 %v3820_v50 }
 0x122   : > { %3154 = vmatprep.mubr.bf16.mxu1 %v3867_v12  ;;  %3212 = vmatpush3.bf16.msra.mxu1 %v3393_v45 }
 0x123   : > { %3205 = vmatprep.subr.bf16.mxu1 %v3395_v61 }
 0x126   : > { %2022 = vmatmul.mubr.bf16.gmra.mrb[68].mxu0 %v4011_v16  ;;  %3213 = vmatpush3.bf16.msra.mxu1 %v3395_v61 }
 0x127   : > { %2029 = vmatprep.mubr.bf16.mxu0 %v3976_v19  ;;  %3206 = vmatprep.subr.bf16.mxu1 %v3398_v2 }
 0x129   : > { %3155 = vmatmul.mubr.bf16.gmra.mrb[8].mxu1 %v3906_v17 }
 0x12a   : > { %3158 = vmatprep.mubr.bf16.mxu1 %v3941_v1  ;;  %3214 = vmatpush3.bf16.msra.mxu1 %v3398_v2 }
 0x12b   : > { %3207 = vmatprep.subr.bf16.mxu1 %v3399_v36 }
 0x12e   : > { %2030 = vmatmul.mubr.bf16.gmra.mrb[72].mxu0 %v4024_v4  ;;  %3215 = vmatpush3.bf16.msra.mxu1 %v3399_v36 }
 0x12f   : > { %2037 = vmatprep.mubr.bf16.mxu0 %v4030_v46  ;;  %3208 = vmatprep.subr.bf16.mxu1 %v3400_v51 }
 0x131   : > { %3159 = vmatmul.mubr.bf16.gmra.mrb[12].mxu1 %v3971_v5 }
 0x132   : > { %3162 = vmatprep.mubr.bf16.mxu1 %v3993_v63  ;;  %3216 = vmatpush3.bf16.msra.mxu1 %v3400_v51 }
 0x133   : > { %3209 = vmatprep.subr.bf16.mxu1 %v3401_v44 }
 0x136   : > { %2038 = vmatmul.mubr.bf16.gmra.mrb[76].mxu0 %v4030_v46  ;;  %3217 = vmatpush3.bf16.msra.mxu1 %v3401_v44 }
 0x137   : > { %3182 = vmatprep.mubr.bf16.mxu0 %v3782_v21 }
 0x139   : > { %3163 = vmatmul.mubr.bf16.gmra.mrb[16].mxu1 %v4014_v38 }
 0x13a   : > { %3190 = vmatprep.mubr.bf16.mxu1 %v3941_v1 }
 0x13e   : > { %3183 = vmatmul.mubr.bf16.vlgmr.msra.gmra.mrb[80].mxu0 %v3820_v50 }
 0x13f   : > { %3186 = vmatprep.mubr.bf16.mxu0 %v3867_v12 }
 0x141   : > { %3191 = vmatmul.mubr.bf16.vlgmr.msra.gmra.mrb[8].mxu1 %v3971_v5 }
 0x142   : > { %3194 = vmatprep.mubr.bf16.mxu1 %v3993_v63 }
 0x146   : > { %3187 = vmatmul.mubr.bf16.gmra.mrb[84].mxu0 %v3906_v17 }
 0x149   : > { %3195 = vmatmul.mubr.bf16.gmra.mrb[12].mxu1 %v4014_v38 }
 0x14a   : > { %3198 = vmatprep.mubr.bf16.mxu1 %v4021_v6 }
 0x151   : > { %3199 = vmatmul.mubr.bf16.gmra.mrb[16].mxu1 %v4030_v46 }
 0x171   : > { %v2828_v54 = vpop.f32.mrb[0].mxu0 }
 0x172   : > { %v2829_v21 = vpop.f32.mrb[1].mxu0 }
 0x173   : > { %v2830_v26 = vadd.f32 %v2829_v21, %v2828_v54  ;;  %v2831_v52 = vpop.f32.mrb[2].mxu0 }
 0x174   : > { %v2832_v20 = vpop.f32.mrb[3].mxu0 }
 0x175   : > { %v2833_v50 = vadd.f32 %v2832_v20, %v2831_v52 }
 0x179   : > { %v2834_v25 = vpop.f32.mrb[4].mxu0 }
 0x17a   : > { %v2835_v12 = vpop.f32.mrb[5].mxu0 }
 0x17b   : > { %v2836_v48 = vadd.f32 %v2835_v12, %v2834_v25  ;;  %v2837_v32 = vpop.f32.mrb[6].mxu0 }
 0x17c   : > { %v2838_v56 = vpop.f32.mrb[7].mxu0 }
 0x17d   : > { %v2839_v1 = vadd.f32 %v2838_v56, %v2837_v32 }
 0x181   : > { %v2840_v14 = vpop.f32.mrb[8].mxu0 }
 0x182   : > { %v2841_v17 = vpop.f32.mrb[9].mxu0 }
 0x183   : > { %v2842_v55 = vadd.f32 %v2841_v17, %v2840_v14  ;;  %v2843_v38 = vpop.f32.mrb[10].mxu0 }
 0x184   : > { %v2844_v5 = vpop.f32.mrb[11].mxu0 }
 0x185   : > { %v2845_v19 = vadd.f32 %v2844_v5, %v2843_v38 }
 0x189   : > { %v2846_v41 = vpop.f32.mrb[12].mxu0 }
 0x18a   : > { %v2847_v63 = vpop.f32.mrb[13].mxu0 }
 0x18b   : > { %v4144_v24 = vadd.f32 %v2847_v63, %v2846_v41  ;;  %v2849_v11 = vpop.f32.mrb[14].mxu0 }
 0x18c   : > { %v2850_v28 = vpop.f32.mrb[15].mxu0 }
 0x18d   : > { %v4146_v27 = vadd.f32 %v2850_v28, %v2849_v11 }
 0x191   : > { %v2852_v29 = vpop.f32.mrb[16].mxu0 }
 0x192   : > { %v2853_v37 = vpop.f32.mrb[17].mxu0 }
 0x193   : > { %v4148_v16 = vadd.f32 %v2853_v37, %v2852_v29  ;;  %v2855_v23 = vpop.f32.mrb[18].mxu0 }
 0x194   : > { %v2856_v8 = vpop.f32.mrb[19].mxu0 }
 0x195   : > { %v4150_v6 = vadd.f32 %v2856_v8, %v2855_v23 }
 0x199   : > { %v2858_v4 = vpop.f32.mrb[20].mxu0 }
 0x19a   : > { %v2859_v46 = vpop.f32.mrb[21].mxu0 }
 0x19b   : > { %v4152_v7 = vadd.f32 %v2859_v46, %v2858_v4  ;;  %v2861_v62 = vpop.f32.mrb[22].mxu0 }
 0x19c   : > { %v2922_v22 = vpop.f32.mrb[20].mxu1  ;;  %v2862_v10 = vpop.f32.mrb[23].mxu0 }
 0x19d   : > { %v4154_v18 = vadd.f32 %v2862_v10, %v2861_v62  ;;  %v2923_v9 = vpop.f32.mrb[21].mxu1 }
 0x19e   : > { %v2924_v53 = vadd.f32 %v2923_v9, %v2922_v22  ;;  %v2925_v33 = vpop.f32.mrb[22].mxu1 }
 0x19f   : > { %v2926_v47 = vpop.f32.mrb[23].mxu1 }
 0x1a0   : > { %v2927_v49 = vadd.f32 %v2926_v47, %v2925_v33  ;;  %v4156_v45 = vadd.f32 %v2924_v53, %v2830_v26 }
 0x1a1   : > { %v2864_v61 = vpop.f32.mrb[24].mxu0 }
 0x1a2   : > { %v2865_v2 = vpop.f32.mrb[25].mxu0  ;;  %v4158_v36 = vadd.f32 %v2927_v49, %v2833_v50 }
 0x1a3   : > { %v4160_v51 = vadd.f32 %v2865_v2, %v2864_v61  ;;  %v2867_v44 = vpop.f32.mrb[26].mxu0 }
 0x1a4   : > { %v2928_v54 = vpop.f32.mrb[24].mxu1  ;;  %v2868_v21 = vpop.f32.mrb[27].mxu0 }
 0x1a5   : > { %v4162_v52 = vadd.f32 %v2868_v21, %v2867_v44  ;;  %v2929_v20 = vpop.f32.mrb[25].mxu1 }
 0x1a6   : > { %v2930_v25 = vadd.f32 %v2929_v20, %v2928_v54  ;;  %v2931_v12 = vpop.f32.mrb[26].mxu1 }
 0x1a7   : > { %v2932_v32 = vpop.f32.mrb[27].mxu1 }
 0x1a8   : > { %v2933_v56 = vadd.f32 %v2932_v32, %v2931_v12  ;;  %v4164_v14 = vadd.f32 %v2930_v25, %v2836_v48 }
 0x1a9   : > { %v2870_v26 = vpop.f32.mrb[28].mxu0 }
 0x1aa   : > { %v2871_v17 = vpop.f32.mrb[29].mxu0  ;;  %v4166_v38 = vadd.f32 %v2933_v56, %v2839_v1 }
 0x1ab   : > { %v4168_v50 = vadd.f32 %v2871_v17, %v2870_v26  ;;  %v2873_v5 = vpop.f32.mrb[30].mxu0 }
 0x1ac   : > { %v2934_v41 = vpop.f32.mrb[28].mxu1  ;;  %v2874_v63 = vpop.f32.mrb[31].mxu0 }
 0x1ad   : > { %v4170_v11 = vadd.f32 %v2874_v63, %v2873_v5  ;;  %v2935_v28 = vpop.f32.mrb[29].mxu1 }
 0x1ae   : > { %v2936_v29 = vadd.f32 %v2935_v28, %v2934_v41  ;;  %v2937_v37 = vpop.f32.mrb[30].mxu1 }
 0x1af   : > { %v2938_v23 = vpop.f32.mrb[31].mxu1 }
 0x1b0   : > { %v2939_v8 = vadd.f32 %v2938_v23, %v2937_v37  ;;  %v4172_v4 = vadd.f32 %v2936_v29, %v2842_v55 }
 0x1b1   : > { %v2876_v48 = vpop.f32.mrb[32].mxu0 }
 0x1b2   : > { %v2877_v46 = vpop.f32.mrb[33].mxu0  ;;  %v4174_v62 = vadd.f32 %v2939_v8, %v2845_v19 }
 0x1b3   : > { %v4176_v1 = vadd.f32 %v2877_v46, %v2876_v48  ;;  %v2879_v22 = vpop.f32.mrb[34].mxu0 }
 0x1b4   : > { %v2940_v10 = vpop.f32.mrb[32].mxu1  ;;  %v2880_v9 = vpop.f32.mrb[35].mxu0 }
 0x1b5   : > { %v4178_v53 = vadd.f32 %v2880_v9, %v2879_v22  ;;  %v2941_v33 = vpop.f32.mrb[33].mxu1 }
 0x1b6   : > { %v2942_v47 = vadd.f32 %v2941_v33, %v2940_v10  ;;  %v2943_v49 = vpop.f32.mrb[34].mxu1 }
 0x1b7   : > { %v2944_v61 = vpop.f32.mrb[35].mxu1 }
 0x1b8   : > { %v2945_v2 = vadd.f32 %v2944_v61, %v2943_v49  ;;  %v4181_v44 = vadd.f32 %v2942_v47, %v4144_v24 }
 0x1b9   : > { %v2882_v55 = vpop.f32.mrb[36].mxu0 }
 0x1ba   : > { %v2883_v54 = vpop.f32.mrb[37].mxu0  ;;  %v4184_v19 = vadd.f32 %v2945_v2, %v4146_v27 }
 0x1bb   : > { %v4186_v21 = vadd.f32 %v2883_v54, %v2882_v55  ;;  %v2885_v20 = vpop.f32.mrb[38].mxu0 }
 0x1bc   : > { %v2946_v25 = vpop.f32.mrb[36].mxu1  ;;  %v2886_v12 = vpop.f32.mrb[39].mxu0 }
 0x1bd   : > { %v4188_v32 = vadd.f32 %v2886_v12, %v2885_v20  ;;  %v2947_v56 = vpop.f32.mrb[37].mxu1 }
 0x1be   : > { %v2948_v26 = vadd.f32 %v2947_v56, %v2946_v25  ;;  %v2949_v17 = vpop.f32.mrb[38].mxu1 }
 0x1bf   : > { %v2950_v5 = vpop.f32.mrb[39].mxu1 }
 0x1c0   : > { %v4191_v41 = vadd.f32 %v2948_v26, %v4148_v16  ;;  %v2951_v24 = vadd.f32 %v2950_v5, %v2949_v17 }
 0x1c1   : > { %v3016_v63 = vpop.f32.mrb[40].mxu0 }
 0x1c2   : > { %v4194_v28 = vadd.f32 %v2951_v24, %v4150_v6  ;;  %v3017_v27 = vpop.f32.mrb[41].mxu0 }
 0x1c3   : > { %v4196_v29 = vadd.f32 %v3017_v27, %v3016_v63  ;;  %v3019_v37 = vpop.f32.mrb[42].mxu0 }
 0x1c4   : > { %v2952_v23 = vpop.f32.mrb[40].mxu1  ;;  %v3020_v8 = vpop.f32.mrb[43].mxu0 }
 0x1c5   : > { %v2953_v48 = vpop.f32.mrb[41].mxu1  ;;  %v4198_v46 = vadd.f32 %v3020_v8, %v3019_v37 }
 0x1c6   : > { %v2954_v22 = vadd.f32 %v2953_v48, %v2952_v23  ;;  %v2955_v10 = vpop.f32.mrb[42].mxu1 }
 0x1c7   : > { %v2956_v9 = vpop.f32.mrb[43].mxu1 }
 0x1c8   : > { %v4201_v16 = vadd.f32 %v2954_v22, %v4152_v7  ;;  %v2957_v33 = vadd.f32 %v2956_v9, %v2955_v10 }
 0x1c9   : > { %v3022_v47 = vpop.f32.mrb[44].mxu0 }
 0x1ca   : > { %v4204_v6 = vadd.f32 %v2957_v33, %v4154_v18  ;;  %v3023_v49 = vpop.f32.mrb[45].mxu0 }
 0x1cb   : > { %v4206_v61 = vadd.f32 %v3023_v49, %v3022_v47  ;;  %v3025_v2 = vpop.f32.mrb[46].mxu0 }
 0x1cc   : > { %v2958_v55 = vpop.f32.mrb[44].mxu1  ;;  %v3026_v54 = vpop.f32.mrb[47].mxu0 }
 0x1cd   : > { %v2959_v20 = vpop.f32.mrb[45].mxu1  ;;  %v4208_v25 = vadd.f32 %v3026_v54, %v3025_v2 }
 0x1ce   : > { %v2960_v12 = vadd.f32 %v2959_v20, %v2958_v55  ;;  %v2961_v56 = vpop.f32.mrb[46].mxu1 }
 0x1cf   : > { %v2962_v26 = vpop.f32.mrb[47].mxu1 }
 0x1d0   : > { %v4211_v7 = vadd.f32 %v2960_v12, %v4160_v51  ;;  %v2963_v17 = vadd.f32 %v2962_v26, %v2961_v56 }
 0x1d1   : > { %v3028_v5 = vpop.f32.mrb[48].mxu0 }
 0x1d2   : > { %v4214_v18 = vadd.f32 %v2963_v17, %v4162_v52  ;;  %v3029_v24 = vpop.f32.mrb[49].mxu0 }
 0x1d3   : > { %v4216_v63 = vadd.f32 %v3029_v24, %v3028_v5  ;;  %v3031_v27 = vpop.f32.mrb[50].mxu0 }
 0x1d4   : > { %v2964_v37 = vpop.f32.mrb[48].mxu1  ;;  %v3032_v23 = vpop.f32.mrb[51].mxu0 }
 0x1d5   : > { %v2965_v8 = vpop.f32.mrb[49].mxu1  ;;  %v4218_v48 = vadd.f32 %v3032_v23, %v3031_v27 }
 0x1d6   : > { %v2966_v22 = vadd.f32 %v2965_v8, %v2964_v37  ;;  %v2967_v10 = vpop.f32.mrb[50].mxu1 }
 0x1d7   : > { %v2968_v9 = vpop.f32.mrb[51].mxu1 }
 0x1d8   : > { %v4221_v51 = vadd.f32 %v2966_v22, %v4168_v50  ;;  %v2969_v33 = vadd.f32 %v2968_v9, %v2967_v10 }
 0x1d9   : > { %v3034_v47 = vpop.f32.mrb[52].mxu0 }
 0x1da   : > { %v4224_v52 = vadd.f32 %v2969_v33, %v4170_v11  ;;  %v3035_v49 = vpop.f32.mrb[53].mxu0 }
 0x1db   : > { %v3036_v2 = vadd.f32 %v3035_v49, %v3034_v47  ;;  %v3037_v55 = vpop.f32.mrb[54].mxu0 }
 0x1dc   : > { %v2970_v54 = vpop.f32.mrb[52].mxu1  ;;  %v3038_v20 = vpop.f32.mrb[55].mxu0 }
 0x1dd   : > { %v2971_v12 = vpop.f32.mrb[53].mxu1  ;;  %v3039_v56 = vadd.f32 %v3038_v20, %v3037_v55 }
 0x1de   : > { %v2972_v26 = vadd.f32 %v2971_v12, %v2970_v54  ;;  %v2973_v17 = vpop.f32.mrb[54].mxu1 }
 0x1df   : > { %v2974_v5 = vpop.f32.mrb[55].mxu1 }
 0x1e0   : > { %v4227_v24 = vadd.f32 %v2972_v26, %v4176_v1  ;;  %v2975_v50 = vadd.f32 %v2974_v5, %v2973_v17 }
 0x1e1   : > { %v3040_v27 = vpop.f32.mrb[56].mxu0 }
 0x1e2   : > { %v4230_v37 = vadd.f32 %v2975_v50, %v4178_v53  ;;  %v3041_v11 = vpop.f32.mrb[57].mxu0 }
 0x1e3   : > { %v3042_v23 = vadd.f32 %v3041_v11, %v3040_v27  ;;  %v3043_v8 = vpop.f32.mrb[58].mxu0 }
 0x1e4   : > { %v2976_v22 = vpop.f32.mrb[56].mxu1  ;;  %v3044_v10 = vpop.f32.mrb[59].mxu0 }
 0x1e5   : > { %v2977_v9 = vpop.f32.mrb[57].mxu1  ;;  %v3045_v33 = vadd.f32 %v3044_v10, %v3043_v8  ;;  %v4233_v47 = vadd.f32 %v4191_v41, %v3042_v23 }
 0x1e6   : > { %v2978_v49 = vadd.f32 %v2977_v9, %v2976_v22  ;;  %v2979_v55 = vpop.f32.mrb[58].mxu1 }
 0x1e7   : > { %v2980_v54 = vpop.f32.mrb[59].mxu1  ;;  %v4236_v1 = vadd.f32 %v4194_v28, %v3045_v33 }
 0x1e8   : > { %v4239_v20 = vadd.f32 %v2978_v49, %v4186_v21  ;;  %v2981_v53 = vadd.f32 %v2980_v54, %v2979_v55 }
 0x1e9   : > { %v3046_v12 = vpop.f32.mrb[60].mxu0 }
 0x1ea   : > { %v4242_v26 = vadd.f32 %v2981_v53, %v4188_v32  ;;  %v3047_v17 = vpop.f32.mrb[61].mxu0 }
 0x1eb   : > { %v3048_v5 = vadd.f32 %v3047_v17, %v3046_v12  ;;  %v3049_v50 = vpop.f32.mrb[62].mxu0 }
 0x1ec   : > { %v3148_v27 = vpop.f32.mrb[0].mxu1  ;;  %v3050_v41 = vpop.f32.mrb[63].mxu0 }
 0x1ed   : > { %v3219_v11 = vadd.f32 %v4164_v14, %v3148_v27  ;;  %v1631_v23 = vpop.f32.mrb[1].mxu1  ;;  %v3051_v8 = vadd.f32 %v3050_v41, %v3049_v50  ;;  %v4246_v28 = vadd.f32 %v4201_v16, %v3048_v5 }
 0x1ee   : > { %v3223_v21 = vadd.f32 %v4156_v45, %v1631_v23  ;;  %v3149_v22 = vpop.f32.mrb[2].mxu1 }
 0x1ef   : > { %v3227_v10 = vadd.f32 %v4166_v38, %v3149_v22  ;;  %v1634_v9 = vpop.f32.mrb[3].mxu1  ;;  %v3220_v32 = vadd.f32 %v3219_v11, %v4206_v61  ;;  %v4252_v33 = vadd.f32 %v4204_v6, %v3051_v8 }
 0x1f0   : > { %v3231_v49 = vadd.f32 %v4158_v36, %v1634_v9  ;;  %v3224_v14 = vadd.f32 %v3223_v21, %v4196_v29 }
 0x1f1   : > { %v3052_v55 = vpop.f32.mrb[64].mxu0  ;;  %v3228_v54 = vadd.f32 %v3227_v10, %v4208_v25 }
 0x1f2   : > { %v3053_v16 = vpop.f32.mrb[65].mxu0  ;;  %v3232_v53 = vadd.f32 %v3231_v49, %v4198_v46 }
 0x1f3   : > { %v3054_v45 = vadd.f32 %v3053_v16, %v3052_v55  ;;  %v3055_v12 = vpop.f32.mrb[66].mxu0 }
 0x1f4   : > { %v3152_v17 = vpop.f32.mrb[4].mxu1  ;;  %v3056_v38 = vpop.f32.mrb[67].mxu0 }
 0x1f5   : > { %v3235_v5 = vadd.f32 %v4181_v44, %v3152_v17  ;;  %v1647_v61 = vpop.f32.mrb[5].mxu1  ;;  %v3057_v50 = vadd.f32 %v3056_v38, %v3055_v12  ;;  %v4260_v6 = vadd.f32 %v4211_v7, %v3054_v45 }
 0x1f6   : > { %v3239_v36 = vadd.f32 %v4172_v4, %v1647_v61  ;;  %v3153_v29 = vpop.f32.mrb[6].mxu1 }
 0x1f7   : > { %v3243_v27 = vadd.f32 %v4184_v19, %v3153_v29  ;;  %v1650_v25 = vpop.f32.mrb[7].mxu1  ;;  %v4264_v41 = vadd.f32 %v3235_v5, %v3036_v2  ;;  %v4267_v46 = vadd.f32 %v4214_v18, %v3057_v50 }
 0x1f8   : > { %v3247_v11 = vadd.f32 %v4174_v62, %v1650_v25  ;;  %v4271_v44 = vadd.f32 %v3239_v36, %v4216_v63 }
 0x1f9   : > { %v3058_v23 = vpop.f32.mrb[68].mxu0  ;;  %v4273_v8 = vadd.f32 %v3243_v27, %v3039_v56 }
 0x1fa   : > { %v3059_v7 = vpop.f32.mrb[69].mxu0  ;;  %v4276_v4 = vadd.f32 %v3247_v11, %v4218_v48 }
 0x1fb   : > { %v3060_v21 = vadd.f32 %v3059_v7, %v3058_v23  ;;  %v3061_v19 = vpop.f32.mrb[70].mxu0 }
 0x1fc   : > { %v3062_v22 = vpop.f32.mrb[71].mxu0 }
 0x1fd   : > { %v3063_v2 = vadd.f32 %v3062_v22, %v3061_v19  ;;  %v4279_v10 = vadd.f32 %v4221_v51, %v3060_v21 }
 0x1ff   : > { %v4282_v18 = vadd.f32 %v4224_v52, %v3063_v2 }
 0x201   : > { %v3064_v62 = vpop.f32.mrb[72].mxu0 }
 0x202   : > { %v3065_v63 = vpop.f32.mrb[73].mxu0 }
 0x203   : > { %v3066_v9 = vadd.f32 %v3065_v63, %v3064_v62  ;;  %v3067_v49 = vpop.f32.mrb[74].mxu0 }
 0x204   : > { %v3068_v56 = vpop.f32.mrb[75].mxu0 }
 0x205   : > { %v3069_v55 = vadd.f32 %v3068_v56, %v3067_v49  ;;  %v4285_v16 = vadd.f32 %v4227_v24, %v3066_v9  ;;  %v4299_v24 = vld [vmem:[%s4412_s6] ss:$0 sm:$0xff] }
 0x207   : > { %v4288_v48 = vadd.f32 %v4230_v37, %v3069_v55 }
 0x209   : > { %v3070_v45 = vpop.f32.mrb[76].mxu0 }
 0x20a   : > { %v3071_v12 = vpop.f32.mrb[77].mxu0 }
 0x20b   : > { %v3072_v17 = vadd.f32 %v3071_v12, %v3070_v45  ;;  %v3073_v51 = vpop.f32.mrb[78].mxu0 }
 0x20c   : > { %v3074_v38 = vpop.f32.mrb[79].mxu0 }
 0x20d   : > { %v3075_v5 = vadd.f32 %v3074_v38, %v3073_v51  ;;  %v4291_v52 = vadd.f32 %v4239_v20, %v3072_v17 }
 0x20f   : > { %v4294_v61 = vadd.f32 %v4242_v26, %v3075_v5 }
 0x211   : > { %v3184_v50 = vpop.f32.mrb[80].mxu0 }
 0x212   : > { %v3221_v36 = vadd.f32 %v3220_v32, %v3184_v50  ;;  %v2080_v37 = vpop.f32.mrb[81].mxu0 }
 0x213   : > { %v3225_v29 = vadd.f32 %v3224_v14, %v2080_v37  ;;  %v3185_v27 = vpop.f32.mrb[82].mxu0 }
 0x214   : > { %v3229_v25 = vadd.f32 %v3228_v54, %v3185_v27  ;;  %v3192_v11 = vpop.f32.mrb[8].mxu1  ;;  %v2083_v23 = vpop.f32.mrb[83].mxu0  ;;  %v2188_v20 = vadd.f32 %v3221_v36, %v4299_v24 }
 0x215   : > { %v2186_v7 = vadd.f32 %v3225_v29, %v4299_v24  ;;  %v3252_v26 = vadd.f32 %v4246_v28, %v3192_v11  ;;  %v3233_v21 = vadd.f32 %v3232_v53, %v2083_v23  ;;  %v2112_v32 = vpop.f32.mrb[9].mxu1 }
 0x216   : > { %v2189_v19 = vadd.f32 %v3229_v25, %v4299_v24  ;;  %v3255_v22 = vadd.f32 %v4233_v47, %v2112_v32  ;;  %v3193_v2 = vpop.f32.mrb[10].mxu1  ;;  %v2308_v63 = vmul.f32 %v2188_v20, %v3658_v39 }
 0x217   : > { %v2306_v62 = vmul.f32 %v2186_v7, %v3660_v40  ;;  %v2187_v14 = vadd.f32 %v3233_v21, %v4299_v24  ;;  %v3258_v28 = vadd.f32 %v4252_v33, %v3193_v2  ;;  %v2115_v54 = vpop.f32.mrb[11].mxu1  ;;  %v4321_v56 = vadd.f32 %v3252_v26, %v4299_v24 }
 0x218   : > { %v2752_v53 = vpack.c.bf16 %v2189_v19, %v2188_v20  ;;  %v2309_v49 = vmul.f32 %v2189_v19, %v3675_v58  ;;  %v3261_v45 = vadd.f32 %v4236_v1, %v2115_v54  ;;  %v4330_v38 = vadd.f32 %v3255_v22, %v4299_v24 }
 0x219   : > { %v2747_v47 = vpack.c.bf16 %v2187_v14, %v2186_v7  ;;  %v2307_v9 = vmul.f32 %v2187_v14, %v3677_v59  ;;  %v3188_v40 = vpop.f32.mrb[84].mxu0  ;;  %v4324_v55 = vadd.f32 %v3258_v28, %v4299_v24  ;;  %v2351_v12 = vmul.f32 %v2306_v62, %v2186_v7 }
 0x21a   : > { %2803 = vst [vmem:[%s4312_s12 + $0x8] sm:$0xff] %v2752_v53   ;;  %v2096_v33 = vpop.f32.mrb[85].mxu0  ;;  %v3237_v59 = vadd.f32 %v4264_v41, %v3188_v40  ;;  %v4335_v5 = vadd.f32 %v3261_v45, %v4299_v24  ;;  %v2353_v36 = vmul.f32 %v2308_v63, %v2188_v20  ;;  %v2354_v7 = vmul.f32 %v2309_v49, %v2189_v19 }
 0x21b   : > { %2748 = vst [vmem:[%s4312_s12] sm:$0xff] %v2747_v47   ;;  %v2326_v39 = vadd.f32 %v2307_v9, %v2306_v62  ;;  %v2352_v17 = vmul.f32 %v2307_v9, %v2187_v14  ;;  %v3189_v51 = vpop.f32.mrb[86].mxu0  ;;  %v2772_v58 = vpack.c.bf16 %v4324_v55, %v4321_v56  ;;  %v3241_v27 = vadd.f32 %v4271_v44, %v2096_v33 }
 0x21c   : > { %v3196_v50 = vpop.f32.mrb[12].mxu1  ;;  %v2099_v1 = vpop.f32.mrb[87].mxu0  ;;  %v2767_v41 = vpack.c.bf16 %v4335_v5, %v4330_v38  ;;  %v3245_v11 = vadd.f32 %v4273_v8, %v3189_v51  ;;  %v2192_v20 = vadd.f32 %v3237_v59, %v4299_v24 }
 0x21d   : > { %v2327_v37 = vadd.f32 %v2326_v39, %v2308_v63  ;;  %v2371_v29 = vadd.f32 %v2352_v17, %v2351_v12  ;;  %v2128_v25 = vpop.f32.mrb[13].mxu1  ;;  %2807 = vst [vmem:[%s4312_s12 + $0x28] sm:$0xff] %v2772_v58   ;;  %v2190_v21 = vadd.f32 %v3241_v27, %v4299_v24  ;;  %v3264_v2 = vadd.f32 %v4279_v10, %v3196_v50 }
 0x21e   : > { %v3197_v23 = vpop.f32.mrb[14].mxu1  ;;  %2806 = vst [vmem:[%s4312_s12 + $0x20] sm:$0xff] %v2767_v41   ;;  %v2193_v44 = vadd.f32 %v3245_v11, %v4299_v24  ;;  %v3249_v62 = vadd.f32 %v4276_v4, %v2099_v1  ;;  %v3267_v19 = vadd.f32 %v4260_v6, %v2128_v25  ;;  %v2312_v9 = vmul.f32 %v2192_v20, %v3725_v35 }
 0x21f   : > { %v2372_v26 = vadd.f32 %v2371_v29, %v2353_v36  ;;  %v2328_v32 = vadd.f32 %v2327_v37, %v2309_v49  ;;  %v2131_v22 = vpop.f32.mrb[15].mxu1  ;;  %v2310_v14 = vmul.f32 %v2190_v21, %v3701_v15  ;;  %v3270_v47 = vadd.f32 %v4282_v18, %v3197_v23 }
 0x220   : > { %v2762_v28 = vpack.c.bf16 %v2193_v44, %v2192_v20  ;;  %v2191_v54 = vadd.f32 %v3249_v62, %v4299_v24  ;;  %v2200_v15 = vadd.f32 %v3264_v2, %v4299_v24  ;;  %v3273_v45 = vadd.f32 %v4267_v46, %v2131_v22 }
 0x221   : > { %v2373_v8 = vadd.f32 %v2372_v26, %v2354_v7  ;;  %v2329_v53 = vadd.f32 %v2328_v32, %v2310_v14  ;;  %v2355_v63 = vmul.f32 %v2310_v14, %v2190_v21  ;;  %v4357_v6 = vadd.f32 %v3270_v47, %v4299_v24 }
 0x222   : > { %2805 = vst [vmem:[%s4312_s12 + $0x18] sm:$0xff] %v2762_v28   ;;  %v2757_v40 = vpack.c.bf16 %v2191_v54, %v2190_v21  ;;  %v2311_v10 = vmul.f32 %v2191_v54, %v3699_v13  ;;  %v2313_v12 = vmul.f32 %v2193_v44, %v3723_v34  ;;  %v2314_v13 = vmul.f32 %v4330_v38, %v3759_v0 }
 0x223   : > { %v2374_v49 = vadd.f32 %v2373_v8, %v2355_v63  ;;  %v2198_v59 = vadd.f32 %v3267_v19, %v4299_v24  ;;  %v2782_v51 = vpack.c.bf16 %v4357_v6, %v2200_v15  ;;  %v2199_v46 = vadd.f32 %v3273_v45, %v4299_v24 }
 0x224   : > { %v3200_v4 = vpop.f32.mrb[16].mxu1  ;;  %2804 = vst [vmem:[%s4312_s12 + $0x10] sm:$0xff] %v2757_v40   ;;  %v2330_v18 = vadd.f32 %v2329_v53, %v2311_v10  ;;  %v2356_v35 = vmul.f32 %v2311_v10, %v2191_v54  ;;  %v2357_v50 = vmul.f32 %v2312_v9, %v2192_v20  ;;  %v2315_v0 = vmul.f32 %v4335_v5, %v3757_v60 }
 0x225   : > { %v2144_v33 = vpop.f32.mrb[17].mxu1  ;;  %v3276_v39 = vadd.f32 %v4291_v52, %v3200_v4  ;;  %2809 = vst [vmem:[%s4312_s12 + $0x38] sm:$0xff] %v2782_v51   ;;  %v2777_v37 = vpack.c.bf16 %v2199_v46, %v2198_v59  ;;  %v2358_v29 = vmul.f32 %v2313_v12, %v2193_v44  ;;  %v2359_v7 = vmul.f32 %v2314_v13, %v4330_v38  ;;  %v4423_v4 = vld [vmem:[#allocation4_spill] sm:$0xff] }
 0x226   : > { %v3201_v17 = vpop.f32.mrb[18].mxu1  ;;  %v2331_v1 = vadd.f32 %v2330_v18, %v2312_v9  ;;  %v2375_v34 = vadd.f32 %v2374_v49, %v2356_v35  ;;  %v3279_v36 = vadd.f32 %v4285_v16, %v2144_v33  ;;  %v2316_v16 = vmul.f32 %v4321_v56, %v3796_v31  ;;  %v4424_v33 = vld [vmem:[#allocation3_spill] sm:$0xff] }
 0x227   : > { %v2147_v58 = vpop.f32.mrb[19].mxu1  ;;  %v3282_v52 = vadd.f32 %v4294_v61, %v3201_v17  ;;  %2808 = vst [vmem:[%s4312_s12 + $0x30] sm:$0xff] %v2777_v37   ;;  %v2204_v41 = vadd.f32 %v3276_v39, %v4299_v24  ;;  %v2317_v22 = vmul.f32 %v4324_v55, %v3794_v30  ;;  %v2360_v20 = vmul.f32 %v2315_v0, %v4335_v5 }
 0x228   : > { %v2332_v27 = vadd.f32 %v2331_v1, %v2313_v12  ;;  %v2376_v25 = vadd.f32 %v2375_v34, %v2357_v50  ;;  %v3285_v23 = vadd.f32 %v4288_v48, %v2147_v58  ;;  %v2202_v60 = vadd.f32 %v3279_v36, %v4299_v24  ;;  %v4425_v12 = vld [vmem:[#allocation6_spill] sm:$0xff] }
 0x229   : > { %v2205_v11 = vadd.f32 %v3282_v52, %v4299_v24  ;;  %v2361_v31 = vmul.f32 %v2316_v16, %v4321_v56  ;;  %v2318_v38 = vmul.f32 %v2198_v59, %v3839_v3  ;;  %v2362_v8 = vmul.f32 %v2317_v22, %v4324_v55 }
 0x22a   : > { %v2333_v61 = vadd.f32 %v2332_v27, %v2314_v13  ;;  %v2377_v26 = vadd.f32 %v2376_v25, %v2358_v29  ;;  %v2203_v32 = vadd.f32 %v3285_v23, %v4299_v24  ;;  %v2319_v28 = vmul.f32 %v2199_v46, %v3837_v57 }
 0x22b   : > { %v2792_v21 = vpack.c.bf16 %v2205_v11, %v2204_v41  ;;  %v2320_v30 = vmul.f32 %v2200_v15, %v3886_v43  ;;  %v2363_v54 = vmul.f32 %v2318_v38, %v2198_v59  ;;  %v2321_v56 = vmul.f32 %v4357_v6, %v3884_v42  ;;  %v4426_v42 = vld [vmem:[#allocation5_spill] sm:$0xff] }
 0x22c   : > { %v2378_v44 = vadd.f32 %v2377_v26, %v2359_v7  ;;  %v2334_v48 = vadd.f32 %v2333_v61, %v2315_v0  ;;  %v2787_v2 = vpack.c.bf16 %v2203_v32, %v2202_v60  ;;  %v2364_v3 = vmul.f32 %v2319_v28, %v2199_v46 }
 0x22d   : > { %2811 = vst [vmem:[%s4312_s12 + $0x48] sm:$0xff] %v2792_v21   ;;  %v2365_v9 = vmul.f32 %v2320_v30, %v2200_v15  ;;  %v2322_v55 = vmul.f32 %v2202_v60, %v4423_v4  ;;  %v2366_v49 = vmul.f32 %v2321_v56, %v4357_v6  ;;  %v2323_v43 = vmul.f32 %v2203_v32, %v4424_v33 }
 0x22e   : > { %v2335_v62 = vadd.f32 %v2334_v48, %v2316_v16  ;;  %v2379_v14 = vadd.f32 %v2378_v44, %v2360_v20  ;;  %2810 = vst [vmem:[%s4312_s12 + $0x40] sm:$0xff] %v2787_v2   ;;  %v2324_v18 = vmul.f32 %v2204_v41, %v4425_v12  ;;  %v2325_v59 = vmul.f32 %v2205_v11, %v4426_v42 }
 0x22f   : > { %v2367_v39 = vmul.f32 %v2322_v55, %v2202_v60  ;;  %v2368_v15 = vmul.f32 %v2323_v43, %v2203_v32 }
 0x230   : > { %v2336_v19 = vadd.f32 %v2335_v62, %v2317_v22  ;;  %v2380_v24 = vadd.f32 %v2379_v14, %v2361_v31  ;;  %v2369_v46 = vmul.f32 %v2324_v18, %v2204_v41  ;;  %v2370_v1 = vmul.f32 %v2325_v59, %v2205_v11 }
 0x232   : > { %v2337_v5 = vadd.f32 %v2336_v19, %v2318_v38  ;;  %v2381_v53 = vadd.f32 %v2380_v24, %v2362_v8 }
 0x234   : > { %v2382_v63 = vadd.f32 %v2381_v53, %v2363_v54  ;;  %v2338_v47 = vadd.f32 %v2337_v5, %v2319_v28 }
 0x236   : > { %v2339_v40 = vadd.f32 %v2338_v47, %v2320_v30  ;;  %v2383_v10 = vadd.f32 %v2382_v63, %v2364_v3 }
 0x238   : > { %v2384_v45 = vadd.f32 %v2383_v10, %v2365_v9  ;;  %v2340_v57 = vadd.f32 %v2339_v40, %v2321_v56 }
 0x23a   : > { %v2341_v35 = vadd.f32 %v2340_v57, %v2322_v55  ;;  %v2385_v17 = vadd.f32 %v2384_v45, %v2366_v49 }
 0x23c   : > { %v2386_v13 = vadd.f32 %v2385_v17, %v2367_v39  ;;  %v2342_v51 = vadd.f32 %v2341_v35, %v2323_v43 }
 0x23e   : > { %v2343_v58 = vadd.f32 %v2342_v51, %v2324_v18  ;;  %v2387_v50 = vadd.f32 %v2386_v13, %v2368_v15 }
 0x240   : > { %v2344_v6 = vadd.f32 %v2343_v58, %v2325_v59  ;;  %v2388_v34 = vadd.f32 %v2387_v50, %v2369_v46 }
 0x242   : > { %v2345_v36 = vrot.slane %v2344_v6, 4  ;;  %v2389_v37 = vadd.f32 %v2388_v34, %v2370_v1 }
 0x244   : > { %v2346_v52 = vadd.f32 %v2345_v36, %v2344_v6  ;;  %v2390_v0 = vrot.slane %v2389_v37, 4 }
 0x246   : > { %v2347_v29 = vrot.slane %v2346_v52, 2  ;;  %v2391_v27 = vadd.f32 %v2390_v0, %v2389_v37 }
 0x248   : > { %v2348_v25 = vadd.f32 %v2347_v29, %v2346_v52  ;;  %v2392_v23 = vrot.slane %v2391_v27, 2 }
 0x24a   : > { %v2349_v16 = vrot.slane %v2348_v25, 1  ;;  %v2393_v7 = vadd.f32 %v2392_v23, %v2391_v27 }
 0x24c   : > { %v2394_v61 = vrot.slane %v2393_v7, 1  ;;  %v2350_v41 = vadd.f32 %v2349_v16, %v2348_v25 }
 0x24e   : > { %v2395_v11 = vadd.f32 %v2394_v61, %v2393_v7 }
 0x250   : > { %v2397_v26 = vsel %vm2396_vm2, %v2350_v41, %v2395_v11 }
 0x251   : > { %2398 = vst [vmem:[%s316_s15] sm:$0x3] %v2397_v26 }
 0x252 PF: > { %s19_s27 = sadd.s32 1, %s3411_s27  }
 0x253   : > { %p16_p4 = scmp.ge.s32.totalorder %s19_s27, 4  }
 0x255   :  { %18 = sbr.rel (!%p16_p4) target bundleno = 1 (0x1), region = 92 }

</bundles_post_ra>
